<compile_context>
chip_gen: v6e
topology: v6e:2x2x1
jax: 0.10.0
libtpu: 0.0.40
codegen_flags: <defaults>
</compile_context>

<pallas_src>
import math
import functools

import jax
import jax.numpy as jnp
from jax import lax
from jax.experimental import pallas as pl
from jax.experimental.pallas import tpu as pltpu


_VMEM_LIMIT_BYTES = 32 * 1024 * 1024   # explicit scoped-VMEM budget (all gens)


def _multi_tensorcore():
    """Heuristic: does this chip have >1 TensorCore (megacore / v7x)?"""
    try:
        kind = jax.devices()[0].device_kind.lower()
    except Exception:
        return False
    return any(tag in kind for tag in ("v7", "tpu7", "v4", "v5p"))


def _const_spec(shape, index_map, single_buffer):
    """BlockSpec for an operand whose block never changes across the grid.
    single_buffer=True avoids the wasted second pipeline buffer."""
    if single_buffer:
        return pl.BlockSpec(shape, index_map, pipeline_mode=pl.Buffered(1))
    return pl.BlockSpec(shape, index_map)


# --------------------------------------------------------------------------
# Pallas kernel 1: fused 1x1 conv (matmul) + GroupNorm(32), multi-image block
# --------------------------------------------------------------------------
def _conv_gn_kernel(x_ref, w_ref, gsel_ref, affine_ref, o_ref, *, groups, eps):
    # x_ref:      (Bb, HW, Cin)  bf16   Bb images per grid step (Cin lane-padded)
    # w_ref:      (Cin, Cout)    bf16   1x1-conv weight as a matmul
    # gsel_ref:   (Cout, Cout)   bf16   0/1 block-diagonal group selector
    # affine_ref: (3, Cout)      f32    rows = [conv bias, gn gamma, gn beta]
    # o_ref:      (Bb, HW, Cout) bf16
    Bb, HW, Cin = x_ref.shape
    Cout = w_ref.shape[1]
    cpg = Cout // groups
    inv_cnt = 1.0 / float(HW * cpg)
    hwf = float(HW)

    aff = affine_ref[...]                                    # (3, Cout)
    b = aff[0:1, :]                                          # conv bias
    gamma = aff[1:2, :]
    beta = aff[2:3, :]

    # fold batch into M so the MXU sees one (Bb*HW, Cin) x (Cin, Cout) matmul.
    # bias is NOT added here: it is folded into the stats / shift below.
    x2 = x_ref[...].reshape(Bb * HW, Cin)
    y = jnp.dot(x2, w_ref[...], preferred_element_type=jnp.float32)
    y3 = y.reshape(Bb, HW, Cout)                             # (Bb, HW, Cout) f32

    # per-image per-channel raw sums of y; bias corrections are (Bb, Cout)-sized
    s = jnp.sum(y3, axis=1)                                  # sum(y)
    ss = jnp.sum(y3 * y3, axis=1)                            # sum(y^2)
    s_b = s + hwf * b                                        # sum(y + b)
    ss_b = ss + 2.0 * b * s + hwf * (b * b)                  # sum((y + b)^2)

    # channel -> group mean (broadcast back to channels) via one bf16 MXU pass
    gsel = gsel_ref[...]
    mean_c = jnp.dot(s_b.astype(jnp.bfloat16), gsel,
                     preferred_element_type=jnp.float32) * inv_cnt
    msq_c = jnp.dot(ss_b.astype(jnp.bfloat16), gsel,
                    preferred_element_type=jnp.float32) * inv_cnt
    var_c = jnp.maximum(msq_c - mean_c * mean_c, 0.0)        # clamp >= 0
    inv_c = lax.rsqrt(var_c + eps)
    # TODO(synk): at production HW (~10k rows) switch to a two-pass (centered)
    # variance to avoid E[y^2]-E[y]^2 cancellation.

    scale = inv_c * gamma                                    # (Bb, Cout)
    shift = (b - mean_c) * scale + beta                      # conv bias folded in

    o_ref[...] = (y3 * scale[:, None, :] + shift[:, None, :]).astype(o_ref.dtype)


def _pick_batch_block(N, HW, Cin, Cout, prefer_split):
    """Largest batch block whose double-buffered working set fits the VMEM
    budget; prefer M = Bb*HW >= 256.  On multi-TC chips prefer >= 2 grid steps
    (for megacore sharding) as long as each step keeps M >= 256."""
    const_bytes = Cin * Cout * 2 + Cout * Cout * 2 + 3 * Cout * 4

    def fits(bb):
        in_b = 2 * bb * HW * Cin * 2     # double-buffered bf16 input
        out_b = 2 * bb * HW * Cout * 2   # double-buffered bf16 output
        mid = 2 * bb * HW * Cout * 4     # f32 matmul result + squared temp
        return in_b + out_b + mid + const_bytes <= 0.8 * _VMEM_LIMIT_BYTES

    divs = [d for d in range(1, N + 1) if N % d == 0 and fits(d)]
    if not divs:
        # TODO(synk): HW-tiled two-pass GroupNorm needed when even Bb=1 does
        # not fit (production Cin/HW on v7x).
        return 1
    best = max(divs)
    if prefer_split:
        split = [d for d in divs if (N // d) >= 2 and d * HW >= 256]
        if split:
            best = max(split)
    return best


def conv1x1_groupnorm(x_nlc, w, bias, gamma, beta, *, groups=32, eps=1e-5,
                      batch_block=None):
    """PyTorch: Conv2d(Cin, Cout, 1) -> GroupNorm(groups, Cout), channels-last
    (N, HW, Cin) -> (N, HW, Cout) (no NCHW transposes).  Output is bf16."""
    N, HW, Cin = x_nlc.shape
    Cout = w.shape[1]
    assert Cout % groups == 0
    cpg = Cout // groups

    # pad channels to a lane-dense multiple of 128 (exact: extra K is zero)
    Cin_pad = ((max(Cin, 128) + 127) // 128) * 128
    x_pad = x_nlc.astype(jnp.bfloat16)
    w_pad = w.astype(jnp.bfloat16)
    if Cin_pad != Cin:
        x_pad = jnp.pad(x_pad, ((0, 0), (0, 0), (0, Cin_pad - Cin)))
        w_pad = jnp.pad(w_pad, ((0, Cin_pad - Cin), (0, 0)))

    if batch_block is None:
        batch_block = _pick_batch_block(N, HW, Cin_pad, Cout, _multi_tensorcore())
    assert N % batch_block == 0
    grid = (N // batch_block,)

    affine = jnp.stack([bias, gamma, beta]).astype(jnp.float32)      # (3, Cout)
    gid = jnp.arange(Cout) // cpg
    gsel = (gid[:, None] == gid[None, :]).astype(jnp.bfloat16)       # exact 0/1

    def _run(single_buffer_consts):
        return pl.pallas_call(
            functools.partial(_conv_gn_kernel, groups=groups, eps=eps),
            out_shape=jax.ShapeDtypeStruct((N, HW, Cout), jnp.bfloat16),
            grid=grid,
            in_specs=[
                pl.BlockSpec((batch_block, HW, Cin_pad), lambda n: (n, 0, 0)),
                _const_spec((Cin_pad, Cout), lambda n: (0, 0), single_buffer_consts),
                _const_spec((Cout, Cout), lambda n: (0, 0), single_buffer_consts),
                _const_spec((3, Cout), lambda n: (0, 0), single_buffer_consts),
            ],
            out_specs=pl.BlockSpec((batch_block, HW, Cout), lambda n: (n, 0, 0)),
            compiler_params=pltpu.CompilerParams(
                dimension_semantics=("parallel",),
                vmem_limit_bytes=_VMEM_LIMIT_BYTES),
        )(x_pad, w_pad, gsel, affine)

    try:
        return _run(True)
    except Exception:
        # pipeline_mode=pl.Buffered(1) unsupported on this JAX build: fall back
        return _run(False)


# --------------------------------------------------------------------------
# Pallas kernel 2: all four classification heads fused into one matmul
# --------------------------------------------------------------------------
def _fused_head_kernel(x_ref, w_ref, b_ref, o_ref):
    o_ref[...] = (jnp.dot(x_ref[...], w_ref[...],
                          preferred_element_type=jnp.float32)
                  + b_ref[...]).astype(o_ref.dtype)


def fused_heads(hs, heads, bs, t):
    """hs: (L, N, Q, D).  heads: list of 4 dicts {'w': (D,K_i), 'b': (K_i,)}.
    Head q reads query slot q of hs.  One lane-dense (K padded to 128) matmul
    produces all heads for all query slots; results are sliced per head."""
    L, N, Q, D = hs.shape
    nheads = len(heads)
    assert Q >= nheads, "fused_heads needs at least one query slot per head"
    ks = [h['w'].shape[1] for h in heads]
    ktot = sum(ks)
    kpad = ((max(ktot, 128) + 127) // 128) * 128

    w_cat = jnp.concatenate([h['w'] for h in heads], axis=1)        # (D, ktot)
    b_cat = jnp.concatenate([h['b'] for h in heads], axis=0)        # (ktot,)
    w_pad = jnp.pad(w_cat, ((0, 0), (0, kpad - ktot))).astype(jnp.bfloat16)
    b_pad = jnp.pad(b_cat, (0, kpad - ktot)).reshape(1, kpad).astype(jnp.float32)

    x = hs[:, :, :nheads, :].reshape(L * N * nheads, D).astype(jnp.bfloat16)
    M = x.shape[0]
    # split M only when a second TensorCore exists AND each half keeps a full
    # MXU M-tile; otherwise a single big step (no serialization overhead).
    m_blk = M
    if _multi_tensorcore() and M % 2 == 0 and (M // 2) % 8 == 0 and (M // 2) >= 256:
        m_blk = M // 2

    def _run(single_buffer_consts):
        return pl.pallas_call(
            _fused_head_kernel,
            out_shape=jax.ShapeDtypeStruct((M, kpad), jnp.bfloat16),
            grid=(M // m_blk,),
            in_specs=[
                pl.BlockSpec((m_blk, D), lambda i: (i, 0)),
                _const_spec((D, kpad), lambda i: (0, 0), single_buffer_consts),
                _const_spec((1, kpad), lambda i: (0, 0), single_buffer_consts),
            ],
            out_specs=pl.BlockSpec((m_blk, kpad), lambda i: (i, 0)),
            compiler_params=pltpu.CompilerParams(
                dimension_semantics=("parallel",),
                vmem_limit_bytes=_VMEM_LIMIT_BYTES),
        )(x, w_pad, b_pad)

    try:
        out = _run(True)
    except Exception:
        out = _run(False)

    out5 = out.astype(jnp.float32).reshape(L, bs, t, nheads, kpad)
    results, off = [], 0
    for q, k in enumerate(ks):
        results.append(out5[:, :, :, q, off:off + k])                # (L,bs,t,K_q)
        off += k
    return results


# --------------------------------------------------------------------------
# Deterministic stand-ins for the injected backbone / transformer modules.
# --------------------------------------------------------------------------
# TODO(synk): backbone (ResNet + positional encoding) is an external injected
# module; stubbed with deterministic pooling + fixed projection (channels-last).
def backbone_stub(samples, level_channels, level_sizes, hidden_dim, key):
    bs, t, c, H, W = samples.shape
    N = bs * t
    x = samples.reshape(N, c, H, W)
    feats, masks, poss = [], [], []
    keys = jax.random.split(key, len(level_channels))
    for cl, (hl, wl), k in zip(level_channels, level_sizes, keys):
        fh, fw = H // hl, W // wl
        pooled = x.reshape(N, c, hl, fh, wl, fw).mean(axis=(3, 5))   # (N,c,hl,wl)
        proj = jax.random.normal(k, (cl, c), jnp.float32) * 0.5
        feat = jnp.einsum('oc,nchw->nhwo', proj, pooled).reshape(N, hl * wl, cl)
        feats.append(feat.astype(jnp.bfloat16))                      # channels-last
        masks.append(jnp.zeros((N, hl * wl), dtype=bool))
        ii = lax.broadcasted_iota(jnp.float32, (hl, wl, hidden_dim), 0)
        jj = lax.broadcasted_iota(jnp.float32, (hl, wl, hidden_dim), 1)
        cc = lax.broadcasted_iota(jnp.float32, (hl, wl, hidden_dim), 2)
        pos = (jnp.sin(ii * 0.5 + cc * 0.1)
               + jnp.cos(jj * 0.5 + cc * 0.1)).reshape(hl * wl, hidden_dim)
        poss.append(jnp.broadcast_to(pos[None], (N, hl * wl, hidden_dim)))
    return feats, masks, poss


# TODO(synk): deformable transformer is an external injected module; stubbed
# with deterministic pooling/mixing producing hs of the correct shape.
def transformer_stub(srcs, masks, pos, query_embeds, num_decoder_layers, hidden_dim):
    bs, t, Q, _ = query_embeds.shape
    N = bs * t
    qe = query_embeds.reshape(N, Q, 2 * hidden_dim)
    query_pos, tgt = qe[..., :hidden_dim], qe[..., hidden_dim:]
    memory = jnp.zeros((N, hidden_dim), jnp.float32)
    for s, p in zip(srcs, pos):
        memory = memory + (s.astype(jnp.float32) + p.astype(jnp.float32)).mean(axis=1)
    hs = []
    for layer in range(num_decoder_layers):
        scale = 0.1 * (layer + 1)
        hs.append(jnp.tanh(tgt + scale * query_pos + scale * memory[:, None, :]))
    return jnp.stack(hs), None, None, None, None                     # (L, N, Q, D)


# --------------------------------------------------------------------------
# SurgFormer parameters (deterministic, PyTorch-matching inits)
# --------------------------------------------------------------------------
def build_params(key, hidden_dim, level_channels, num_queries,
                 phase_classes, phase_ant_classes, tool_classes, tool_ant_classes):
    prior_prob = 0.01
    bias_value = -math.log((1 - prior_prob) / prior_prob)
    params = {}
    keys = jax.random.split(key, 16)
    ki = iter(keys)

    # input_proj: one (Conv2d 1x1, GroupNorm(32, hidden)) per backbone level
    params['input_proj'] = []
    for cin in level_channels:
        bound = math.sqrt(6.0 / (cin + hidden_dim))          # xavier_uniform gain=1
        w = jax.random.uniform(next(ki), (cin, hidden_dim), jnp.float32, -bound, bound)
        params['input_proj'].append(dict(
            w=w, b=jnp.zeros((hidden_dim,), jnp.float32),
            gamma=jnp.ones((hidden_dim,), jnp.float32),
            beta=jnp.zeros((hidden_dim,), jnp.float32)))

    params['query_embed'] = jax.random.normal(
        next(ki), (num_queries, 2 * hidden_dim), jnp.float32)

    def make_head(k, n_cls):                                  # nn.Linear default init
        lim = 1.0 / math.sqrt(hidden_dim)
        w = jax.random.uniform(k, (hidden_dim, n_cls), jnp.float32, -lim, lim)
        b = jnp.full((n_cls,), bias_value, jnp.float32)       # focal prior bias
        return dict(w=w, b=b)

    params['phase_embed'] = make_head(next(ki), phase_classes)
    params['phase_ant_embed'] = make_head(next(ki), phase_ant_classes)
    params['tool_embed'] = make_head(next(ki), tool_classes)
    params['tool_ant_embed'] = make_head(next(ki), tool_ant_classes)
    return params


def surgformer_forward(samples, params, *, hidden_dim, level_channels, level_sizes,
                       num_decoder_layers, aux_loss=False, backbone_key=None):
    bs, t = samples.shape[0], samples.shape[1]

    features, masks, pos = backbone_stub(samples, level_channels, level_sizes,
                                         hidden_dim, backbone_key)

    # --- input_proj: Pallas fused conv1x1 + GroupNorm per level (channels-last)
    srcs = []
    for l, feat in enumerate(features):
        p = params['input_proj'][l]
        srcs.append(conv1x1_groupnorm(feat, p['w'], p['b'], p['gamma'], p['beta']))

    # num_feature_levels == len(backbone levels) here, so the extra stride-2
    # projection branch of the PyTorch forward is not entered.

    nq = params['query_embed'].shape[0]
    query_embeds = jnp.broadcast_to(params['query_embed'][None, None],
                                    (bs, t, nq, params['query_embed'].shape[1]))

    hs, _, _, _, _ = transformer_stub(srcs, masks, pos, query_embeds,
                                      num_decoder_layers, hidden_dim)

    # --- classification heads: single fused Pallas matmul, sliced per head
    heads = [params['phase_embed'], params['phase_ant_embed'],
             params['tool_embed'], params['tool_ant_embed']]
    output_phases, output_phases_ant, output_tool, output_tool_ant = \
        fused_heads(hs, heads, bs, t)

    out = {'pred_phase': output_phases[-1],
           'pred_phase_ant': output_phases_ant[-1],
           'pred_tool': output_tool[-1],
           'pred_tool_ant': output_tool_ant[-1]}
    if aux_loss:
        out['aux_outputs'] = [
            {'pred_phase': a, 'pred_phase_ant': b, 'pred_tool': c, 'pred_tool_ant': d}
            for a, b, c, d in zip(output_phases[:-1], output_phases_ant[:-1],
                                  output_tool[:-1], output_tool_ant[:-1])]
    return out


# --------------------------------------------------------------------------
if __name__ == "__main__":
    key = jax.random.PRNGKey(0)
    k_samples, k_params, k_backbone = jax.random.split(key, 3)

    # small config (hidden_dim divisible by 32 for GroupNorm and = 128 lanes)
    bs, t = 2, 4
    H = W = 32
    hidden_dim = 128
    level_channels = [8, 16]            # backbone.num_channels
    level_sizes = [(8, 8), (4, 4)]      # feature-map sizes per level
    num_decoder_layers = 3              # num_pred
    num_queries = 4
    phase_classes, phase_ant_classes = 7, 7
    tool_classes, tool_ant_classes = 6, 6

    samples = jax.random.normal(k_samples, (bs, t, 3, H, W), jnp.float32)
    params = build_params(k_params, hidden_dim, level_channels, num_queries,
                          phase_classes, phase_ant_classes,
                          tool_classes, tool_ant_classes)

    out = surgformer_forward(samples, params,
                             hidden_dim=hidden_dim,
                             level_channels=level_channels,
                             level_sizes=level_sizes,
                             num_decoder_layers=num_decoder_layers,
                             aux_loss=True,
                             backbone_key=k_backbone)
    jax.block_until_ready(out)

    # ---------------- correctness checks vs pure-JAX references -----------
    feats, msks, poss = backbone_stub(samples, level_channels, level_sizes,
                                      hidden_dim, k_backbone)

    def gn_ref(feat, p):
        xf = feat.astype(jnp.float32)
        y = jnp.einsum('nlc,cd->nld', xf, p['w']) + p['b']
        Nn, HWn, Cn = y.shape
        g = y.reshape(Nn, HWn, 32, Cn // 32)
        mu = g.mean(axis=(1, 3), keepdims=True)
        var = ((g - mu) ** 2).mean(axis=(1, 3), keepdims=True)
        gam = p['gamma'].reshape(1, 1, 32, Cn // 32)
        bet = p['beta'].reshape(1, 1, 32, Cn // 32)
        return (((g - mu) / jnp.sqrt(var + 1e-5)) * gam + bet).reshape(Nn, HWn, Cn)

    # (a) conv1x1 + GroupNorm kernel (bf16 matmul / bf16 output vs f32 reference)
    p0 = params['input_proj'][0]
    y_pl = conv1x1_groupnorm(feats[0], p0['w'], p0['b'], p0['gamma'], p0['beta'])
    y_ref = gn_ref(feats[0], p0)
    assert jnp.allclose(y_pl.astype(jnp.float32), y_ref,
                        atol=3e-2, rtol=3e-2), "conv+GN mismatch"

    # (b) fused head kernel: rebuild hs from the same (Pallas) srcs and compare
    srcs_pl = [conv1x1_groupnorm(f, p['w'], p['b'], p['gamma'], p['beta'])
               for f, p in zip(feats, params['input_proj'])]
    q_emb = jnp.broadcast_to(params['query_embed'][None, None],
                             (bs, t, num_queries, 2 * hidden_dim))
    hs_ref, *_ = transformer_stub(srcs_pl, msks, poss, q_emb,
                                  num_decoder_layers, hidden_dim)
    ph_ref = (hs_ref[-1][:, 0] @ params['phase_embed']['w']
              + params['phase_embed']['b']).reshape(bs, t, -1)
    ta_ref = (hs_ref[-1][:, 3] @ params['tool_ant_embed']['w']
              + params['tool_ant_embed']['b']).reshape(bs, t, -1)
    assert jnp.allclose(out['pred_phase'], ph_ref, atol=5e-2, rtol=5e-2), \
        "fused head (phase) mismatch"
    assert jnp.allclose(out['pred_tool_ant'], ta_ref, atol=5e-2, rtol=5e-2), \
        "fused head (tool_ant) mismatch"

    expected_shapes = {
        'pred_phase': (bs, t, phase_classes),
        'pred_phase_ant': (bs, t, phase_ant_classes),
        'pred_tool': (bs, t, tool_classes),
        'pred_tool_ant': (bs, t, tool_ant_classes),
    }
    for name, shape in expected_shapes.items():
        assert out[name].shape == shape, (name, out[name].shape, shape)
    assert len(out['aux_outputs']) == num_decoder_layers - 1

    print("KERNEL_OK")
</pallas_src>

<mosaic_0001>
module attributes {stable_mosaic.version = 11 : i64} {
  func.func @_conv_gn_kernel(%arg0: i32, %arg1: memref<8x64x128xbf16, #tpu.memory_space<vmem>>, %arg2: memref<128x128xbf16, #tpu.memory_space<vmem>>, %arg3: memref<128x128xbf16, #tpu.memory_space<vmem>>, %arg4: memref<3x128xf32, #tpu.memory_space<vmem>>, %arg5: memref<8x64x128xbf16, #tpu.memory_space<vmem>>) attributes {dimension_semantics = [#tpu.dimension_semantics<parallel>], iteration_bounds = array<i64: 1>, scalar_prefetch = 0 : i64, scratch_operands = 0 : i64, tpu.core_type = #tpu.core_type<tc>, window_params = [{transform_indices = @transform_0, window_bounds = array<i64: 8, 64, 128>}, {pipeline_mode = #tpu.pipeline_mode<synchronous>, transform_indices = @transform_1, window_bounds = array<i64: 128, 128>}, {pipeline_mode = #tpu.pipeline_mode<synchronous>, transform_indices = @transform_2, window_bounds = array<i64: 128, 128>}, {pipeline_mode = #tpu.pipeline_mode<synchronous>, transform_indices = @transform_3, window_bounds = array<i64: 3, 128>}, {transform_indices = @transform_4, window_bounds = array<i64: 8, 64, 128>}]} {
    %c0 = arith.constant 0 : index
    %c0_0 = arith.constant 0 : index
    %0 = vector.load %arg4[%c0, %c0_0] : memref<3x128xf32, #tpu.memory_space<vmem>>, vector<3x128xf32>
    %1 = vector.extract_strided_slice %0 {offsets = [0, 0], sizes = [1, 128], strides = [1, 1]} : vector<3x128xf32> to vector<1x128xf32>
    %2 = vector.extract_strided_slice %0 {offsets = [1, 0], sizes = [1, 128], strides = [1, 1]} : vector<3x128xf32> to vector<1x128xf32>
    %3 = vector.extract_strided_slice %0 {offsets = [2, 0], sizes = [1, 128], strides = [1, 1]} : vector<3x128xf32> to vector<1x128xf32>
    %c0_1 = arith.constant 0 : index
    %c0_2 = arith.constant 0 : index
    %c0_3 = arith.constant 0 : index
    %4 = vector.load %arg1[%c0_1, %c0_2, %c0_3] : memref<8x64x128xbf16, #tpu.memory_space<vmem>>, vector<8x64x128xbf16>
    %5 = vector.shape_cast %4 : vector<8x64x128xbf16> to vector<512x128xbf16>
    %c0_4 = arith.constant 0 : index
    %c0_5 = arith.constant 0 : index
    %6 = vector.load %arg2[%c0_4, %c0_5] : memref<128x128xbf16, #tpu.memory_space<vmem>>, vector<128x128xbf16>
    %cst = arith.constant dense<0.000000e+00> : vector<512x128xf32>
    %7 = tpu.matmul %5, %6, %cst {dimension_numbers = #tpu.dot_dimension_numbers<[1], [0], [0], [1], [0, 0, 1, 1], [], []>} : vector<512x128xbf16>, vector<128x128xbf16>, vector<512x128xf32> -> vector<512x128xf32>
    %8 = vector.shape_cast %7 : vector<512x128xf32> to vector<8x64x128xf32>
    %cst_6 = arith.constant dense<0.000000e+00> : vector<8x128xf32>
    %9 = vector.multi_reduction <add>, %8, %cst_6 [1] : vector<8x64x128xf32> to vector<8x128xf32>
    %10 = arith.mulf %8, %8 : vector<8x64x128xf32>
    %cst_7 = arith.constant dense<0.000000e+00> : vector<8x128xf32>
    %11 = vector.multi_reduction <add>, %10, %cst_7 [1] : vector<8x64x128xf32> to vector<8x128xf32>
    %cst_8 = arith.constant 6.400000e+01 : f32
    %12 = vector.broadcast %cst_8 : f32 to vector<1x128xf32>
    %13 = arith.mulf %12, %1 : vector<1x128xf32>
    %14 = vector.broadcast %13 : vector<1x128xf32> to vector<8x128xf32>
    %15 = arith.addf %9, %14 : vector<8x128xf32>
    %cst_9 = arith.constant 2.000000e+00 : f32
    %16 = vector.broadcast %cst_9 : f32 to vector<1x128xf32>
    %17 = arith.mulf %16, %1 : vector<1x128xf32>
    %18 = vector.broadcast %17 : vector<1x128xf32> to vector<8x128xf32>
    %19 = arith.mulf %18, %9 : vector<8x128xf32>
    %20 = arith.addf %11, %19 : vector<8x128xf32>
    %21 = arith.mulf %1, %1 : vector<1x128xf32>
    %cst_10 = arith.constant 6.400000e+01 : f32
    %22 = vector.broadcast %cst_10 : f32 to vector<1x128xf32>
    %23 = arith.mulf %22, %21 : vector<1x128xf32>
    %24 = vector.broadcast %23 : vector<1x128xf32> to vector<8x128xf32>
    %25 = arith.addf %20, %24 : vector<8x128xf32>
    %c0_11 = arith.constant 0 : index
    %c0_12 = arith.constant 0 : index
    %26 = vector.load %arg3[%c0_11, %c0_12] : memref<128x128xbf16, #tpu.memory_space<vmem>>, vector<128x128xbf16>
    %27 = arith.truncf %15 : vector<8x128xf32> to vector<8x128xbf16>
    %cst_13 = arith.constant dense<0.000000e+00> : vector<8x128xf32>
    %28 = tpu.matmul %27, %26, %cst_13 {dimension_numbers = #tpu.dot_dimension_numbers<[1], [0], [0], [1], [0, 0, 1, 1], [], []>} : vector<8x128xbf16>, vector<128x128xbf16>, vector<8x128xf32> -> vector<8x128xf32>
    %cst_14 = arith.constant 3.906250e-03 : f32
    %29 = vector.broadcast %cst_14 : f32 to vector<8x128xf32>
    %30 = arith.mulf %28, %29 : vector<8x128xf32>
    %31 = arith.truncf %25 : vector<8x128xf32> to vector<8x128xbf16>
    %cst_15 = arith.constant dense<0.000000e+00> : vector<8x128xf32>
    %32 = tpu.matmul %31, %26, %cst_15 {dimension_numbers = #tpu.dot_dimension_numbers<[1], [0], [0], [1], [0, 0, 1, 1], [], []>} : vector<8x128xbf16>, vector<128x128xbf16>, vector<8x128xf32> -> vector<8x128xf32>
    %cst_16 = arith.constant 3.906250e-03 : f32
    %33 = vector.broadcast %cst_16 : f32 to vector<8x128xf32>
    %34 = arith.mulf %32, %33 : vector<8x128xf32>
    %35 = arith.mulf %30, %30 : vector<8x128xf32>
    %36 = arith.subf %34, %35 : vector<8x128xf32>
    %cst_17 = arith.constant 0.000000e+00 : f32
    %37 = vector.broadcast %cst_17 : f32 to vector<8x128xf32>
    %38 = arith.maximumf %36, %37 : vector<8x128xf32>
    %cst_18 = arith.constant 9.99999974E-6 : f32
    %39 = vector.broadcast %cst_18 : f32 to vector<8x128xf32>
    %40 = arith.addf %38, %39 : vector<8x128xf32>
    %41 = math.rsqrt %40 : vector<8x128xf32>
    %42 = vector.broadcast %2 : vector<1x128xf32> to vector<8x128xf32>
    %43 = arith.mulf %41, %42 : vector<8x128xf32>
    %44 = vector.broadcast %1 : vector<1x128xf32> to vector<8x128xf32>
    %45 = arith.subf %44, %30 : vector<8x128xf32>
    %46 = arith.mulf %45, %43 : vector<8x128xf32>
    %47 = vector.broadcast %3 : vector<1x128xf32> to vector<8x128xf32>
    %48 = arith.addf %46, %47 : vector<8x128xf32>
    %49 = vector.shape_cast %43 : vector<8x128xf32> to vector<8x1x128xf32>
    %50 = vector.broadcast %49 : vector<8x1x128xf32> to vector<8x64x128xf32>
    %51 = arith.mulf %8, %50 : vector<8x64x128xf32>
    %52 = vector.shape_cast %48 : vector<8x128xf32> to vector<8x1x128xf32>
    %53 = vector.broadcast %52 : vector<8x1x128xf32> to vector<8x64x128xf32>
    %54 = arith.addf %51, %53 : vector<8x64x128xf32>
    %55 = arith.truncf %54 : vector<8x64x128xf32> to vector<8x64x128xbf16>
    %c0_19 = arith.constant 0 : index
    %c0_20 = arith.constant 0 : index
    %c0_21 = arith.constant 0 : index
    %56 = vector.load %arg5[%c0_19, %c0_20, %c0_21] : memref<8x64x128xbf16, #tpu.memory_space<vmem>>, vector<8x64x128xbf16>
    tpu.vector_store %arg5[%c0_19, %c0_20, %c0_21], %55 {strides = array<i32>} : memref<8x64x128xbf16, #tpu.memory_space<vmem>>, vector<8x64x128xbf16>,
    return
  }
  func.func @transform_0(%arg0: i32) -> (i32, i32, i32) {
    %c0_i32 = arith.constant 0 : i32
    %c0_i32_0 = arith.constant 0 : i32
    %c0_i32_1 = arith.constant 0 : i32
    return %arg0, %c0_i32, %c0_i32_0 : i32, i32, i32
  }
  func.func @transform_1(%arg0: i32) -> (i32, i32) {
    %c0_i32 = arith.constant 0 : i32
    %c0_i32_0 = arith.constant 0 : i32
    %c0_i32_1 = arith.constant 0 : i32
    return %c0_i32, %c0_i32_0 : i32, i32
  }
  func.func @transform_2(%arg0: i32) -> (i32, i32) {
    %c0_i32 = arith.constant 0 : i32
    %c0_i32_0 = arith.constant 0 : i32
    %c0_i32_1 = arith.constant 0 : i32
    return %c0_i32, %c0_i32_0 : i32, i32
  }
  func.func @transform_3(%arg0: i32) -> (i32, i32) {
    %c0_i32 = arith.constant 0 : i32
    %c0_i32_0 = arith.constant 0 : i32
    %c0_i32_1 = arith.constant 0 : i32
    return %c0_i32, %c0_i32_0 : i32, i32
  }
  func.func @transform_4(%arg0: i32) -> (i32, i32, i32) {
    %c0_i32 = arith.constant 0 : i32
    %c0_i32_0 = arith.constant 0 : i32
    %c0_i32_1 = arith.constant 0 : i32
    return %arg0, %c0_i32, %c0_i32_0 : i32, i32, i32
  }
}

module attributes {stable_mosaic.version = 11 : i64} {
  func.func @_conv_gn_kernel(%arg0: i32, %arg1: memref<8x64x128xbf16, #tpu.memory_space<vmem>>, %arg2: memref<128x128xbf16, #tpu.memory_space<vmem>>, %arg3: memref<128x128xbf16, #tpu.memory_space<vmem>>, %arg4: memref<3x128xf32, #tpu.memory_space<vmem>>, %arg5: memref<8x64x128xbf16, #tpu.memory_space<vmem>>) attributes {dimension_semantics = [#tpu.dimension_semantics<parallel>], iteration_bounds = array<i64: 1>, scalar_prefetch = 0 : i64, scratch_operands = 0 : i64, tpu.core_type = #tpu.core_type<tc>, window_params = [{transform_indices = @transform_0, window_bounds = array<i64: 8, 64, 128>}, {pipeline_mode = #tpu.pipeline_mode<synchronous>, transform_indices = @transform_1, window_bounds = array<i64: 128, 128>}, {pipeline_mode = #tpu.pipeline_mode<synchronous>, transform_indices = @transform_2, window_bounds = array<i64: 128, 128>}, {pipeline_mode = #tpu.pipeline_mode<synchronous>, transform_indices = @transform_3, window_bounds = array<i64: 3, 128>}, {transform_indices = @transform_4, window_bounds = array<i64: 8, 64, 128>}]} {
    %c0 = arith.constant 0 : index
    %c0_0 = arith.constant 0 : index
    %0 = vector.load %arg4[%c0, %c0_0] : memref<3x128xf32, #tpu.memory_space<vmem>>, vector<3x128xf32>
    %1 = vector.extract_strided_slice %0 {offsets = [0, 0], sizes = [1, 128], strides = [1, 1]} : vector<3x128xf32> to vector<1x128xf32>
    %2 = vector.extract_strided_slice %0 {offsets = [1, 0], sizes = [1, 128], strides = [1, 1]} : vector<3x128xf32> to vector<1x128xf32>
    %3 = vector.extract_strided_slice %0 {offsets = [2, 0], sizes = [1, 128], strides = [1, 1]} : vector<3x128xf32> to vector<1x128xf32>
    %c0_1 = arith.constant 0 : index
    %c0_2 = arith.constant 0 : index
    %c0_3 = arith.constant 0 : index
    %4 = vector.load %arg1[%c0_1, %c0_2, %c0_3] : memref<8x64x128xbf16, #tpu.memory_space<vmem>>, vector<8x64x128xbf16>
    %5 = vector.shape_cast %4 : vector<8x64x128xbf16> to vector<512x128xbf16>
    %c0_4 = arith.constant 0 : index
    %c0_5 = arith.constant 0 : index
    %6 = vector.load %arg2[%c0_4, %c0_5] : memref<128x128xbf16, #tpu.memory_space<vmem>>, vector<128x128xbf16>
    %cst = arith.constant dense<0.000000e+00> : vector<512x128xf32>
    %7 = tpu.matmul %5, %6, %cst {dimension_numbers = #tpu.dot_dimension_numbers<[1], [0], [0], [1], [0, 0, 1, 1], [], []>} : vector<512x128xbf16>, vector<128x128xbf16>, vector<512x128xf32> -> vector<512x128xf32>
    %8 = vector.shape_cast %7 : vector<512x128xf32> to vector<8x64x128xf32>
    %cst_6 = arith.constant dense<0.000000e+00> : vector<8x128xf32>
    %9 = vector.multi_reduction <add>, %8, %cst_6 [1] : vector<8x64x128xf32> to vector<8x128xf32>
    %10 = arith.mulf %8, %8 : vector<8x64x128xf32>
    %cst_7 = arith.constant dense<0.000000e+00> : vector<8x128xf32>
    %11 = vector.multi_reduction <add>, %10, %cst_7 [1] : vector<8x64x128xf32> to vector<8x128xf32>
    %cst_8 = arith.constant 6.400000e+01 : f32
    %12 = vector.broadcast %cst_8 : f32 to vector<1x128xf32>
    %13 = arith.mulf %12, %1 : vector<1x128xf32>
    %14 = vector.broadcast %13 : vector<1x128xf32> to vector<8x128xf32>
    %15 = arith.addf %9, %14 : vector<8x128xf32>
    %cst_9 = arith.constant 2.000000e+00 : f32
    %16 = vector.broadcast %cst_9 : f32 to vector<1x128xf32>
    %17 = arith.mulf %16, %1 : vector<1x128xf32>
    %18 = vector.broadcast %17 : vector<1x128xf32> to vector<8x128xf32>
    %19 = arith.mulf %18, %9 : vector<8x128xf32>
    %20 = arith.addf %11, %19 : vector<8x128xf32>
    %21 = arith.mulf %1, %1 : vector<1x128xf32>
    %cst_10 = arith.constant 6.400000e+01 : f32
    %22 = vector.broadcast %cst_10 : f32 to vector<1x128xf32>
    %23 = arith.mulf %22, %21 : vector<1x128xf32>
    %24 = vector.broadcast %23 : vector<1x128xf32> to vector<8x128xf32>
    %25 = arith.addf %20, %24 : vector<8x128xf32>
    %c0_11 = arith.constant 0 : index
    %c0_12 = arith.constant 0 : index
    %26 = vector.load %arg3[%c0_11, %c0_12] : memref<128x128xbf16, #tpu.memory_space<vmem>>, vector<128x128xbf16>
    %27 = arith.truncf %15 : vector<8x128xf32> to vector<8x128xbf16>
    %cst_13 = arith.constant dense<0.000000e+00> : vector<8x128xf32>
    %28 = tpu.matmul %27, %26, %cst_13 {dimension_numbers = #tpu.dot_dimension_numbers<[1], [0], [0], [1], [0, 0, 1, 1], [], []>} : vector<8x128xbf16>, vector<128x128xbf16>, vector<8x128xf32> -> vector<8x128xf32>
    %cst_14 = arith.constant 3.906250e-03 : f32
    %29 = vector.broadcast %cst_14 : f32 to vector<8x128xf32>
    %30 = arith.mulf %28, %29 : vector<8x128xf32>
    %31 = arith.truncf %25 : vector<8x128xf32> to vector<8x128xbf16>
    %cst_15 = arith.constant dense<0.000000e+00> : vector<8x128xf32>
    %32 = tpu.matmul %31, %26, %cst_15 {dimension_numbers = #tpu.dot_dimension_numbers<[1], [0], [0], [1], [0, 0, 1, 1], [], []>} : vector<8x128xbf16>, vector<128x128xbf16>, vector<8x128xf32> -> vector<8x128xf32>
    %cst_16 = arith.constant 3.906250e-03 : f32
    %33 = vector.broadcast %cst_16 : f32 to vector<8x128xf32>
    %34 = arith.mulf %32, %33 : vector<8x128xf32>
    %35 = arith.mulf %30, %30 : vector<8x128xf32>
    %36 = arith.subf %34, %35 : vector<8x128xf32>
    %cst_17 = arith.constant 0.000000e+00 : f32
    %37 = vector.broadcast %cst_17 : f32 to vector<8x128xf32>
    %38 = arith.maximumf %36, %37 : vector<8x128xf32>
    %cst_18 = arith.constant 9.99999974E-6 : f32
    %39 = vector.broadcast %cst_18 : f32 to vector<8x128xf32>
    %40 = arith.addf %38, %39 : vector<8x128xf32>
    %41 = math.rsqrt %40 : vector<8x128xf32>
    %42 = vector.broadcast %2 : vector<1x128xf32> to vector<8x128xf32>
    %43 = arith.mulf %41, %42 : vector<8x128xf32>
    %44 = vector.broadcast %1 : vector<1x128xf32> to vector<8x128xf32>
    %45 = arith.subf %44, %30 : vector<8x128xf32>
    %46 = arith.mulf %45, %43 : vector<8x128xf32>
    %47 = vector.broadcast %3 : vector<1x128xf32> to vector<8x128xf32>
    %48 = arith.addf %46, %47 : vector<8x128xf32>
    %49 = vector.shape_cast %43 : vector<8x128xf32> to vector<8x1x128xf32>
    %50 = vector.broadcast %49 : vector<8x1x128xf32> to vector<8x64x128xf32>
    %51 = arith.mulf %8, %50 : vector<8x64x128xf32>
    %52 = vector.shape_cast %48 : vector<8x128xf32> to vector<8x1x128xf32>
    %53 = vector.broadcast %52 : vector<8x1x128xf32> to vector<8x64x128xf32>
    %54 = arith.addf %51, %53 : vector<8x64x128xf32>
    %55 = arith.truncf %54 : vector<8x64x128xf32> to vector<8x64x128xbf16>
    %c0_19 = arith.constant 0 : index
    %c0_20 = arith.constant 0 : index
    %c0_21 = arith.constant 0 : index
    %56 = vector.load %arg5[%c0_19, %c0_20, %c0_21] : memref<8x64x128xbf16, #tpu.memory_space<vmem>>, vector<8x64x128xbf16>
    tpu.vector_store %arg5[%c0_19, %c0_20, %c0_21], %55 {strides = array<i32>} : memref<8x64x128xbf16, #tpu.memory_space<vmem>>, vector<8x64x128xbf16>,
    return
  }
  func.func @transform_0(%arg0: i32) -> (i32, i32, i32) {
    %c0_i32 = arith.constant 0 : i32
    %c0_i32_0 = arith.constant 0 : i32
    %c0_i32_1 = arith.constant 0 : i32
    return %arg0, %c0_i32, %c0_i32_0 : i32, i32, i32
  }
  func.func @transform_1(%arg0: i32) -> (i32, i32) {
    %c0_i32 = arith.constant 0 : i32
    %c0_i32_0 = arith.constant 0 : i32
    %c0_i32_1 = arith.constant 0 : i32
    return %c0_i32, %c0_i32_0 : i32, i32
  }
  func.func @transform_2(%arg0: i32) -> (i32, i32) {
    %c0_i32 = arith.constant 0 : i32
    %c0_i32_0 = arith.constant 0 : i32
    %c0_i32_1 = arith.constant 0 : i32
    return %c0_i32, %c0_i32_0 : i32, i32
  }
  func.func @transform_3(%arg0: i32) -> (i32, i32) {
    %c0_i32 = arith.constant 0 : i32
    %c0_i32_0 = arith.constant 0 : i32
    %c0_i32_1 = arith.constant 0 : i32
    return %c0_i32, %c0_i32_0 : i32, i32
  }
  func.func @transform_4(%arg0: i32) -> (i32, i32, i32) {
    %c0_i32 = arith.constant 0 : i32
    %c0_i32_0 = arith.constant 0 : i32
    %c0_i32_1 = arith.constant 0 : i32
    return %arg0, %c0_i32, %c0_i32_0 : i32, i32, i32
  }
}

</mosaic_0001>

<bundles_post_ra>
// kernel: tpu_custom_call.1
= control target key start
LH: loop header
LB: loop body
LE: loop exit
PB: predicated region body
PF: predicated region fallthrough
CT: control target
= control target key end

     0   :  { %9 = vsyncpa [#allocation3], 0  ;;  %s3693_s0 = inlined_call_operand.hbm [shape: bf16[8,64,128], index: 0, kind: input, shape index: {}]   ;;  %s3694_s1 = inlined_call_operand.hbm [shape: bf16[128,128], index: 1, kind: input, shape index: {}]   ;;  %s3695_s2 = inlined_call_operand.hbm [shape: bf16[128,128], index: 2, kind: input, shape index: {}]   ;;  %s3696_s3 = inlined_call_operand.vmem [shape: f32[3,128], index: 3, kind: input, shape index: {}]   ;;  %s3697_s4 = inlined_call_operand.hbm [shape: bf16[8,64,128], index: 4, kind: output, shape index: {}]  }
   0x1   :  { %10 = vsyncpa [#allocation6], 0 }
   0x2   :  { %11 = vsyncpa [#allocation4], 0  ;;  %s2621_s15 = smov [#allocation5]   ;;  %s2622_s17 = smov [#allocation2]  }
   0x3   :  { %s29_s16 = sshll.u32 %s2621_s15, 4  ;;  %s17_s18 = sshll.u32 %s2622_s17, 4  ;;  %s30_s16 = int_to_ptr.vmem [resolvable:$true] %s29_s16  ;;  %s18_s18 = int_to_ptr.vmem [resolvable:$true] %s17_s18 }
   0x4   :  { %s2543_s19 = scalar_lea.vmem %s30_s16, 1024  ;;  %p2548_p1 = scmp.lt.s32.totalorder %s30_s16, %s30_s16 }
   0x5   :  { %p2544_p0 = scmp.ne.s32.totalorder %s30_s16, %s2543_s19  ;;  %p2549_p2 = scmp.lt.s32.totalorder %s2543_s19, %s2543_s19 }
   0x7   :  { %p2550_p3 = por %p2549_p2, %p2548_p1 }
   0x9   :  { %p2551_p4 = pnand %p2550_p3, %p2544_p0 }
   0xb   :  { %2554 = shalt.err (!%p2551_p4)
}
   0xc   :  { %s2623_s20 = smov 64   ;;  %s2624_s21 = smov 4  }
   0xd   :  { %35 = dma.hbm_to_vmem [thread:$0]  %s3694_s1, 1024, %s30_s16, [#allocation6], %s2623_s20, %s2623_s20, %s2624_s21  }
   0xe   :  { %s2563_s24 = scalar_lea.vmem %s18_s18, 4096  ;;  %p2568_p6 = scmp.lt.s32.totalorder %s18_s18, %s18_s18 }
   0xf   :  { %p2564_p5 = scmp.ne.s32.totalorder %s18_s18, %s2563_s24  ;;  %p2569_p7 = scmp.lt.s32.totalorder %s2563_s24, %s2563_s24 }
  0x11   :  { %p2570_p8 = por %p2569_p7, %p2568_p6 }
  0x13   :  { %p2571_p9 = pnand %p2570_p8, %p2564_p5 }
  0x15   :  { %2574 = shalt.err (!%p2571_p9)
}
  0x16   :  { %23 = dma.hbm_to_vmem [thread:$0]  %s3693_s0, 4096, %s18_s18, [#allocation3], %s2623_s20, %s2623_s20, %s2624_s21  }
  0x17   :  { %s2625_s27 = smov [#allocation7]  }
  0x18   :  { %s41_s28 = sshll.u32 %s2625_s27, 4  ;;  %s42_s28 = int_to_ptr.vmem [resolvable:$true] %s41_s28 }
  0x19   :  { %s2583_s29 = scalar_lea.vmem %s42_s28, 1024  ;;  %p2588_p11 = scmp.lt.s32.totalorder %s42_s28, %s42_s28 }
  0x1a   :  { %p2584_p10 = scmp.ne.s32.totalorder %s42_s28, %s2583_s29  ;;  %p2589_p12 = scmp.lt.s32.totalorder %s2583_s29, %s2583_s29 }
  0x1c   :  { %p2590_p13 = por %p2589_p12, %p2588_p11 }
  0x1e   :  { %p2591_p0 = pnand %p2590_p13, %p2584_p10 }
  0x20   :  { %2594 = shalt.err (!%p2591_p0)
}
  0x21   :  { %47 = dma.hbm_to_vmem [thread:$0]  %s3695_s2, 1024, %s42_s28, [#allocation6], %s2623_s20, %s2623_s20, %s2624_s21  }
  0x22   :  { %2615 = dma.done.wait [#allocation3], 4096  }
  0x23   :  { %2616 = vsyncadd [#allocation3], 4294963200 }
  0x24   :  { %2617 = dma.done.wait [#allocation6], 2048  }
  0x25   :  { %2618 = vsyncadd [#allocation6], 4294965248  ;;  %v2485_v0 = vld [vmem:[#allocation5 + $0x38] sm:$0xff]   ;;  %v2486_v1 = vld [vmem:[#allocation5 + $0x30] sm:$0xff]   ;;  %v3698_v41 = vmov 0.0   ;;  %vm2627_vm0 = vmmov 0  }
  0x26   :  { %2340 = vmatprep.subr.bf16.mxu0 %v2485_v0  ;;  %2460 = vmatprep.subr.bf16.mxu1 %v2485_v0  ;;  %v2487_v2 = vld [vmem:[#allocation5 + $0x28] sm:$0xff]   ;;  %v2488_v3 = vld [vmem:[#allocation5 + $0x20] sm:$0xff]   ;;  %v2489_v5 = vld [vmem:[#allocation5 + $0x18] sm:$0xff]   ;;  %vm968_vm1 = vcmask 1041409   ;;  %vm970_vm2 = vcmask 1042434   ;;  %vm972_vm3 = vcmask 1043459  }
  0x27   :  { %2341 = vmatpush3.bf16.msra.mxu0 %v2485_v0  ;;  %2468 = vmatpush3.bf16.msra.mxu1 %v2485_v0  ;;  %v2493_v4 = vld [vmem:[#allocation2] sm:$0xff]   ;;  %v2490_v6 = vld [vmem:[#allocation5 + $0x10] sm:$0xff]   ;;  %v2491_v7 = vld [vmem:[#allocation5 + $0x8] sm:$0xff]   ;;  %vm974_vm4 = vcmask 1044484   ;;  %vm976_vm5 = vcmask 1045509   ;;  %vm978_vm6 = vcmask 1046534  }
  0x28   :  { %2342 = vmatprep.subr.bf16.mxu0 %v2486_v1  ;;  %2461 = vmatprep.subr.bf16.mxu1 %v2486_v1  ;;  %v2505_v8 = vld [vmem:[#allocation2 + $0xb0] sm:$0xff]   ;;  %v2492_v9 = vld [vmem:[#allocation5] sm:$0xff]   ;;  %v2494_v10 = vld [vmem:[#allocation2 + $0x8] sm:$0xff]   ;;  %vm980_vm7 = vcmask 1047559  }
  0x29   :  { %2356 = vmatprep.mubr.bf16.mxu0 %v2493_v4  ;;  %2400 = vmatprep.mubr.bf16.mxu1 %v2505_v8  ;;  %v2495_v11 = vld [vmem:[#allocation2 + $0x10] sm:$0xff]   ;;  %v2506_v12 = vld [vmem:[#allocation2 + $0xb8] sm:$0xff]   ;;  %v2509_v13 = vld [vmem:[#allocation2 + $0xc0] sm:$0xff]  }
  0x2a   :  { %v2496_v14 = vld [vmem:[#allocation2 + $0x18] sm:$0xff]   ;;  %v2497_v15 = vld [vmem:[#allocation2 + $0x20] sm:$0xff]   ;;  %v2510_v16 = vld [vmem:[#allocation2 + $0xc8] sm:$0xff]  }
  0x2b   :  { %2343 = vmatpush3.bf16.msra.mxu0 %v2486_v1  ;;  %2469 = vmatpush3.bf16.msra.mxu1 %v2486_v1  ;;  %v2513_v17 = vld [vmem:[#allocation2 + $0xd0] sm:$0xff]   ;;  %v2498_v18 = vld [vmem:[#allocation2 + $0x28] sm:$0xff]   ;;  %v2514_v19 = vld [vmem:[#allocation2 + $0xd8] sm:$0xff]  }
  0x2c   :  { %2344 = vmatprep.subr.bf16.mxu0 %v2487_v2  ;;  %2462 = vmatprep.subr.bf16.mxu1 %v2487_v2  ;;  %v2499_v20 = vld [vmem:[#allocation2 + $0x30] sm:$0xff]   ;;  %v2517_v21 = vld [vmem:[#allocation2 + $0xe0] sm:$0xff]   ;;  %v2500_v22 = vld [vmem:[#allocation2 + $0x38] sm:$0xff]  }
  0x2d   :  { %v2518_v23 = vld [vmem:[#allocation2 + $0xe8] sm:$0xff]   ;;  %v2501_v24 = vld [vmem:[#allocation2 + $0x40] sm:$0xff]   ;;  %v2521_v25 = vld [vmem:[#allocation2 + $0xf0] sm:$0xff]  }
  0x2e   :  { %v2502_v26 = vld [vmem:[#allocation2 + $0x48] sm:$0xff]   ;;  %v2522_v27 = vld [vmem:[#allocation2 + $0xf8] sm:$0xff]   ;;  %v2503_v28 = vld [vmem:[#allocation2 + $0x50] sm:$0xff]  }
  0x2f   :  { %2345 = vmatpush3.bf16.msra.mxu0 %v2487_v2  ;;  %2470 = vmatpush3.bf16.msra.mxu1 %v2487_v2  ;;  %v2504_v29 = vld [vmem:[#allocation2 + $0x58] sm:$0xff]   ;;  %v2507_v30 = vld [vmem:[#allocation2 + $0x60] sm:$0xff]   ;;  %v2508_v31 = vld [vmem:[#allocation2 + $0x68] sm:$0xff]  }
  0x30   :  { %2346 = vmatprep.subr.bf16.mxu0 %v2488_v3  ;;  %2463 = vmatprep.subr.bf16.mxu1 %v2488_v3  ;;  %v2511_v32 = vld [vmem:[#allocation2 + $0x70] sm:$0xff]   ;;  %v2512_v33 = vld [vmem:[#allocation2 + $0x78] sm:$0xff]   ;;  %v2515_v34 = vld [vmem:[#allocation2 + $0x80] sm:$0xff]  }
  0x31   :  { %v2516_v35 = vld [vmem:[#allocation2 + $0x88] sm:$0xff]   ;;  %v2519_v36 = vld [vmem:[#allocation2 + $0x90] sm:$0xff]   ;;  %v2520_v37 = vld [vmem:[#allocation2 + $0x98] sm:$0xff]  }
  0x32   :  { %v2523_v38 = vld [vmem:[#allocation2 + $0xa0] sm:$0xff]   ;;  %v2524_v39 = vld [vmem:[#allocation2 + $0xa8] sm:$0xff]   ;;  %v2673_v40 = vld [vmem:[#allocation7 + $0x38] sm:$0xff]  }
  0x33   :  { %2347 = vmatpush3.bf16.msra.mxu0 %v2488_v3  ;;  %2471 = vmatpush3.bf16.msra.mxu1 %v2488_v3  ;;  %3760 = vst [vmem:[#allocation12_spill] sm:$0xff] %v2673_v40  ;;  %v2678_v42 = vld [vmem:[#allocation7 + $0x30] sm:$0xff]   ;;  %v2682_v43 = vld [vmem:[#allocation7 + $0x28] sm:$0xff]   ;;  %v2686_v44 = vld [vmem:[#allocation7 + $0x20] sm:$0xff]  }
  0x34   :  { %2348 = vmatprep.subr.bf16.mxu0 %v2489_v5  ;;  %2464 = vmatprep.subr.bf16.mxu1 %v2489_v5  ;;  %3761 = vst [vmem:[#allocation13_spill] sm:$0xff] %v2678_v42  ;;  %3762 = vst [vmem:[#allocation14_spill] sm:$0xff] %v2682_v43  ;;  %v2690_v45 = vld [vmem:[#allocation7 + $0x18] sm:$0xff]   ;;  %v2694_v46 = vld [vmem:[#allocation7 + $0x10] sm:$0xff]  }
  0x35   :  { %3763 = vst [vmem:[#allocation15_spill] sm:$0xff] %v2686_v44  ;;  %3764 = vst [vmem:[#allocation16_spill] sm:$0xff] %v2690_v45  ;;  %v2697_v47 = vld [vmem:[#allocation7 + $0x8] sm:$0xff]   ;;  %v2703_v48 = vld [vmem:[#allocation7] sm:$0xff]  }
  0x36   :  { %3765 = vst [vmem:[#allocation17_spill] sm:$0xff] %v2694_v46  ;;  %3766 = vst [vmem:[#allocation18_spill] sm:$0xff] %v2697_v47 }
  0x37   :  { %2349 = vmatpush3.bf16.msra.mxu0 %v2489_v5  ;;  %2472 = vmatpush3.bf16.msra.mxu1 %v2489_v5  ;;  %3767 = vst [vmem:[#allocation19_spill] sm:$0xff] %v2703_v48 }
  0x38   :  { %2350 = vmatprep.subr.bf16.mxu0 %v2490_v6  ;;  %2465 = vmatprep.subr.bf16.mxu1 %v2490_v6 }
  0x3b   :  { %2351 = vmatpush3.bf16.msra.mxu0 %v2490_v6  ;;  %2473 = vmatpush3.bf16.msra.mxu1 %v2490_v6 }
  0x3c   :  { %2352 = vmatprep.subr.bf16.mxu0 %v2491_v7  ;;  %2466 = vmatprep.subr.bf16.mxu1 %v2491_v7 }
  0x3f   :  { %2353 = vmatpush3.bf16.msra.mxu0 %v2491_v7  ;;  %2474 = vmatpush3.bf16.msra.mxu1 %v2491_v7 }
  0x40   :  { %2354 = vmatprep.subr.bf16.mxu0 %v2492_v9  ;;  %2467 = vmatprep.subr.bf16.mxu1 %v2492_v9 }
  0x43   :  { %2355 = vmatpush3.bf16.msra.mxu0 %v2492_v9  ;;  %2475 = vmatpush3.bf16.msra.mxu1 %v2492_v9 }
  0x44   :  { %2420 = vmatprep.subr.bf16.mxu1 %v3698_v41 }
  0x46   :  { %2357 = vmatmul.mubr.bf16.vlgmr.msra.gmra.mxu0 %v2494_v10  ;;  %2401 = vmatmul.mubr.bf16.vlgmr.msra.gmra.mxu1 %v2506_v12 }
  0x47   :  { %2360 = vmatprep.mubr.bf16.mxu0 %v2495_v11  ;;  %2404 = vmatprep.mubr.bf16.mxu1 %v2509_v13 }
  0x48   :  { %2421 = vmatpush3.bf16.msra.mxu1 %v2673_v40 }
  0x49   :  { %2422 = vmatprep.subr.bf16.mxu1 %v3698_v41 }
  0x4c   :  { %2423 = vmatpush3.bf16.msra.mxu1 %v2678_v42 }
  0x4d   :  { %2424 = vmatprep.subr.bf16.mxu1 %v3698_v41 }
  0x4e   :  { %2361 = vmatmul.mubr.bf16.gmra.mxu0 %v2496_v14  ;;  %2405 = vmatmul.mubr.bf16.gmra.mxu1 %v2510_v16 }
  0x4f   :  { %2364 = vmatprep.mubr.bf16.mxu0 %v2497_v15  ;;  %2408 = vmatprep.mubr.bf16.mxu1 %v2513_v17 }
  0x50   :  { %2425 = vmatpush3.bf16.msra.mxu1 %v2682_v43 }
  0x51   :  { %2426 = vmatprep.subr.bf16.mxu1 %v3698_v41 }
  0x54   :  { %2427 = vmatpush3.bf16.msra.mxu1 %v2686_v44 }
  0x55   :  { %2428 = vmatprep.subr.bf16.mxu1 %v3698_v41 }
  0x56   :  { %2365 = vmatmul.mubr.bf16.gmra.mxu0 %v2498_v18  ;;  %2409 = vmatmul.mubr.bf16.gmra.mxu1 %v2514_v19 }
  0x57   :  { %2368 = vmatprep.mubr.bf16.mxu0 %v2499_v20  ;;  %2412 = vmatprep.mubr.bf16.mxu1 %v2517_v21 }
  0x58   :  { %2429 = vmatpush3.bf16.msra.mxu1 %v2690_v45 }
  0x59   :  { %2430 = vmatprep.subr.bf16.mxu1 %v3698_v41 }
  0x5c   :  { %2431 = vmatpush3.bf16.msra.mxu1 %v2694_v46 }
  0x5d   :  { %2432 = vmatprep.subr.bf16.mxu1 %v3698_v41 }
  0x5e   :  { %2369 = vmatmul.mubr.bf16.gmra.mxu0 %v2500_v22  ;;  %2413 = vmatmul.mubr.bf16.gmra.mxu1 %v2518_v23 }
  0x5f   :  { %2372 = vmatprep.mubr.bf16.mxu0 %v2501_v24  ;;  %2416 = vmatprep.mubr.bf16.mxu1 %v2521_v25 }
  0x60   :  { %2433 = vmatpush3.bf16.msra.mxu1 %v2697_v47 }
  0x61   :  { %2434 = vmatprep.subr.bf16.mxu1 %v3698_v41 }
  0x64   :  { %2435 = vmatpush3.bf16.msra.mxu1 %v2703_v48 }
  0x65   :  { %2440 = vmatprep.subr.bf16.mxu1 %v3698_v41 }
  0x66   :  { %2373 = vmatmul.mubr.bf16.gmra.mxu0 %v2502_v26  ;;  %2417 = vmatmul.mubr.bf16.gmra.mxu1 %v2522_v27 }
  0x67   :  { %2376 = vmatprep.mubr.bf16.mxu0 %v2503_v28  ;;  %2436 = vmatprep.mubr.msk.bf16.mxu1 %vm2627_vm0, %v3698_v41 }
  0x6e   :  { %2377 = vmatmul.mubr.bf16.gmra.mxu0 %v2504_v29 }
  0x6f   :  { %2380 = vmatprep.mubr.bf16.mxu0 %v2507_v30 }
  0x76   :  { %2381 = vmatmul.mubr.bf16.gmra.mxu0 %v2508_v31 }
  0x77   :  { %2384 = vmatprep.mubr.bf16.mxu0 %v2511_v32 }
  0x7e   :  { %2385 = vmatmul.mubr.bf16.gmra.mxu0 %v2512_v33 }
  0x7f   :  { %2388 = vmatprep.mubr.bf16.mxu0 %v2515_v34 }
  0x86   :  { %2389 = vmatmul.mubr.bf16.gmra.mxu0 %v2516_v35 }
  0x87   :  { %2392 = vmatprep.mubr.bf16.mxu0 %v2519_v36 }
  0x8e   :  { %2393 = vmatmul.mubr.bf16.gmra.mxu0 %v2520_v37 }
  0x8f   :  { %2396 = vmatprep.mubr.bf16.mxu0 %v2523_v38 }
  0x96   :  { %2397 = vmatmul.mubr.bf16.gmra.mxu0 %v2524_v39 }
 0x106   :  { %v2708_v49 = vpop.f32.mrf.mxu0  ;;  %v2710_v50 = vpop.f32.mrf.mxu1 }
 0x107   :  { %3768 = vst [vmem:[#allocation20_spill] sm:$0xff] %v2708_v49  ;;  %v776_v9 = vmul.f32 %v2708_v49, %v2708_v49 }
 0x108   :  { %v2712_v51 = vpop.f32.mrf.mxu0  ;;  %v2714_v52 = vpop.f32.mrf.mxu1 }
 0x109   :  { %3769 = vst [vmem:[#allocation21_spill] sm:$0xff] %v2712_v51  ;;  %v774_v3 = vmul.f32 %v2712_v51, %v2712_v51 }
 0x10a   :  { %v2716_v53 = vpop.f32.mrf.mxu0  ;;  %v2718_v54 = vpop.f32.mrf.mxu1 }
 0x10b   :  { %3770 = vst [vmem:[#allocation22_spill] sm:$0xff] %v2716_v53  ;;  %v777_v15 = vmul.f32 %v2716_v53, %v2716_v53 }
 0x10c   :  { %v2720_v55 = vpop.f32.mrf.mxu0  ;;  %v2722_v56 = vpop.f32.mrf.mxu1 }
 0x10d   :  { %3771 = vst [vmem:[#allocation23_spill] sm:$0xff] %v2720_v55  ;;  %v775_v0 = vmul.f32 %v2720_v55, %v2720_v55  ;;  %v670_v4 = vadd.f32 %v2720_v55, %v2712_v51 }
 0x10e   :  { %v2724_v57 = vpop.f32.mrf.mxu0  ;;  %v2728_v59 = vpop.f32.mrf.mxu1 }
 0x10f   :  { %3772 = vst [vmem:[#allocation24_spill] sm:$0xff] %v2724_v57  ;;  %3774 = vst [vmem:[#allocation26_spill] sm:$0xff] %v2728_v59  ;;  %v838_v6 = vadd.f32 %v775_v0, %v774_v3  ;;  %v671_v10 = vadd.f32 %v2708_v49, %v670_v4  ;;  %v780_v38 = vmul.f32 %v2724_v57, %v2724_v57 }
 0x110   :  { %v2726_v58 = vpop.f32.mrf.mxu0  ;;  %v2734_v62 = vpop.f32.mrf.mxu1  ;;  %v824_v4 = vmul.f32 %v2728_v59, %v2728_v59 }
 0x111   :  { %3773 = vst [vmem:[#allocation25_spill] sm:$0xff] %v2726_v58  ;;  %3777 = vst [vmem:[#allocation29_spill] sm:$0xff] %v2734_v62  ;;  %v839_v12 = vadd.f32 %v838_v6, %v776_v9  ;;  %v672_v16 = vadd.f32 %v2716_v53, %v671_v10  ;;  %v778_v23 = vmul.f32 %v2726_v58, %v2726_v58 }
 0x112   :  { %v2730_v60 = vpop.f32.mrf.mxu0  ;;  %v2742_v2 = vpop.f32.mrf.mxu1  ;;  %v822_v32 = vmul.f32 %v2734_v62, %v2734_v62 }
 0x113   :  { %3775 = vst [vmem:[#allocation27_spill] sm:$0xff] %v2730_v60  ;;  %3780 = vst [vmem:[#allocation32_spill] sm:$0xff] %v2742_v2  ;;  %v840_v18 = vadd.f32 %v839_v12, %v777_v15  ;;  %v673_v22 = vadd.f32 %v672_v16, %v2726_v58  ;;  %v781_v16 = vmul.f32 %v2730_v60, %v2730_v60 }
 0x114   :  { %v2732_v61 = vpop.f32.mrf.mxu0  ;;  %v2752_v8 = vpop.f32.mrf.mxu1 }
 0x115   :  { %3776 = vst [vmem:[#allocation28_spill] sm:$0xff] %v2732_v61  ;;  %3783 = vst [vmem:[#allocation35_spill] sm:$0xff] %v2752_v8  ;;  %v748_v21 = vadd.f32 %v2752_v8, %v2734_v62  ;;  %v841_v25 = vadd.f32 %v840_v18, %v778_v23  ;;  %v779_v26 = vmul.f32 %v2732_v61, %v2732_v61 }
 0x116   :  { %v2736_v63 = vpop.f32.mrf.mxu0  ;;  %v2761_v14 = vpop.f32.mrf.mxu1  ;;  %v674_v30 = vadd.f32 %v673_v22, %v2732_v61  ;;  %v823_v33 = vmul.f32 %v2752_v8, %v2752_v8  ;;  %v825_v23 = vmul.f32 %v2742_v2, %v2742_v2 }
 0x117   :  { %3778 = vst [vmem:[#allocation30_spill] sm:$0xff] %v2736_v63  ;;  %3786 = vst [vmem:[#allocation38_spill] sm:$0xff] %v2761_v14  ;;  %v749_v29 = vadd.f32 %v2728_v59, %v748_v21  ;;  %v842_v34 = vadd.f32 %v841_v25, %v779_v26  ;;  %v2843_v59 = vld [vmem:[%s3696_s3] sm:$0x7]  ;;  %s2629_s3 = smov [#allocation8]  }
 0x118   :  { %v2740_v1 = vpop.f32.mrf.mxu0  ;;  %v2770_v20 = vpop.f32.mrf.mxu1  ;;  %v675_v39 = vadd.f32 %v2724_v57, %v674_v30  ;;  %v916_v6 = vadd.f32 %v823_v33, %v822_v32  ;;  %v943_v33 = vlaneseq  ;;  %3802 = vst [vmem:[#allocation54_spill] sm:$0xff] %v2843_v59  ;;  %v828_v57 = vmul.f32 %v2761_v14, %v2761_v14  ;;  %s1902_s5 = sshll.u32 %s2629_s3, 4  ;;  %s1903_s5 = int_to_ptr.vmem [resolvable:$true] %s1902_s5 }
 0x119   :  { %3779 = vst [vmem:[#allocation31_spill] sm:$0xff] %v2740_v1  ;;  %3789 = vst [vmem:[#allocation41_spill] sm:$0xff] %v2770_v20  ;;  %v750_v37 = vadd.f32 %v2742_v2, %v749_v29  ;;  %v843_v9 = vadd.f32 %v842_v34, %v780_v38  ;;  %v782_v38 = vmul.f32 %v2740_v1, %v2740_v1  ;;  %s2595_s6 = scalar_lea.vmem %s1903_s5, 4096  ;;  %p2600_p2 = scmp.lt.s32.totalorder %s1903_s5, %s1903_s5 }
 0x11a   :  { %v2748_v5 = vpop.f32.mrf.mxu0  ;;  %v2783_v28 = vpop.f32.mrf.mxu1  ;;  %v676_v18 = vadd.f32 %v2730_v60, %v675_v39  ;;  %v917_v25 = vadd.f32 %v916_v6, %v824_v4  ;;  %v826_v4 = vmul.f32 %v2770_v20, %v2770_v20  ;;  %p2596_p1 = scmp.ne.s32.totalorder %s1903_s5, %s2595_s6  ;;  %p2601_p3 = scmp.lt.s32.totalorder %s2595_s6, %s2595_s6 }
 0x11b   :  { %3781 = vst [vmem:[#allocation33_spill] sm:$0xff] %v2748_v5  ;;  %3792 = vst [vmem:[#allocation44_spill] sm:$0xff] %v2783_v28  ;;  %v751_v15 = vadd.f32 %v750_v37, %v2770_v20  ;;  %v844_v26 = vadd.f32 %v843_v9, %v781_v16 }
 0x11c   :  { %v2750_v7 = vpop.f32.mrf.mxu0  ;;  %v2795_v36 = vpop.f32.mrf.mxu1  ;;  %v677_v37 = vrot.slane %v676_v18, 4  ;;  %v918_v6 = vadd.f32 %v917_v25, %v825_v23  ;;  %v784_v23 = vmul.f32 %v2736_v63, %v2736_v63  ;;  %p2602_p4 = por %p2601_p3, %p2600_p2 }
 0x11d   :  { %3782 = vst [vmem:[#allocation34_spill] sm:$0xff] %v2750_v7  ;;  %3795 = vst [vmem:[#allocation47_spill] sm:$0xff] %v2795_v36  ;;  %v683_v0 = vadd.f32 %v2750_v7, %v2740_v1  ;;  %v783_v29 = vmul.f32 %v2750_v7, %v2750_v7  ;;  %v752_v34 = vadd.f32 %v751_v15, %v2795_v36  ;;  %v845_v9 = vrot.slane %v844_v26, 4 }
 0x11e   :  { %v2757_v11 = vpop.f32.mrf.mxu0  ;;  %v2809_v12 = vpop.f32.mrf.mxu1  ;;  %v678_v20 = vadd.f32 %v677_v37, %v676_v18  ;;  %v919_v62 = vadd.f32 %v918_v6, %v826_v4  ;;  %v827_v7 = vmul.f32 %v2795_v36, %v2795_v36  ;;  %v2870_v6 = vmul.f32 2.0, %v2843_v59  ;;  %p2603_p5 = pnand %p2602_p4, %p2596_p1 }
 0x11f   :  { %3784 = vst [vmem:[#allocation36_spill] sm:$0xff] %v2757_v11  ;;  %3796 = vst [vmem:[#allocation48_spill] sm:$0xff] %v2809_v12  ;;  %v684_v21 = vadd.f32 %v2736_v63, %v683_v0  ;;  %v851_v16 = vadd.f32 %v783_v29, %v782_v38  ;;  %v753_v8 = vadd.f32 %v2761_v14, %v752_v34 }
 0x120   :  { %v2759_v13 = vpop.f32.mrf.mxu0  ;;  %v2824_v32 = vpop.f32.mrf.mxu1  ;;  %v1008_v38 = vmul.f32 %v2843_v59, %v2843_v59  ;;  %v846_v1 = vadd.f32 %v845_v9, %v844_v26  ;;  %v679_v26 = vrot.slane %v678_v20, 2  ;;  %v785_v9 = vmul.f32 %v2748_v5, %v2748_v5 }
 0x121   :  { %3785 = vst [vmem:[#allocation37_spill] sm:$0xff] %v2759_v13  ;;  %3798 = vst [vmem:[#allocation50_spill] sm:$0xff] %v2824_v32  ;;  %v685_v39 = vadd.f32 %v2748_v5, %v684_v21  ;;  %v2845_v21 = vshrl.u32 %v943_v33, 7  ;;  %v942_v33 = vmul.f32 64.0, %v2843_v59  ;;  %v852_v60 = vadd.f32 %v851_v16, %v784_v23 }
 0x122   :  { %v2766_v17 = vpop.f32.mrf.mxu0  ;;  %v2838_v15 = vpop.f32.mrf.mxu1  ;;  %v754_v4 = vadd.f32 %v2783_v28, %v753_v8  ;;  %v1009_v23 = vmul.f32 64.0, %v1008_v38  ;;  %v920_v61 = vadd.f32 %v919_v62, %v827_v7  ;;  %v847_v58 = vrot.slane %v846_v1, 2 }
 0x123   :  { %3787 = vst [vmem:[#allocation39_spill] sm:$0xff] %v2766_v17  ;;  %3801 = vst [vmem:[#allocation53_spill] sm:$0xff] %v2838_v15  ;;  %v686_v25 = vadd.f32 %v685_v39, %v2759_v13  ;;  %v2864_v39 = vsub.s32 0, %v2845_v21  ;;  %v853_v53 = vadd.f32 %v852_v60, %v785_v9  ;;  %v680_v51 = vadd.f32 %v679_v26, %v678_v20 }
 0x124   :  { %v2768_v19 = vpop.f32.mrf.mxu0  ;;  %3803 = vst [vmem:[#allocation55_spill] sm:$0xff] %v2845_v21  ;;  %v2861_v37 = vpop.f32.mrf.mxu1  ;;  %v755_v38 = vrot.slane %v754_v4, 4  ;;  %v786_v62 = vmul.f32 %v2759_v13, %v2759_v13  ;;  %v921_v9 = vadd.f32 %v920_v61, %v828_v57  ;;  %v848_v20 = vadd.f32 %v847_v58, %v846_v1 }
 0x125   :  { %3788 = vst [vmem:[#allocation40_spill] sm:$0xff] %v2768_v19  ;;  %3806 = vst [vmem:[#allocation58_spill] sm:$0xff] %v2861_v37  ;;  %v761_v8 = vadd.f32 %v2861_v37, %v2824_v32  ;;  %v787_v13 = vmul.f32 %v2768_v19, %v2768_v19  ;;  %v2913_v60 = vmul.f32 %v2710_v50, %v2710_v50  ;;  %v681_v61 = vrot.slane %v680_v51, 1 }
 0x126   :  { %v2777_v24 = vpop.f32.mrf.mxu0  ;;  %v2885_v5 = vpop.f32.mrf.mxu1  ;;  %v854_v26 = vadd.f32 %v853_v53, %v786_v62  ;;  %v2917_v57 = vmul.f32 %v2714_v52, %v2714_v52  ;;  %v756_v53 = vadd.f32 %v755_v38, %v754_v4  ;;  %v788_v62 = vmul.f32 %v2757_v11, %v2757_v11 }
 0x127   :  { %3790 = vst [vmem:[#allocation42_spill] sm:$0xff] %v2777_v24  ;;  %3808 = vst [vmem:[#allocation60_spill] sm:$0xff] %v2885_v5  ;;  %v832_v4 = vmul.f32 %v2809_v12, %v2809_v12  ;;  %v849_v38 = vrot.slane %v848_v20, 1 }
 0x128   :  { %v2781_v27 = vpop.f32.mrf.mxu0  ;;  %v2909_v21 = vpop.f32.mrf.mxu1 }
 0x129   :  { %3791 = vst [vmem:[#allocation43_spill] sm:$0xff] %v2781_v27  ;;  %3810 = vst [vmem:[#allocation62_spill] sm:$0xff] %v2909_v21 }
 0x12a   :  { %v2787_v31 = vpop.f32.mrf.mxu0  ;;  %v2943_v46 = vpop.f32.mrf.mxu1 }
 0x12b   :  { %3793 = vst [vmem:[#allocation45_spill] sm:$0xff] %v2787_v31 }
 0x12c   :  { %v2793_v35 = vpop.f32.mrf.mxu0 }
 0x12d   :  { %3794 = vst [vmem:[#allocation46_spill] sm:$0xff] %v2793_v35  ;;  %v696_v41 = vadd.f32 %v2793_v35, %v2781_v27 }
 0x12e   :  { %v2803_v3 = vpop.f32.mrf.mxu0 }
 0x12f   :  { %v697_v18 = vadd.f32 %v2777_v24, %v696_v41  ;;  %v687_v41 = vadd.f32 %v686_v25, %v2768_v19  ;;  %v2888_v25 = vrot.slane %v942_v33, %v2864_v39  ;;  %v762_v33 = vadd.f32 %v2809_v12, %v761_v8 }
 0x130   :  { %v2807_v10 = vpop.f32.mrf.mxu0  ;;  %v791_v19 = vmul.f32 %v2793_v35, %v2793_v35  ;;  %v2950_v12 = vadd.f32 %v681_v61, %v680_v51  ;;  %v2958_v35 = vmul.f32 %v2838_v15, %v2838_v15  ;;  %v2966_v61 = vadd.f32 %v849_v38, %v848_v20 }
 0x131   :  { %v698_v49 = vadd.f32 %v2787_v31, %v697_v18  ;;  %v688_v7 = vadd.f32 %v2757_v11, %v687_v41  ;;  %v829_v18 = vmul.f32 %v2783_v28, %v2783_v28  ;;  %v757_v11 = vrot.slane %v756_v53, 2 }
 0x132   :  { %v2816_v22 = vpop.f32.mrf.mxu0  ;;  %v2980_v20 = vadd.f32 %v2888_v25, %v2950_v12 }
 0x133   :  { %3797 = vst [vmem:[#allocation49_spill] sm:$0xff] %v2816_v22  ;;  %v699_v41 = vadd.f32 %v698_v49, %v2807_v10  ;;  %v689_v1 = vadd.f32 %v2766_v17, %v688_v7  ;;  %v2923_v49 = vmul.f32 %v2718_v54, %v2718_v54  ;;  %v2933_v28 = vadd.f32 %v921_v9, %v829_v18 }
 0x134   :  { %v2822_v30 = vpop.f32.mrf.mxu0  ;;  %v855_v7 = vadd.f32 %v854_v26, %v787_v13  ;;  %v789_v18 = vmul.f32 %v2766_v17, %v2766_v17  ;;  %v790_v26 = vmul.f32 %v2781_v27, %v2781_v27  ;;  %v758_v42 = vadd.f32 %v757_v11, %v756_v53 }
 0x135   :  { %v700_v48 = vadd.f32 %v699_v41, %v2822_v30  ;;  %v690_v13 = vrot.slane %v689_v1, 4 }
 0x136   :  { %v2830_v0 = vpop.f32.mrf.mxu0  ;;  %v856_v45 = vadd.f32 %v855_v7, %v788_v62  ;;  %v864_v27 = vadd.f32 %v791_v19, %v790_v26 }
 0x137   :  { %3799 = vst [vmem:[#allocation51_spill] sm:$0xff] %v2830_v0  ;;  %v701_v44 = vadd.f32 %v2803_v3, %v700_v48  ;;  %v691_v19 = vadd.f32 %v690_v13, %v689_v1  ;;  %v792_v48 = vmul.f32 %v2777_v24, %v2777_v24 }
 0x138   :  { %v2836_v2 = vpop.f32.mrf.mxu0 }
 0x139   :  { %3800 = vst [vmem:[#allocation52_spill] sm:$0xff] %v2836_v2  ;;  %v865_v26 = vadd.f32 %v864_v27, %v792_v48 }
 0x13a   :  { %v2851_v29 = vpop.f32.mrf.mxu0 }
 0x13b   :  { %3804 = vst [vmem:[#allocation56_spill] sm:$0xff] %v2851_v29 }
 0x13c   :  { %v2859_v34 = vpop.f32.mrf.mxu0 }
 0x13d   :  { %3805 = vst [vmem:[#allocation57_spill] sm:$0xff] %v2859_v34  ;;  %v709_v63 = vadd.f32 %v2859_v34, %v2836_v2  ;;  %v799_v17 = vmul.f32 %v2859_v34, %v2859_v34  ;;  %v798_v34 = vmul.f32 %v2836_v2, %v2836_v2  ;;  %v702_v2 = vadd.f32 %v2816_v22, %v701_v44 }
 0x13e   :  { %v2875_v16 = vpop.f32.mrf.mxu0  ;;  %v3003_v44 = vmul.f32 %v2885_v5, %v2885_v5 }
 0x13f   :  { %v710_v36 = vadd.f32 %v2830_v0, %v709_v63  ;;  %v877_v38 = vadd.f32 %v799_v17, %v798_v34  ;;  %v759_v17 = vrot.slane %v758_v42, 1 }
 0x140   :  { %v2883_v55 = vpop.f32.mrf.mxu0 }
 0x141   :  { %3807 = vst [vmem:[#allocation59_spill] sm:$0xff] %v2883_v55  ;;  %v711_v63 = vadd.f32 %v2851_v29, %v710_v36  ;;  %v2902_v36 = vrot.slane %v1009_v23, %v2864_v39  ;;  %v2927_v23 = vmul.f32 %v2722_v56, %v2722_v56  ;;  %v3015_v40 = vadd.f32 %v759_v17, %v758_v42 }
 0x142   :  { %v2894_v14 = vpop.f32.mrf.mxu0 }
 0x143   :  { %v712_v58 = vadd.f32 %v711_v63, %v2883_v55  ;;  %v763_v63 = vadd.f32 %v2838_v15, %v762_v33  ;;  %v830_v33 = vmul.f32 %v2824_v32, %v2824_v32  ;;  %v831_v32 = vmul.f32 %v2861_v37, %v2861_v37  ;;  %v2971_v15 = vpop.f32.mrf.mxu1 }
 0x144   :  { %v2907_v59 = vpop.f32.mrf.mxu0 }
 0x145   :  { %3809 = vst [vmem:[#allocation61_spill] sm:$0xff] %v2907_v59  ;;  %v713_v9 = vadd.f32 %v712_v58, %v2907_v59  ;;  %v764_v51 = vadd.f32 %v763_v63, %v2909_v21  ;;  %v929_v11 = vadd.f32 %v831_v32, %v830_v33  ;;  %v692_v32 = vrot.slane %v691_v19, 2 }
 0x146   :  { %v2929_v8 = vpop.f32.mrf.mxu0 }
 0x147   :  { %3811 = vst [vmem:[#allocation63_spill] sm:$0xff] %v2929_v8  ;;  %v714_v58 = vadd.f32 %v2875_v16, %v713_v9  ;;  %v765_v53 = vadd.f32 %v764_v51, %v2971_v15  ;;  %v857_v9 = vadd.f32 %v856_v45, %v789_v18  ;;  %v793_v45 = vmul.f32 %v2787_v31, %v2787_v31 }
 0x148   :  { %v2941_v47 = vpop.f32.mrf.mxu0  ;;  %v930_v33 = vadd.f32 %v929_v11, %v832_v4  ;;  %v693_v4 = vadd.f32 %v692_v32, %v691_v19  ;;  %v794_v11 = vmul.f32 %v2807_v10, %v2807_v10  ;;  %v795_v19 = vmul.f32 %v2822_v30, %v2822_v30 }
 0x149   :  { %3812 = vst [vmem:[#allocation64_spill] sm:$0xff] %v2941_v47  ;;  %v806_v1 = vmul.f32 %v2941_v47, %v2941_v47  ;;  %v715_v24 = vadd.f32 %v2894_v14, %v714_v58  ;;  %v766_v58 = vadd.f32 %v2885_v5, %v765_v53  ;;  %v858_v48 = vrot.slane %v857_v9, 4 }
 0x14a   :  { %v2954_v41 = vpop.f32.mrf.mxu0 }
 0x14b   :  { %3813 = vst [vmem:[#allocation65_spill] sm:$0xff] %v2954_v41  ;;  %v767_v42 = vadd.f32 %v2943_v46, %v766_v58  ;;  %v809_v32 = vmul.f32 %v2954_v41, %v2954_v41  ;;  %v3038_v58 = vadd.f32 %v858_v48, %v857_v9 }
 0x14c   :  { %v2969_v43 = vpop.f32.mrf.mxu0 }
 0x14d   :  { %3814 = vst [vmem:[#allocation66_spill] sm:$0xff] %v2969_v43  ;;  %v722_v37 = vadd.f32 %v2969_v43, %v2941_v47  ;;  %v807_v62 = vmul.f32 %v2969_v43, %v2969_v43  ;;  %v800_v43 = vmul.f32 %v2830_v0, %v2830_v0  ;;  %v866_v47 = vadd.f32 %v865_v26, %v793_v45 }
 0x14e   :  { %v2986_v63 = vpop.f32.mrf.mxu0  ;;  %v808_v0 = vmul.f32 %v2929_v8, %v2929_v8  ;;  %v834_v45 = vmul.f32 %v2909_v21, %v2909_v21  ;;  %v803_v21 = vmul.f32 %v2907_v59, %v2907_v59 }
 0x14f   :  { %v723_v7 = vadd.f32 %v2929_v8, %v722_v37  ;;  %v890_v27 = vadd.f32 %v807_v62, %v806_v1  ;;  %v878_v18 = vadd.f32 %v877_v38, %v800_v43  ;;  %v801_v62 = vmul.f32 %v2851_v29, %v2851_v29 }
 0x150   :  { %v2993_v13 = vpop.f32.mrf.mxu0  ;;  %v716_v1 = vrot.slane %v715_v24, 4  ;;  %v796_v38 = vmul.f32 %v2803_v3, %v2803_v3  ;;  %v867_v17 = vadd.f32 %v866_v47, %v794_v11  ;;  %v3042_v47 = vadd.f32 %v2888_v25, %v3015_v40 }
 0x151   :  { %3815 = vst [vmem:[#allocation67_spill] sm:$0xff] %v2993_v13  ;;  %v724_v34 = vadd.f32 %v2954_v41, %v723_v7  ;;  %v703_v7 = vrot.slane %v702_v2, 4  ;;  %v891_v53 = vadd.f32 %v890_v27, %v808_v0  ;;  %v802_v0 = vmul.f32 %v2883_v55, %v2883_v55 }
 0x152   :  { %v3005_v37 = vpop.f32.mrf.mxu0  ;;  %v717_v27 = vadd.f32 %v716_v1, %v715_v24  ;;  %v768_v24 = vrot.slane %v767_v42, 4  ;;  %v810_v9 = vmul.f32 %v2993_v13, %v2993_v13 }
 0x153   :  { %v725_v51 = vadd.f32 %v724_v34, %v2993_v13  ;;  %v879_v34 = vadd.f32 %v878_v18, %v801_v62  ;;  %v931_v18 = vadd.f32 %v930_v33, %v2958_v35  ;;  %v797_v35 = vmul.f32 %v2816_v22, %v2816_v22 }
 0x154   :  { %v3011_v31 = vpop.f32.mrf.mxu0  ;;  %v868_v33 = vadd.f32 %v867_v17, %v795_v19  ;;  %v718_v1 = vrot.slane %v717_v27, 2  ;;  %v769_v29 = vadd.f32 %v768_v24, %v767_v42 }
 0x155   :  { %v726_v43 = vadd.f32 %v725_v51, %v3011_v31  ;;  %v704_v51 = vadd.f32 %v703_v7, %v702_v2  ;;  %v892_v2 = vadd.f32 %v891_v53, %v809_v32  ;;  %v880_v11 = vadd.f32 %v879_v34, %v802_v0 }
 0x156   :  { %v3022_v26 = vpop.f32.mrf.mxu0  ;;  %v932_v53 = vadd.f32 %v931_v18, %v834_v45  ;;  %v811_v59 = vmul.f32 %v3011_v31, %v3011_v31 }
 0x157   :  { %v727_v5 = vadd.f32 %v2986_v63, %v726_v43  ;;  %v694_v43 = vrot.slane %v693_v4, 1  ;;  %v893_v0 = vadd.f32 %v892_v2, %v810_v9  ;;  %v881_v19 = vadd.f32 %v880_v11, %v803_v21 }
 0x158   :  { %v3032_v8 = vpop.f32.mrf.mxu0  ;;  %v816_v18 = vmul.f32 %v3022_v26, %v3022_v26  ;;  %v804_v2 = vmul.f32 %v2875_v16, %v2875_v16  ;;  %v719_v9 = vadd.f32 %v718_v1, %v717_v27  ;;  %v812_v27 = vmul.f32 %v2986_v63, %v2986_v63 }
 0x159   :  { %3816 = vst [vmem:[#allocation68_spill] sm:$0xff] %v3032_v8  ;;  %v728_v62 = vadd.f32 %v3005_v37, %v727_v5  ;;  %v705_v5 = vrot.slane %v704_v51, 2  ;;  %v814_v55 = vmul.f32 %v3032_v8, %v3032_v8  ;;  %v894_v11 = vadd.f32 %v893_v0, %v811_v59 }
 0x15a   :  { %v3044_v7 = vpop.f32.mrf.mxu0  ;;  %v882_v24 = vadd.f32 %v881_v19, %v804_v2  ;;  %v805_v59 = vmul.f32 %v2894_v14, %v2894_v14  ;;  %v813_v2 = vmul.f32 %v3005_v37, %v3005_v37 }
 0x15b   :  { %v729_v41 = vrot.slane %v728_v62, 4  ;;  %v706_v45 = vadd.f32 %v705_v5, %v704_v51  ;;  %v817_v42 = vmul.f32 %v3044_v7, %v3044_v7  ;;  %v770_v5 = vrot.slane %v769_v29, 2 }
 0x15c   :  { %v3052_v48 = vpop.f32.mrf.mxu0 }
 0x15d   :  { %3817 = vst [vmem:[#allocation69_spill] sm:$0xff] %v3052_v48  ;;  %v730_v32 = vadd.f32 %v729_v41, %v728_v62  ;;  %v735_v34 = vadd.f32 %v3052_v48, %v3032_v8  ;;  %v815_v17 = vmul.f32 %v3052_v48, %v3052_v48  ;;  %v869_v41 = vadd.f32 %v868_v33, %v796_v38 }
 0x15e   :  { %v835_v8 = vmul.f32 %v2971_v15, %v2971_v15  ;;  %v3072_v38 = vadd.f32 %v694_v43, %v693_v4  ;;  %v707_v33 = vrot.slane %v706_v45, 1  ;;  %v895_v43 = vadd.f32 %v894_v11, %v812_v27 }
 0x15f   :  { %v731_v13 = vrot.slane %v730_v32, 2  ;;  %v736_v22 = vadd.f32 %v3022_v26, %v735_v34  ;;  %v903_v62 = vadd.f32 %v815_v17, %v814_v55  ;;  %v870_v34 = vadd.f32 %v869_v41, %v797_v35 }
 0x160   :  { %v933_v0 = vadd.f32 %v932_v53, %v835_v8  ;;  %v948_v35 = vadd.f32 %v2888_v25, %v3072_v38  ;;  %v771_v19 = vadd.f32 %v770_v5, %v769_v29  ;;  %v837_v8 = vmul.f32 %v2943_v46, %v2943_v46 }
 0x161   :  { %v737_v48 = vadd.f32 %v3044_v7, %v736_v22  ;;  %v732_v21 = vadd.f32 %v731_v13, %v730_v32  ;;  %v904_v51 = vadd.f32 %v903_v62, %v816_v18  ;;  %v860_v22 = vrot.slane %v3038_v58, 2 }
 0x162   :  { %v720_v13 = vrot.slane %v719_v9, 1  ;;  %v708_v18 = vadd.f32 %v707_v33, %v706_v45  ;;  %v871_v62 = vrot.slane %v870_v34, 4  ;;  %v934_v45 = vadd.f32 %v933_v0, %v3003_v44 }
 0x163   :  { %v738_v55 = vadd.f32 %v737_v48, %v2714_v52  ;;  %v905_v1 = vadd.f32 %v904_v51, %v817_v42  ;;  %v733_v4 = vrot.slane %v732_v21, 1  ;;  %v883_v48 = vadd.f32 %v882_v24, %v805_v59 }
 0x164   :  { %v721_v11 = vadd.f32 %v720_v13, %v719_v9  ;;  %v896_v51 = vadd.f32 %v895_v43, %v813_v2  ;;  %v1038_v33 = vpack.c.bf16 %v2980_v20, %v2980_v20  ;;  %v1039_v27 = vpack.c.bf16 %v948_v35, %v948_v35 }
 0x165   :  { %v739_v32 = vadd.f32 %v738_v55, %v2722_v56  ;;  %v906_v17 = vadd.f32 %v905_v1, %v2917_v57  ;;  %v1044_v57 = vpack.c.bf16 %v3042_v47, %v3042_v47  ;;  %v734_v53 = vadd.f32 %v733_v4, %v732_v21 }
 0x166   :  { %v884_v5 = vrot.slane %v883_v48, 4  ;;  %v772_v47 = vrot.slane %v771_v19, 1  ;;  %v872_v1 = vadd.f32 %v871_v62, %v870_v34  ;;  %v949_v21 = vadd.f32 %v2888_v25, %v708_v18 }
 0x167   :  { %v740_v41 = vadd.f32 %v2710_v50, %v739_v32  ;;  %v907_v42 = vadd.f32 %v906_v17, %v2927_v23  ;;  %v3818_v23 = vrot.slane %v2933_v28, 4  ;;  %v861_v44 = vadd.f32 %v860_v22, %v3038_v58 }
 0x168   :  { %v897_v32 = vrot.slane %v896_v51, 4  ;;  %v951_v4 = vadd.f32 %v2888_v25, %v734_v53  ;;  %v935_v43 = vadd.f32 %v934_v45, %v837_v8  ;;  %v885_v20 = vadd.f32 %v884_v5, %v883_v48 }
 0x169   :  { %v741_v29 = vadd.f32 %v2718_v54, %v740_v41  ;;  %v908_v24 = vadd.f32 %v907_v42, %v2913_v60  ;;  %v3098_v9 = vadd.f32 %v3818_v23, %v2933_v28  ;;  %v950_v60 = vadd.f32 %v2888_v25, %v721_v11 }
 0x16a   :  { %v3106_v28 = vunpack.c.l.b16 %v1044_v57  ;;  %v773_v0 = vadd.f32 %v772_v47, %v771_v19  ;;  %v1054_v35 = vunpack.c.l.b16 %v1038_v33  ;;  %v1055_v58 = vunpack.c.l.b16 %v1039_v27 }
 0x16b   :  { %v742_v55 = vrot.slane %v741_v29, 4  ;;  %v909_v13 = vadd.f32 %v908_v24, %v2923_v49  ;;  %v925_v34 = vrot.slane %v3098_v9, 2  ;;  %v873_v22 = vrot.slane %v872_v1, 2 }
 0x16c   :  { %v1040_v41 = vpack.c.bf16 %v949_v21, %v949_v21  ;;  %v862_v62 = vrot.slane %v861_v44, 1  ;;  %v1041_v2 = vpack.c.bf16 %v950_v60, %v950_v60  ;;  %v1072_v57 = vrot.slane %v3106_v28, 2 }
 0x16d   :  { %v743_v59 = vadd.f32 %v742_v55, %v741_v29  ;;  %v910_v42 = vrot.slane %v909_v13, 4  ;;  %v898_v29 = vadd.f32 %v897_v32, %v896_v51  ;;  %v1042_v24 = vpack.c.bf16 %v951_v4, %v951_v4 }
 0x16e   :  { %v936_v23 = vrot.slane %v935_v43, 4  ;;  %v969_v48 = vsel %vm968_vm1, %v3072_v38, %v2950_v12  ;;  %v886_v8 = vrot.slane %v885_v20, 2  ;;  %v954_v19 = vadd.f32 %v2888_v25, %v773_v0 }
 0x16f   :  { %v744_v17 = vrot.slane %v743_v59, 2  ;;  %v1062_v5 = vrot.slane %v1055_v58, 7  ;;  %v874_v47 = vadd.f32 %v873_v22, %v872_v1  ;;  %v971_v55 = vsel %vm970_vm2, %v708_v18, %v969_v48 }
 0x170   :  { %v1056_v33 = vunpack.c.l.b16 %v1040_v41  ;;  %v973_v27 = vsel %vm972_vm3, %v721_v11, %v971_v55  ;;  %v1057_v21 = vunpack.c.l.b16 %v1041_v2  ;;  %v911_v51 = vadd.f32 %v910_v42, %v909_v13 }
 0x171   :  { %v745_v49 = vadd.f32 %v744_v17, %v743_v59  ;;  %v899_v59 = vrot.slane %v898_v29, 2  ;;  %v975_v28 = vsel %vm974_vm4, %v734_v53, %v973_v27  ;;  %v1058_v32 = vunpack.c.l.b16 %v1042_v24 }
 0x172   :  { %v937_v4 = vadd.f32 %v936_v23, %v935_v43  ;;  %v887_v12 = vadd.f32 %v886_v8, %v885_v20  ;;  %v1045_v38 = vpack.c.bf16 %v954_v19, %v954_v19  ;;  %v863_v1 = vadd.f32 %v862_v62, %v861_v44 }
 0x173   :  { %v746_v45 = vrot.slane %v745_v49, 1  ;;  %v875_v22 = vrot.slane %v874_v47, 1  ;;  %v1064_v18 = vrot.slane %v1056_v33, 6  ;;  %v1066_v41 = vrot.slane %v1057_v21, 5 }
 0x174   :  { %v912_v2 = vrot.slane %v911_v51, 2  ;;  %v1063_v53 = vsel %vm968_vm1, %v1062_v5, %v1054_v35  ;;  %v900_v43 = vadd.f32 %v899_v59, %v898_v29  ;;  %v1068_v20 = vrot.slane %v1058_v32, 4 }
 0x175   :  { %v747_v60 = vadd.f32 %v746_v45, %v745_v49  ;;  %v888_v44 = vrot.slane %v887_v12, 1  ;;  %v938_v62 = vrot.slane %v937_v4, 2  ;;  %v1061_v24 = vunpack.c.l.b16 %v1045_v38 }
 0x176   :  { %v876_v48 = vadd.f32 %v875_v22, %v874_v47  ;;  %v913_v19 = vadd.f32 %v912_v2, %v911_v51  ;;  %v926_v51 = vadd.f32 %v925_v34, %v3098_v9 }
 0x177   :  { %v952_v17 = vadd.f32 %v2888_v25, %v747_v60  ;;  %v977_v58 = vsel %vm976_vm5, %v747_v60, %v975_v28  ;;  %v3819_v25 = vrot.slane %v2870_v6, %v2864_v39  ;;  %v901_v6 = vrot.slane %v900_v43, 1 }
 0x178   :  { %v979_v11 = vsel %vm978_vm6, %v3015_v40, %v977_v58  ;;  %v1065_v40 = vsel %vm970_vm2, %v1064_v18, %v1063_v53  ;;  %v889_v27 = vadd.f32 %v888_v44, %v887_v12  ;;  %v1074_v21 = vrot.slane %v1061_v24, 1 }
 0x179   :  { %v981_v13 = vsel %vm980_vm7, %v773_v0, %v979_v11  ;;  %v1043_v49 = vpack.c.bf16 %v952_v17, %v952_v17  ;;  %v1067_v35 = vsel %vm972_vm3, %v1066_v41, %v1065_v40  ;;  %v914_v38 = vrot.slane %v913_v19, 1 }
 0x17a   :  { %v3127_v42 = vmul.f32 %v981_v13, %v3819_v25  ;;  %v1069_v5 = vsel %vm974_vm4, %v1068_v20, %v1067_v35  ;;  %v939_v18 = vadd.f32 %v938_v62, %v937_v4  ;;  %v927_v34 = vrot.slane %v926_v51, 1  ;;  %v3820_v13 = vld [vmem:[#allocation12_spill] sm:$0xff] }
 0x17b   :  { %v1059_v23 = vunpack.c.l.b16 %v1043_v49  ;;  %v915_v2 = vadd.f32 %v914_v38, %v913_v19  ;;  %v3821_v49 = vmov 0.0  }
 0x17c   :  { %v985_v8 = vrot.slane %v3127_v42, 1  ;;  %v986_v0 = vrot.slane %v3127_v42, 2  ;;  %v987_v45 = vrot.slane %v3127_v42, 3  ;;  %v1000_v60 = vadd.f32 %v3127_v42, %v2966_v61 }
 0x17d   :  { %v1070_v29 = vrot.slane %v1059_v23, 3  ;;  %v988_v28 = vrot.slane %v3127_v42, 4  ;;  %v989_v61 = vrot.slane %v3127_v42, 5  ;;  %v990_v4 = vrot.slane %v3127_v42, 6 }
 0x17e   :  { %v1001_v55 = vadd.f32 %v985_v8, %v863_v1  ;;  %v1002_v33 = vadd.f32 %v986_v0, %v876_v48  ;;  %v1003_v12 = vadd.f32 %v987_v45, %v889_v27  ;;  %v902_v1 = vadd.f32 %v901_v6, %v900_v43  ;;  %v3822_v48 = vld [vmem:[#allocation13_spill] sm:$0xff] }
 0x17f   :  { %v1071_v47 = vsel %vm976_vm5, %v1070_v29, %v1069_v5  ;;  %v1014_v11 = vadd.f32 %v2902_v36, %v1000_v60  ;;  %v940_v20 = vrot.slane %v939_v18, 1  ;;  %v1005_v25 = vadd.f32 %v989_v61, %v915_v2  ;;  %v3827_v2 = vld [vmem:[#allocation18_spill] sm:$0xff] }
 0x180   :  { %v1073_v59 = vsel %vm978_vm6, %v1072_v57, %v1071_v47  ;;  %v1015_v32 = vadd.f32 %v2902_v36, %v1001_v55  ;;  %v1016_v58 = vadd.f32 %v2902_v36, %v1002_v33  ;;  %v1004_v57 = vadd.f32 %v988_v28, %v902_v1  ;;  %v3823_v55 = vld [vmem:[#allocation14_spill] sm:$0xff]  ;;  %v3825_v1 = vld [vmem:[#allocation16_spill] sm:$0xff] }
 0x181   :  { %v1075_v17 = vsel %vm980_vm7, %v1074_v21, %v1073_v59  ;;  %v1017_v53 = vadd.f32 %v2902_v36, %v1003_v12  ;;  %v1167_v44 = vpack.c.bf16 %v1014_v11, %v1014_v11  ;;  %v928_v62 = vadd.f32 %v927_v34, %v926_v51  ;;  %v3824_v59 = vld [vmem:[#allocation15_spill] sm:$0xff] }
 0x182   :  { %v1076_v22 = vpack.c.b16 %v1075_v17, %v1075_v17  ;;  %v1168_v9 = vpack.c.bf16 %v1015_v32, %v1015_v32  ;;  %v1169_v41 = vpack.c.bf16 %v1016_v58, %v1016_v58  ;;  %v1018_v24 = vadd.f32 %v2902_v36, %v1004_v57 }
 0x183   :  { %v991_v40 = vrot.slane %v3127_v42, 7  ;;  %v1170_v8 = vpack.c.bf16 %v1017_v53, %v1017_v53  ;;  %v1006_v19 = vadd.f32 %v990_v4, %v928_v62  ;;  %v941_v35 = vadd.f32 %v940_v20, %v939_v18 }
 0x184   :  { %2437 = vmatmul.mubr.bf16.vlgmr.msra.gmra.mxu1 %v1076_v22  ;;  %v1184_v43 = vunpack.c.l.b16 %v1168_v9  ;;  %v1185_v23 = vunpack.c.l.b16 %v1169_v41  ;;  %v1019_v29 = vadd.f32 %v2902_v36, %v1005_v25  ;;  %v1183_v45 = vunpack.c.l.b16 %v1167_v44  ;;  %v3826_v9 = vld [vmem:[#allocation17_spill] sm:$0xff] }
 0x185   :  { %2441 = vmatpush3.bf16.msra.mxu1 %v3820_v13  ;;  %2456 = vmatprep.mubr.msk.bf16.mxu1 %vm2627_vm0, %v3821_v49  ;;  %v1171_v6 = vpack.c.bf16 %v1018_v24, %v1018_v24  ;;  %v1007_v33 = vadd.f32 %v991_v40, %v941_v35  ;;  %v1186_v27 = vunpack.c.l.b16 %v1170_v8  ;;  %v1020_v42 = vadd.f32 %v2902_v36, %v1006_v19 }
 0x186   :  { %2442 = vmatprep.subr.bf16.mxu1 %v3821_v49  ;;  %v1191_v0 = vrot.slane %v1184_v43, 7  ;;  %v1193_v5 = vrot.slane %v1185_v23, 6  ;;  %v1172_v21 = vpack.c.bf16 %v1019_v29, %v1019_v29  ;;  %v3828_v43 = vld [vmem:[#allocation19_spill] sm:$0xff] }
 0x187   :  { %v1187_v60 = vunpack.c.l.b16 %v1171_v6  ;;  %v1021_v28 = vadd.f32 %v2902_v36, %v1007_v33  ;;  %v1195_v32 = vrot.slane %v1186_v27, 5  ;;  %v1173_v38 = vpack.c.bf16 %v1020_v42, %v1020_v42  ;;  %v3830_v27 = vld [vmem:[#allocation54_spill] sm:$0xff] }
 0x188   :  { %v1192_v47 = vsel %vm968_vm1, %v1191_v0, %v1183_v45  ;;  %v1188_v17 = vunpack.c.l.b16 %v1172_v21  ;;  %v2628_v45 = vmov 1966171168  }
 0x189   :  { %2443 = vmatpush3.bf16.msra.mxu1 %v3822_v48  ;;  %v1194_v51 = vsel %vm970_vm2, %v1193_v5, %v1192_v47  ;;  %v1197_v58 = vrot.slane %v1187_v60, 4  ;;  %v1174_v22 = vpack.c.bf16 %v1021_v28, %v1021_v28  ;;  %v1189_v18 = vunpack.c.l.b16 %v1173_v38  ;;  %v3829_v5 = vld [vmem:[#allocation55_spill] sm:$0xff] }
 0x18a   :  { %2444 = vmatprep.subr.bf16.mxu1 %v3821_v49  ;;  %v1196_v12 = vsel %vm972_vm3, %v1195_v32, %v1194_v51  ;;  %v1199_v11 = vrot.slane %v1188_v17, 3  ;;  %v1272_v6 = vunpack.c.l.s4 %v2628_v45  ;;  %v1261_v47 = vrot.slane %v3830_v27, %v2864_v39  ;;  %v3835_v45 = vld [vmem:[#allocation25_spill] sm:$0xff] }
 0x18b   :  { %v1198_v61 = vsel %vm974_vm4, %v1197_v58, %v1196_v12  ;;  %v1190_v36 = vunpack.c.l.b16 %v1174_v22  ;;  %v1201_v57 = vrot.slane %v1189_v18, 2  ;;  %v1266_v21 = vsub.s32 2, %v3829_v5 }
 0x18c   :  { %v1200_v34 = vsel %vm976_vm5, %v1199_v11, %v1198_v61  ;;  %v1273_v33 = vunpack.c.0.s8 %v1272_v6 }
 0x18d   :  { %2445 = vmatpush3.bf16.msra.mxu1 %v3823_v55  ;;  %v1202_v41 = vsel %vm978_vm6, %v1201_v57, %v1200_v34  ;;  %v1203_v13 = vrot.slane %v1190_v36, 1  ;;  %v1255_v55 = vsub.s32 1, %v3829_v5  ;;  %v1267_v32 = vrot.slane %v3830_v27, %v1266_v21  ;;  %v3839_v21 = vld [vmem:[#allocation31_spill] sm:$0xff] }
 0x18e   :  { %2446 = vmatprep.subr.bf16.mxu1 %v3821_v49  ;;  %v3185_v60 = vsub.s32 %v1273_v33, %v3829_v5  ;;  %v3836_v5 = vld [vmem:[#allocation28_spill] sm:$0xff] }
 0x18f   :  { %v1204_v53 = vsel %vm980_vm7, %v1203_v13, %v1202_v41  ;;  %v1256_v42 = vrot.slane %v3830_v27, %v1255_v55  ;;  %v3837_v33 = vld [vmem:[#allocation24_spill] sm:$0xff] }
 0x190   :  { %v1205_v4 = vpack.c.b16 %v1204_v53, %v1204_v53 }
 0x191   :  { %2447 = vmatpush3.bf16.msra.mxu1 %v3824_v59 }
 0x192   :  { %2448 = vmatprep.subr.bf16.mxu1 %v3821_v49 }
 0x195   :  { %2449 = vmatpush3.bf16.msra.mxu1 %v3825_v1 }
 0x196   :  { %2450 = vmatprep.subr.bf16.mxu1 %v3821_v49 }
 0x199   :  { %2451 = vmatpush3.bf16.msra.mxu1 %v3826_v9 }
 0x19a   :  { %2452 = vmatprep.subr.bf16.mxu1 %v3821_v49 }
 0x19d   :  { %2453 = vmatpush3.bf16.msra.mxu1 %v3827_v2 }
 0x19e   :  { %2454 = vmatprep.subr.bf16.mxu1 %v3821_v49 }
 0x1a1   :  { %2455 = vmatpush3.bf16.msra.mxu1 %v3828_v43 }
 0x1a4   :  { %2457 = vmatmul.mubr.bf16.vlgmr.msra.gmra.mxu1 %v1205_v4 }
 0x244   :  { %v1160_v20 = vpop.f32.mrf.mxu1 }
 0x245   :  { %v1166_v24 = vmul.f32 0.00390625, %v1160_v20 }
 0x246   :  { %v2438_v25 = vpop.f32.mrf.mxu1 }
 0x247   :  { %v1248_v48 = vmul.f32 %v1166_v24, %v1166_v24  ;;  %v1262_v59 = vsub.f32 %v1261_v47, %v1166_v24  ;;  %v3838_v47 = vld [vmem:[#allocation27_spill] sm:$0xff] }
 0x248   :  { %v1163_v44 = vpop.f32.mrf.mxu1 }
 0x24a   :  { %v2439_v62 = vpop.f32.mrf.mxu1 }
 0x24b   :  { %v3831_v62 = vld [vmem:[#allocation21_spill] sm:$0xff] }
 0x264   :  { %v1241_v23 = vpop.f32.mrf.mxu1 }
 0x265   :  { %v1247_v40 = vmul.f32 0.00390625, %v1241_v23  ;;  %v3832_v23 = vld [vmem:[#allocation23_spill] sm:$0xff] }
 0x266   :  { %v2458_v8 = vpop.f32.mrf.mxu1 }
 0x267   :  { %v1249_v0 = vsub.f32 %v1247_v40, %v1248_v48 }
 0x268   :  { %v1244_v19 = vpop.f32.mrf.mxu1 }
 0x269   :  { %v1250_v35 = vmax.f32 %v1249_v0, 0.0  ;;  %v3833_v0 = vld [vmem:[#allocation20_spill] sm:$0xff] }
 0x26a   :  { %v2459_v29 = vpop.f32.mrf.mxu1 }
 0x26b   :  { %v1251_v49 = vadd.f32 1e-05, %v1250_v35  ;;  %v3834_v35 = vld [vmem:[#allocation22_spill] sm:$0xff] }
 0x26d   :  { %2533 = vrsqrt.f32 %v1251_v49 }
 0x27a   :  { %v2534_v51 = vpop.eup %2533 }
 0x27b   :  { %v1257_v28 = vmul.f32 %v2534_v51, %v1256_v42 }
 0x27d   :  { %v1263_v38 = vmul.f32 %v1262_v59, %v1257_v28  ;;  %v1270_v17 = vcombine.high %v1257_v28, %v1257_v28  ;;  %v1277_v12 = vrot.slane %v1257_v28, %v3185_v60  ;;  %v3840_v59 = vld [vmem:[#allocation34_spill] sm:$0xff] }
 0x27f   :  { %v1284_v58 = vrot.slane %v1270_v17, %v3185_v60  ;;  %v1285_v1 = vcombine.high %v1277_v12, %v1277_v12  ;;  %v1293_v22 = vrot.slane %v1277_v12, %v3185_v60  ;;  %v3191_v18 = vadd.f32 %v1267_v32, %v1263_v38  ;;  %v3841_v32 = vld [vmem:[#allocation30_spill] sm:$0xff]  ;;  %v3842_v17 = vld [vmem:[#allocation33_spill] sm:$0xff] }
 0x281   :  { %v1286_v61 = vcombine.high %v1284_v58, %v1284_v58  ;;  %v1300_v11 = vrot.slane %v1284_v58, %v3185_v60  ;;  %v1307_v9 = vrot.slane %v1285_v1, %v3185_v60  ;;  %v1315_v36 = vcombine.high %v1293_v22, %v1293_v22  ;;  %v3843_v58 = vld [vmem:[#allocation37_spill] sm:$0xff] }
 0x282   :  { %v1322_v34 = vrot.slane %v1293_v22, %v2864_v39  ;;  %v3203_v20 = vrot.slane %v3191_v18, %v3185_v60  ;;  %v3844_v22 = vld [vmem:[#allocation40_spill] sm:$0xff] }
 0x283   :  { %v1314_v57 = vrot.slane %v1286_v61, %v3185_v60  ;;  %v1316_v41 = vcombine.high %v1300_v11, %v1300_v11  ;;  %v1317_v2 = vcombine.high %v1307_v9, %v1307_v9  ;;  %v1326_v43 = vrot.slane %v1307_v9, %v2864_v39 }
 0x284   :  { %v1330_v4 = vrot.slane %v1315_v36, %v2864_v39  ;;  %v1338_v44 = vrot.slane %v1300_v11, %v2864_v39  ;;  %v3208_v24 = vmul.f32 %v1322_v34, %v3831_v62  ;;  %v3211_v48 = vmul.f32 %v1322_v34, %v3832_v23  ;;  %v3845_v11 = vld [vmem:[#allocation36_spill] sm:$0xff]  ;;  %v3846_v36 = vld [vmem:[#allocation39_spill] sm:$0xff]  ;;  %v3849_v62 = vld [vmem:[#allocation42_spill] sm:$0xff] }
 0x285   :  { %v1318_v53 = vcombine.high %v1314_v57, %v1314_v57  ;;  %v1334_v25 = vrot.slane %v1317_v2, %v2864_v39  ;;  %v1342_v40 = vrot.slane %v1314_v57, %v2864_v39  ;;  %v1346_v8 = vrot.slane %v1316_v41, %v2864_v39  ;;  %v3847_v57 = vld [vmem:[#allocation43_spill] sm:$0xff]  ;;  %v3848_v2 = vld [vmem:[#allocation46_spill] sm:$0xff] }
 0x286   :  { %v3216_v19 = vmul.f32 %v3833_v0, %v1322_v34  ;;  %v3219_v29 = vmul.f32 %v3834_v35, %v1322_v34  ;;  %v3225_v6 = vmul.f32 %v1322_v34, %v3835_v45  ;;  %v3228_v55 = vmul.f32 %v1322_v34, %v3836_v5  ;;  %v3850_v0 = vld [vmem:[#allocation45_spill] sm:$0xff] }
 0x287   :  { %v3222_v49 = vrot.slane %v1318_v53, %v2864_v39  ;;  %v3231_v27 = vmul.f32 %v3837_v33, %v1322_v34  ;;  %v3234_v42 = vmul.f32 %v3838_v47, %v1322_v34  ;;  %v3237_v51 = vmul.f32 %v1326_v43, %v3839_v21  ;;  %v3851_v33 = vld [vmem:[#allocation49_spill] sm:$0xff]  ;;  %v3852_v21 = vld [vmem:[#allocation52_spill] sm:$0xff] }
 0x288   :  { %v3240_v28 = vmul.f32 %v1326_v43, %v3840_v59  ;;  %v3243_v38 = vmul.f32 %v3841_v32, %v1326_v43  ;;  %v3246_v12 = vmul.f32 %v3842_v17, %v1326_v43  ;;  %v3249_v1 = vmul.f32 %v1326_v43, %v3843_v58  ;;  %v3853_v32 = vld [vmem:[#allocation57_spill] sm:$0xff]  ;;  %v3854_v58 = vld [vmem:[#allocation51_spill] sm:$0xff] }
 0x289   :  { %v3252_v61 = vmul.f32 %v1326_v43, %v3844_v22  ;;  %v3255_v9 = vmul.f32 %v3845_v11, %v1326_v43  ;;  %v3258_v34 = vmul.f32 %v3846_v36, %v1326_v43  ;;  %v3261_v41 = vmul.f32 %v1330_v4, %v3847_v57 }
 0x28a   :  { %v3264_v53 = vmul.f32 %v1330_v4, %v3848_v2  ;;  %v3267_v23 = vmul.f32 %v3849_v62, %v1330_v4  ;;  %v3270_v35 = vmul.f32 %v3850_v0, %v1330_v4  ;;  %v3273_v45 = vmul.f32 %v1330_v4, %v2807_v10  ;;  %v3855_v10 = vld [vmem:[#allocation56_spill] sm:$0xff] }
 0x28b   :  { %v3276_v5 = vmul.f32 %v1330_v4, %v2822_v30  ;;  %v3279_v43 = vmul.f32 %v2803_v3, %v1330_v4  ;;  %v3282_v47 = vmul.f32 %v3851_v33, %v1330_v4  ;;  %v3285_v59 = vmul.f32 %v1334_v25, %v3852_v21  ;;  %v3856_v30 = vld [vmem:[#allocation59_spill] sm:$0xff]  ;;  %v3857_v3 = vld [vmem:[#allocation61_spill] sm:$0xff]  ;;  %v3858_v62 = vld [vmem:[#allocation64_spill] sm:$0xff] }
 0x28c   :  { %v3288_v17 = vmul.f32 %v1334_v25, %v3853_v32  ;;  %v3291_v22 = vmul.f32 %v3854_v58, %v1334_v25  ;;  %v3294_v11 = vmul.f32 %v3855_v10, %v1334_v25  ;;  %v3297_v36 = vmul.f32 %v1334_v25, %v3856_v30  ;;  %v3859_v33 = vld [vmem:[#allocation66_spill] sm:$0xff]  ;;  %v3860_v32 = vld [vmem:[#allocation63_spill] sm:$0xff]  ;;  %v3862_v10 = vld [vmem:[#allocation65_spill] sm:$0xff] }
 0x28d   :  { %v3300_v57 = vmul.f32 %v1334_v25, %v3857_v3  ;;  %v3303_v4 = vmul.f32 %v2875_v16, %v1334_v25  ;;  %v3306_v2 = vmul.f32 %v2894_v14, %v1334_v25  ;;  %v3309_v0 = vmul.f32 %v1338_v44, %v3858_v62  ;;  %v3863_v3 = vld [vmem:[#allocation67_spill] sm:$0xff]  ;;  %v3864_v62 = vld [vmem:[#allocation68_spill] sm:$0xff] }
 0x28e   :  { %v3312_v21 = vmul.f32 %v1338_v44, %v3859_v33  ;;  %v3315_v58 = vmul.f32 %v3860_v32, %v1338_v44  ;;  %v3318_v30 = vmul.f32 %v3862_v10, %v1338_v44  ;;  %v3321_v13 = vmul.f32 %v1338_v44, %v3863_v3  ;;  %v3865_v32 = vld [vmem:[#allocation69_spill] sm:$0xff] }
 0x28f   :  { %v3324_v16 = vmul.f32 %v1338_v44, %v3011_v31  ;;  %v3327_v14 = vmul.f32 %v2986_v63, %v1338_v44  ;;  %v3330_v25 = vmul.f32 %v3005_v37, %v1338_v44  ;;  %v3333_v33 = vmul.f32 %v1342_v40, %v3864_v62  ;;  %v3871_v62 = vld [vmem:[#allocation29_spill] sm:$0xff] }
 0x290   :  { %3861 = vst [vmem:[#allocation12_spill] sm:$0xff] %v3315_v58  ;;  %v3336_v58 = vmul.f32 %v1342_v40, %v3865_v32  ;;  %v3339_v10 = vmul.f32 %v3022_v26, %v1342_v40  ;;  %v3342_v3 = vmul.f32 %v3044_v7, %v1342_v40  ;;  %v3345_v31 = vmul.f32 %v1342_v40, %v2714_v52  ;;  %v3873_v26 = vld [vmem:[#allocation35_spill] sm:$0xff]  ;;  %v3875_v7 = vld [vmem:[#allocation26_spill] sm:$0xff]  ;;  %v3876_v52 = vld [vmem:[#allocation32_spill] sm:$0xff] }
 0x291   :  { %v3348_v63 = vmul.f32 %v1342_v40, %v2722_v56  ;;  %v3351_v37 = vmul.f32 %v2710_v50, %v1342_v40  ;;  %v3354_v44 = vmul.f32 %v2718_v54, %v1342_v40  ;;  %v3357_v32 = vmul.f32 %v1346_v8, %v3871_v62  ;;  %v3877_v56 = vld [vmem:[#allocation41_spill] sm:$0xff]  ;;  %v3879_v50 = vld [vmem:[#allocation47_spill] sm:$0xff]  ;;  %v3881_v54 = vld [vmem:[#allocation38_spill] sm:$0xff] }
 0x292   :  { %3866 = vst [vmem:[#allocation13_spill] sm:$0xff] %v3339_v10  ;;  %3867 = vst [vmem:[#allocation14_spill] sm:$0xff] %v3342_v3  ;;  %v3360_v10 = vmul.f32 %v1346_v8, %v3873_v26  ;;  %v3363_v3 = vmul.f32 %v3875_v7, %v1346_v8  ;;  %v3375_v40 = vmul.f32 %v3881_v54, %v1346_v8  ;;  %v3883_v62 = vld [vmem:[#allocation44_spill] sm:$0xff]  ;;  %v3885_v26 = vld [vmem:[#allocation50_spill] sm:$0xff] }
 0x293   :  { %3868 = vst [vmem:[#allocation15_spill] sm:$0xff] %v3345_v31  ;;  %3869 = vst [vmem:[#allocation16_spill] sm:$0xff] %v3348_v63  ;;  %v3366_v31 = vmul.f32 %v3876_v52, %v1346_v8  ;;  %v3369_v63 = vmul.f32 %v1346_v8, %v3877_v56  ;;  %v3887_v7 = vld [vmem:[#allocation58_spill] sm:$0xff]  ;;  %v3889_v56 = vcombine.high %v3191_v18, %v3191_v18 }
 0x294   :  { %3870 = vst [vmem:[#allocation17_spill] sm:$0xff] %v3351_v37  ;;  %3872 = vst [vmem:[#allocation18_spill] sm:$0xff] %v3357_v32  ;;  %v3372_v37 = vmul.f32 %v1346_v8, %v3879_v50  ;;  %v3378_v32 = vmul.f32 %v3883_v62, %v1346_v8  ;;  %v3386_v52 = vmul.f32 %v3222_v49, %v3887_v7  ;;  %v3892_v8 = vld [vmem:[#allocation53_spill] sm:$0xff] }
 0x295   :  { %3874 = vst [vmem:[#allocation19_spill] sm:$0xff] %v3360_v10  ;;  %3878 = vst [vmem:[#allocation55_spill] sm:$0xff] %v3369_v63  ;;  %v3382_v10 = vmul.f32 %v3222_v49, %v3885_v26  ;;  %v1438_v50 = vrot.slane %v3889_v56, %v3185_v60  ;;  %v3398_v62 = vmul.f32 %v3892_v8, %v3222_v49  ;;  %v3897_v8 = vld [vmem:[#allocation60_spill] sm:$0xff] }
 0x296   :  { %3880 = vst [vmem:[#allocation54_spill] sm:$0xff] %v3372_v37  ;;  %3882 = vst [vmem:[#allocation21_spill] sm:$0xff] %v3375_v40  ;;  %v3890_v37 = vld [vmem:[#allocation48_spill] sm:$0xff]  ;;  %v1439_v26 = vcombine.high %v3203_v20, %v3203_v20  ;;  %v1447_v7 = vrot.slane %v3203_v20, %v3185_v60  ;;  %v3410_v18 = vmul.f32 %v3222_v49, %v2971_v15 }
 0x297   :  { %3884 = vst [vmem:[#allocation23_spill] sm:$0xff] %v3378_v32  ;;  %3886 = vst [vmem:[#allocation20_spill] sm:$0xff] %v3382_v10  ;;  %v3394_v54 = vmul.f32 %v3890_v37, %v3222_v49  ;;  %v1440_v37 = vcombine.high %v1438_v50, %v1438_v50  ;;  %v1454_v56 = vrot.slane %v1438_v50, %v3185_v60 }
 0x298   :  { %3888 = vst [vmem:[#allocation22_spill] sm:$0xff] %v3386_v52  ;;  %3893 = vst [vmem:[#allocation28_spill] sm:$0xff] %v3398_v62  ;;  %v3894_v52 = vld [vmem:[#allocation62_spill] sm:$0xff]  ;;  %v3415_v62 = vmul.f32 %v3897_v8, %v3222_v49  ;;  %v1469_v32 = vcombine.high %v1447_v7, %v1447_v7  ;;  %v1476_v20 = vrot.slane %v1447_v7, %v2864_v39 }
 0x299   :  { %3891 = vst [vmem:[#allocation25_spill] sm:$0xff] %v3394_v54  ;;  %v3406_v10 = vmul.f32 %v3222_v49, %v3894_v52  ;;  %3896 = vst [vmem:[#allocation27_spill] sm:$0xff] %v3410_v18  ;;  %v1461_v54 = vrot.slane %v1439_v26, %v3185_v60  ;;  %v3421_v52 = vmul.f32 %v2943_v46, %v3222_v49 }
 0x29a   :  { %3898 = vst [vmem:[#allocation31_spill] sm:$0xff] %v3415_v62  ;;  %v1470_v15 = vcombine.high %v1454_v56, %v1454_v56  ;;  %v1492_v18 = vrot.slane %v1454_v56, %v2864_v39  ;;  %v1484_v8 = vrot.slane %v1469_v32, %v2864_v39  ;;  %v3428_v62 = vadd.f32 %v1476_v20, %v3208_v24 }
 0x29b   :  { %3895 = vst [vmem:[#allocation24_spill] sm:$0xff] %v3406_v10  ;;  %v1468_v10 = vrot.slane %v1440_v37, %v3185_v60  ;;  %v1471_v40 = vcombine.high %v1461_v54, %v1461_v54  ;;  %v1480_v50 = vrot.slane %v1461_v54, %v2864_v39  ;;  %v3433_v46 = vadd.f32 %v1476_v20, %v3211_v48 }
 0x29c   :  { %v1500_v63 = vrot.slane %v1470_v15, %v2864_v39  ;;  %v3437_v49 = vadd.f32 %v1476_v20, %v3216_v19  ;;  %v3440_v54 = vadd.f32 %v1476_v20, %v3219_v29  ;;  %v3443_v32 = vadd.f32 %v1476_v20, %v3225_v6 }
 0x29d   :  { %v1472_v26 = vcombine.high %v1468_v10, %v1468_v10  ;;  %v1496_v7 = vrot.slane %v1468_v10, %v2864_v39  ;;  %v1488_v60 = vrot.slane %v1471_v40, %v2864_v39  ;;  %v3447_v10 = vadd.f32 %v1476_v20, %v3228_v55 }
 0x29e   :  { %v3450_v37 = vadd.f32 %v1476_v20, %v3231_v27  ;;  %v3453_v48 = vadd.f32 %v1476_v20, %v3234_v42  ;;  %v3456_v19 = vadd.f32 %v1480_v50, %v3237_v51  ;;  %v3459_v29 = vadd.f32 %v1480_v50, %v3240_v28 }
 0x29f   :  { %v1504_v24 = vrot.slane %v1472_v26, %v2864_v39  ;;  %v3462_v6 = vadd.f32 %v1480_v50, %v3243_v38  ;;  %v3465_v39 = vadd.f32 %v1480_v50, %v3246_v12  ;;  %v3468_v55 = vadd.f32 %v1480_v50, %v3249_v1 }
 0x2a0   :  { %v3471_v27 = vadd.f32 %v1480_v50, %v3252_v61  ;;  %v3474_v42 = vadd.f32 %v1480_v50, %v3255_v9  ;;  %v3477_v51 = vadd.f32 %v1480_v50, %v3258_v34  ;;  %v3480_v28 = vadd.f32 %v1484_v8, %v3261_v41 }
 0x2a1   :  { %v3483_v38 = vadd.f32 %v1484_v8, %v3264_v53  ;;  %v3486_v12 = vadd.f32 %v1484_v8, %v3267_v23  ;;  %v3489_v1 = vadd.f32 %v1484_v8, %v3270_v35  ;;  %v3492_v61 = vadd.f32 %v1484_v8, %v3273_v45 }
 0x2a2   :  { %v3495_v9 = vadd.f32 %v1484_v8, %v3276_v5  ;;  %v3498_v34 = vadd.f32 %v1484_v8, %v3279_v43  ;;  %v3501_v41 = vadd.f32 %v1484_v8, %v3282_v47  ;;  %v3504_v53 = vadd.f32 %v1488_v60, %v3285_v59 }
 0x2a3   :  { %v3507_v23 = vadd.f32 %v1488_v60, %v3288_v17  ;;  %v3510_v35 = vadd.f32 %v1488_v60, %v3291_v22  ;;  %v3513_v45 = vadd.f32 %v1488_v60, %v3294_v11  ;;  %v3516_v5 = vadd.f32 %v1488_v60, %v3297_v36  ;;  %v3899_v11 = vld [vmem:[#allocation12_spill] sm:$0xff] }
 0x2a4   :  { %v3519_v43 = vadd.f32 %v1488_v60, %v3300_v57  ;;  %v3522_v47 = vadd.f32 %v1488_v60, %v3303_v4  ;;  %v3525_v59 = vadd.f32 %v1488_v60, %v3306_v2  ;;  %v3528_v17 = vadd.f32 %v1492_v18, %v3309_v0  ;;  %v3908_v60 = vld [vmem:[#allocation19_spill] sm:$0xff] }
 0x2a5   :  { %v3531_v22 = vadd.f32 %v1492_v18, %v3312_v21  ;;  %v3534_v40 = vadd.f32 %v1492_v18, %v3899_v11  ;;  %v3537_v36 = vadd.f32 %v1492_v18, %v3318_v30  ;;  %v3540_v57 = vadd.f32 %v1492_v18, %v3321_v13  ;;  %v3900_v30 = vld [vmem:[#allocation13_spill] sm:$0xff]  ;;  %v3901_v13 = vld [vmem:[#allocation14_spill] sm:$0xff] }
 0x2a6   :  { %v3543_v4 = vadd.f32 %v1492_v18, %v3324_v16  ;;  %v3546_v2 = vadd.f32 %v1492_v18, %v3327_v14  ;;  %v3549_v0 = vadd.f32 %v1492_v18, %v3330_v25  ;;  %v3552_v21 = vadd.f32 %v1496_v7, %v3333_v33  ;;  %v3902_v16 = vld [vmem:[#allocation15_spill] sm:$0xff]  ;;  %v3903_v14 = vld [vmem:[#allocation16_spill] sm:$0xff]  ;;  %v3904_v25 = vld [vmem:[#allocation17_spill] sm:$0xff] }
 0x2a7   :  { %v3555_v56 = vadd.f32 %v1496_v7, %v3336_v58  ;;  %v3558_v20 = vadd.f32 %v1496_v7, %v3900_v30  ;;  %v3561_v15 = vadd.f32 %v1496_v7, %v3901_v13  ;;  %v3564_v50 = vadd.f32 %v1496_v7, %v3902_v16  ;;  %v3906_v58 = vld [vmem:[#allocation18_spill] sm:$0xff]  ;;  %v3912_v16 = vld [vmem:[#allocation55_spill] sm:$0xff] }
 0x2a8   :  { %v3567_v8 = vadd.f32 %v1496_v7, %v3903_v14  ;;  %v3570_v18 = vadd.f32 %v1496_v7, %v3904_v25  ;;  %v3573_v33 = vadd.f32 %v1496_v7, %v3354_v44  ;;  %v3576_v26 = vadd.f32 %v1500_v63, %v3906_v58  ;;  %v3914_v25 = vld [vmem:[#allocation54_spill] sm:$0xff]  ;;  %v3916_v44 = vld [vmem:[#allocation21_spill] sm:$0xff]  ;;  %v3918_v58 = vld [vmem:[#allocation23_spill] sm:$0xff] }
 0x2a9   :  { %v3579_v11 = vadd.f32 %v1500_v63, %v3908_v60  ;;  %v3582_v30 = vadd.f32 %v1500_v63, %v3363_v3  ;;  %v3585_v13 = vadd.f32 %v1500_v63, %v3366_v31  ;;  %v3588_v14 = vadd.f32 %v1500_v63, %v3912_v16  ;;  %v3919_v60 = vld [vmem:[#allocation20_spill] sm:$0xff]  ;;  %v3920_v3 = vld [vmem:[#allocation22_spill] sm:$0xff]  ;;  %v3921_v31 = vld [vmem:[#allocation25_spill] sm:$0xff] }
 0x2aa   :  { %3905 = vst [vmem:[#allocation34_spill] sm:$0xff] %v3570_v18  ;;  %3907 = vst [vmem:[#allocation30_spill] sm:$0xff] %v3576_v26  ;;  %v3591_v18 = vadd.f32 %v1500_v63, %v3914_v25  ;;  %v3594_v7 = vadd.f32 %v1500_v63, %v3916_v44  ;;  %v3597_v26 = vadd.f32 %v1500_v63, %v3918_v58  ;;  %v3922_v16 = vld [vmem:[#allocation28_spill] sm:$0xff]  ;;  %v3924_v44 = vld [vmem:[#allocation27_spill] sm:$0xff] }
 0x2ab   :  { %3909 = vst [vmem:[#allocation33_spill] sm:$0xff] %v3579_v11  ;;  %3910 = vst [vmem:[#allocation37_spill] sm:$0xff] %v3582_v30  ;;  %v3600_v11 = vadd.f32 %v1504_v24, %v3919_v60  ;;  %v3603_v30 = vadd.f32 %v1504_v24, %v3920_v3  ;;  %v3923_v25 = vld [vmem:[#allocation24_spill] sm:$0xff]  ;;  %v3925_v63 = vld [vmem:[#allocation31_spill] sm:$0xff]  ;;  %v3621_v60 = vadd.f32 %v1504_v24, %v3421_v52 }
 0x2ac   :  { %3911 = vst [vmem:[#allocation40_spill] sm:$0xff] %v3585_v13  ;;  %3913 = vst [vmem:[#allocation36_spill] sm:$0xff] %v3588_v14  ;;  %v3606_v13 = vadd.f32 %v1504_v24, %v3921_v31  ;;  %v3609_v14 = vadd.f32 %v1504_v24, %v3922_v16  ;;  %v3618_v58 = vadd.f32 %v1504_v24, %v3925_v63 }
 0x2ad   :  { %3915 = vst [vmem:[#allocation39_spill] sm:$0xff] %v3591_v18  ;;  %3917 = vst [vmem:[#allocation43_spill] sm:$0xff] %v3594_v7  ;;  %v3612_v18 = vadd.f32 %v1504_v24, %v3923_v25  ;;  %v3615_v7 = vadd.f32 %v1504_v24, %v3924_v44  ;;  %v2094_v3 = vpack.c.bf16 %v3433_v46, %v3428_v62 }
 0x2ae   :  { %v2099_v31 = vpack.c.bf16 %v3440_v54, %v3437_v49  ;;  %v2104_v16 = vpack.c.bf16 %v3447_v10, %v3443_v32  ;;  %v2109_v25 = vpack.c.bf16 %v3453_v48, %v3450_v37  ;;  %v2114_v44 = vpack.c.bf16 %v3459_v29, %v3456_v19 }
 0x2af   :  { %v2119_v63 = vpack.c.bf16 %v3465_v39, %v3462_v6  ;;  %v2124_v52 = vpack.c.bf16 %v3471_v27, %v3468_v55  ;;  %v2129_v62 = vpack.c.bf16 %v3477_v51, %v3474_v42  ;;  %2095 = vst [vmem:[#allocation8] sm:$0xff] %v2094_v3   ;;  %v2134_v46 = vpack.c.bf16 %v3483_v38, %v3480_v28 }
 0x2b0   :  { %2251 = vst [vmem:[#allocation8 + $0x8] sm:$0xff] %v2099_v31   ;;  %2252 = vst [vmem:[#allocation8 + $0x10] sm:$0xff] %v2104_v16   ;;  %v2139_v49 = vpack.c.bf16 %v3489_v1, %v3486_v12  ;;  %v2144_v54 = vpack.c.bf16 %v3495_v9, %v3492_v61  ;;  %v2149_v32 = vpack.c.bf16 %v3501_v41, %v3498_v34 }
 0x2b1   :  { %2253 = vst [vmem:[#allocation8 + $0x18] sm:$0xff] %v2109_v25   ;;  %2254 = vst [vmem:[#allocation8 + $0x20] sm:$0xff] %v2114_v44   ;;  %v2154_v24 = vpack.c.bf16 %v3507_v23, %v3504_v53  ;;  %v2159_v10 = vpack.c.bf16 %v3513_v45, %v3510_v35  ;;  %v2164_v37 = vpack.c.bf16 %v3519_v43, %v3516_v5  ;;  %v3926_v51 = vld [vmem:[#allocation34_spill] sm:$0xff] }
 0x2b2   :  { %2255 = vst [vmem:[#allocation8 + $0x28] sm:$0xff] %v2119_v63   ;;  %2256 = vst [vmem:[#allocation8 + $0x30] sm:$0xff] %v2124_v52   ;;  %v2169_v48 = vpack.c.bf16 %v3525_v59, %v3522_v47  ;;  %v2174_v19 = vpack.c.bf16 %v3531_v22, %v3528_v17  ;;  %v2179_v29 = vpack.c.bf16 %v3537_v36, %v3534_v40  ;;  %v3927_v38 = vld [vmem:[#allocation30_spill] sm:$0xff]  ;;  %v3928_v12 = vld [vmem:[#allocation33_spill] sm:$0xff] }
 0x2b3   :  { %2257 = vst [vmem:[#allocation8 + $0x38] sm:$0xff] %v2129_v62   ;;  %2258 = vst [vmem:[#allocation8 + $0x40] sm:$0xff] %v2134_v46   ;;  %v2184_v6 = vpack.c.bf16 %v3543_v4, %v3540_v57  ;;  %v2189_v39 = vpack.c.bf16 %v3549_v0, %v3546_v2  ;;  %v2194_v55 = vpack.c.bf16 %v3555_v56, %v3552_v21  ;;  %v3929_v61 = vld [vmem:[#allocation37_spill] sm:$0xff]  ;;  %v3930_v9 = vld [vmem:[#allocation40_spill] sm:$0xff] }
 0x2b4   :  { %2259 = vst [vmem:[#allocation8 + $0x48] sm:$0xff] %v2139_v49   ;;  %2260 = vst [vmem:[#allocation8 + $0x50] sm:$0xff] %v2144_v54   ;;  %v2199_v27 = vpack.c.bf16 %v3561_v15, %v3558_v20  ;;  %v2204_v42 = vpack.c.bf16 %v3567_v8, %v3564_v50  ;;  %v2209_v28 = vpack.c.bf16 %v3573_v33, %v3926_v51  ;;  %v3931_v41 = vld [vmem:[#allocation36_spill] sm:$0xff]  ;;  %v3932_v53 = vld [vmem:[#allocation39_spill] sm:$0xff] }
 0x2b5   :  { %2261 = vst [vmem:[#allocation8 + $0x58] sm:$0xff] %v2149_v32   ;;  %2262 = vst [vmem:[#allocation8 + $0x60] sm:$0xff] %v2154_v24   ;;  %v2214_v1 = vpack.c.bf16 %v3928_v12, %v3927_v38  ;;  %v2219_v34 = vpack.c.bf16 %v3930_v9, %v3929_v61  ;;  %v2224_v23 = vpack.c.bf16 %v3932_v53, %v3931_v41  ;;  %v3933_v35 = vld [vmem:[#allocation43_spill] sm:$0xff] }
 0x2b6   :  { %2263 = vst [vmem:[#allocation8 + $0x68] sm:$0xff] %v2159_v10   ;;  %2264 = vst [vmem:[#allocation8 + $0x70] sm:$0xff] %v2164_v37   ;;  %v2229_v45 = vpack.c.bf16 %v3597_v26, %v3933_v35  ;;  %v2234_v5 = vpack.c.bf16 %v3603_v30, %v3600_v11  ;;  %v2239_v43 = vpack.c.bf16 %v3609_v14, %v3606_v13 }
 0x2b7   :  { %2265 = vst [vmem:[#allocation8 + $0x78] sm:$0xff] %v2169_v48   ;;  %2266 = vst [vmem:[#allocation8 + $0x80] sm:$0xff] %v2174_v19   ;;  %v2244_v47 = vpack.c.bf16 %v3615_v7, %v3612_v18  ;;  %v2249_v59 = vpack.c.bf16 %v3621_v60, %v3618_v58 }
 0x2b8   :  { %2267 = vst [vmem:[#allocation8 + $0x88] sm:$0xff] %v2179_v29   ;;  %2268 = vst [vmem:[#allocation8 + $0x90] sm:$0xff] %v2184_v6  }
 0x2b9   :  { %2269 = vst [vmem:[#allocation8 + $0x98] sm:$0xff] %v2189_v39   ;;  %2270 = vst [vmem:[#allocation8 + $0xa0] sm:$0xff] %v2194_v55  }
 0x2ba   :  { %2271 = vst [vmem:[#allocation8 + $0xa8] sm:$0xff] %v2199_v27   ;;  %2272 = vst [vmem:[#allocation8 + $0xb0] sm:$0xff] %v2204_v42  }
 0x2bb   :  { %2273 = vst [vmem:[#allocation8 + $0xb8] sm:$0xff] %v2209_v28   ;;  %2274 = vst [vmem:[#allocation8 + $0xc0] sm:$0xff] %v2214_v1  }
 0x2bc   :  { %2275 = vst [vmem:[#allocation8 + $0xc8] sm:$0xff] %v2219_v34   ;;  %2276 = vst [vmem:[#allocation8 + $0xd0] sm:$0xff] %v2224_v23  }
 0x2bd   :  { %2277 = vst [vmem:[#allocation8 + $0xd8] sm:$0xff] %v2229_v45   ;;  %2278 = vst [vmem:[#allocation8 + $0xe0] sm:$0xff] %v2234_v5  }
 0x2be   :  { %2279 = vst [vmem:[#allocation8 + $0xe8] sm:$0xff] %v2239_v43   ;;  %2280 = vst [vmem:[#allocation8 + $0xf0] sm:$0xff] %v2244_v47  }
 0x2bf   :  { %2281 = vst [vmem:[#allocation8 + $0xf8] sm:$0xff] %v2249_v59  }
 0x2c0   :  { %2606 = shalt.err (!%p2603_p5)
}
 0x2c1   :  { %1908 = dma.vmem_to_hbm [thread:$0]  %s1903_s5, 4096, %s3697_s4, [#allocation4], %s2623_s20, %s2623_s20, %s2624_s21  }
 0x2c2   :  { %2619 = dma.done.wait [#allocation4], 4096  }
 0x2c3   :  { %2620 = vsyncadd [#allocation4], 4294963200 }
 0x2c4   :  { %1912 = vsyncpa [#allocation3], 1 }
 0x2c5   :  { %1913 = vsyncpa [#allocation6], 1 }
 0x2c6   :  { %1914 = vsyncpa [#allocation4], 1 }

// kernel: tpu_custom_call.1
= control target key start
LH: loop header
LB: loop body
LE: loop exit
PB: predicated region body
PF: predicated region fallthrough
CT: control target
= control target key end

     0   :  { %9 = vsyncpa [#allocation3], 0  ;;  %s3693_s0 = inlined_call_operand.hbm [shape: bf16[8,64,128], index: 0, kind: input, shape index: {}]   ;;  %s3694_s1 = inlined_call_operand.hbm [shape: bf16[128,128], index: 1, kind: input, shape index: {}]   ;;  %s3695_s2 = inlined_call_operand.hbm [shape: bf16[128,128], index: 2, kind: input, shape index: {}]   ;;  %s3696_s3 = inlined_call_operand.vmem [shape: f32[3,128], index: 3, kind: input, shape index: {}]   ;;  %s3697_s4 = inlined_call_operand.hbm [shape: bf16[8,64,128], index: 4, kind: output, shape index: {}]  }
   0x1   :  { %10 = vsyncpa [#allocation6], 0 }
   0x2   :  { %11 = vsyncpa [#allocation4], 0  ;;  %s2621_s15 = smov [#allocation5]   ;;  %s2622_s17 = smov [#allocation2]  }
   0x3   :  { %s29_s16 = sshll.u32 %s2621_s15, 4  ;;  %s17_s18 = sshll.u32 %s2622_s17, 4  ;;  %s30_s16 = int_to_ptr.vmem [resolvable:$true] %s29_s16  ;;  %s18_s18 = int_to_ptr.vmem [resolvable:$true] %s17_s18 }
   0x4   :  { %s2543_s19 = scalar_lea.vmem %s30_s16, 1024  ;;  %p2548_p1 = scmp.lt.s32.totalorder %s30_s16, %s30_s16 }
   0x5   :  { %p2544_p0 = scmp.ne.s32.totalorder %s30_s16, %s2543_s19  ;;  %p2549_p2 = scmp.lt.s32.totalorder %s2543_s19, %s2543_s19 }
   0x7   :  { %p2550_p3 = por %p2549_p2, %p2548_p1 }
   0x9   :  { %p2551_p4 = pnand %p2550_p3, %p2544_p0 }
   0xb   :  { %2554 = shalt.err (!%p2551_p4)
}
   0xc   :  { %s2623_s20 = smov 64   ;;  %s2624_s21 = smov 4  }
   0xd   :  { %35 = dma.hbm_to_vmem [thread:$0]  %s3694_s1, 1024, %s30_s16, [#allocation6], %s2623_s20, %s2623_s20, %s2624_s21  }
   0xe   :  { %s2563_s24 = scalar_lea.vmem %s18_s18, 4096  ;;  %p2568_p6 = scmp.lt.s32.totalorder %s18_s18, %s18_s18 }
   0xf   :  { %p2564_p5 = scmp.ne.s32.totalorder %s18_s18, %s2563_s24  ;;  %p2569_p7 = scmp.lt.s32.totalorder %s2563_s24, %s2563_s24 }
  0x11   :  { %p2570_p8 = por %p2569_p7, %p2568_p6 }
  0x13   :  { %p2571_p9 = pnand %p2570_p8, %p2564_p5 }
  0x15   :  { %2574 = shalt.err (!%p2571_p9)
}
  0x16   :  { %23 = dma.hbm_to_vmem [thread:$0]  %s3693_s0, 4096, %s18_s18, [#allocation3], %s2623_s20, %s2623_s20, %s2624_s21  }
  0x17   :  { %s2625_s27 = smov [#allocation7]  }
  0x18   :  { %s41_s28 = sshll.u32 %s2625_s27, 4  ;;  %s42_s28 = int_to_ptr.vmem [resolvable:$true] %s41_s28 }
  0x19   :  { %s2583_s29 = scalar_lea.vmem %s42_s28, 1024  ;;  %p2588_p11 = scmp.lt.s32.totalorder %s42_s28, %s42_s28 }
  0x1a   :  { %p2584_p10 = scmp.ne.s32.totalorder %s42_s28, %s2583_s29  ;;  %p2589_p12 = scmp.lt.s32.totalorder %s2583_s29, %s2583_s29 }
  0x1c   :  { %p2590_p13 = por %p2589_p12, %p2588_p11 }
  0x1e   :  { %p2591_p0 = pnand %p2590_p13, %p2584_p10 }
  0x20   :  { %2594 = shalt.err (!%p2591_p0)
}
  0x21   :  { %47 = dma.hbm_to_vmem [thread:$0]  %s3695_s2, 1024, %s42_s28, [#allocation6], %s2623_s20, %s2623_s20, %s2624_s21  }
  0x22   :  { %2615 = dma.done.wait [#allocation3], 4096  }
  0x23   :  { %2616 = vsyncadd [#allocation3], 4294963200 }
  0x24   :  { %2617 = dma.done.wait [#allocation6], 2048  }
  0x25   :  { %2618 = vsyncadd [#allocation6], 4294965248  ;;  %v2485_v0 = vld [vmem:[#allocation5 + $0x38] sm:$0xff]   ;;  %v2486_v1 = vld [vmem:[#allocation5 + $0x30] sm:$0xff]   ;;  %v3698_v41 = vmov 0.0   ;;  %vm2627_vm0 = vmmov 0  }
  0x26   :  { %2340 = vmatprep.subr.bf16.mxu0 %v2485_v0  ;;  %2460 = vmatprep.subr.bf16.mxu1 %v2485_v0  ;;  %v2487_v2 = vld [vmem:[#allocation5 + $0x28] sm:$0xff]   ;;  %v2488_v3 = vld [vmem:[#allocation5 + $0x20] sm:$0xff]   ;;  %v2489_v5 = vld [vmem:[#allocation5 + $0x18] sm:$0xff]   ;;  %vm968_vm1 = vcmask 1041409   ;;  %vm970_vm2 = vcmask 1042434   ;;  %vm972_vm3 = vcmask 1043459  }
  0x27   :  { %2341 = vmatpush3.bf16.msra.mxu0 %v2485_v0  ;;  %2468 = vmatpush3.bf16.msra.mxu1 %v2485_v0  ;;  %v2493_v4 = vld [vmem:[#allocation2] sm:$0xff]   ;;  %v2490_v6 = vld [vmem:[#allocation5 + $0x10] sm:$0xff]   ;;  %v2491_v7 = vld [vmem:[#allocation5 + $0x8] sm:$0xff]   ;;  %vm974_vm4 = vcmask 1044484   ;;  %vm976_vm5 = vcmask 1045509   ;;  %vm978_vm6 = vcmask 1046534  }
  0x28   :  { %2342 = vmatprep.subr.bf16.mxu0 %v2486_v1  ;;  %2461 = vmatprep.subr.bf16.mxu1 %v2486_v1  ;;  %v2505_v8 = vld [vmem:[#allocation2 + $0xb0] sm:$0xff]   ;;  %v2492_v9 = vld [vmem:[#allocation5] sm:$0xff]   ;;  %v2494_v10 = vld [vmem:[#allocation2 + $0x8] sm:$0xff]   ;;  %vm980_vm7 = vcmask 1047559  }
  0x29   :  { %2356 = vmatprep.mubr.bf16.mxu0 %v2493_v4  ;;  %2400 = vmatprep.mubr.bf16.mxu1 %v2505_v8  ;;  %v2495_v11 = vld [vmem:[#allocation2 + $0x10] sm:$0xff]   ;;  %v2506_v12 = vld [vmem:[#allocation2 + $0xb8] sm:$0xff]   ;;  %v2509_v13 = vld [vmem:[#allocation2 + $0xc0] sm:$0xff]  }
  0x2a   :  { %v2496_v14 = vld [vmem:[#allocation2 + $0x18] sm:$0xff]   ;;  %v2497_v15 = vld [vmem:[#allocation2 + $0x20] sm:$0xff]   ;;  %v2510_v16 = vld [vmem:[#allocation2 + $0xc8] sm:$0xff]  }
  0x2b   :  { %2343 = vmatpush3.bf16.msra.mxu0 %v2486_v1  ;;  %2469 = vmatpush3.bf16.msra.mxu1 %v2486_v1  ;;  %v2513_v17 = vld [vmem:[#allocation2 + $0xd0] sm:$0xff]   ;;  %v2498_v18 = vld [vmem:[#allocation2 + $0x28] sm:$0xff]   ;;  %v2514_v19 = vld [vmem:[#allocation2 + $0xd8] sm:$0xff]  }
  0x2c   :  { %2344 = vmatprep.subr.bf16.mxu0 %v2487_v2  ;;  %2462 = vmatprep.subr.bf16.mxu1 %v2487_v2  ;;  %v2499_v20 = vld [vmem:[#allocation2 + $0x30] sm:$0xff]   ;;  %v2517_v21 = vld [vmem:[#allocation2 + $0xe0] sm:$0xff]   ;;  %v2500_v22 = vld [vmem:[#allocation2 + $0x38] sm:$0xff]  }
  0x2d   :  { %v2518_v23 = vld [vmem:[#allocation2 + $0xe8] sm:$0xff]   ;;  %v2501_v24 = vld [vmem:[#allocation2 + $0x40] sm:$0xff]   ;;  %v2521_v25 = vld [vmem:[#allocation2 + $0xf0] sm:$0xff]  }
  0x2e   :  { %v2502_v26 = vld [vmem:[#allocation2 + $0x48] sm:$0xff]   ;;  %v2522_v27 = vld [vmem:[#allocation2 + $0xf8] sm:$0xff]   ;;  %v2503_v28 = vld [vmem:[#allocation2 + $0x50] sm:$0xff]  }
  0x2f   :  { %2345 = vmatpush3.bf16.msra.mxu0 %v2487_v2  ;;  %2470 = vmatpush3.bf16.msra.mxu1 %v2487_v2  ;;  %v2504_v29 = vld [vmem:[#allocation2 + $0x58] sm:$0xff]   ;;  %v2507_v30 = vld [vmem:[#allocation2 + $0x60] sm:$0xff]   ;;  %v2508_v31 = vld [vmem:[#allocation2 + $0x68] sm:$0xff]  }
  0x30   :  { %2346 = vmatprep.subr.bf16.mxu0 %v2488_v3  ;;  %2463 = vmatprep.subr.bf16.mxu1 %v2488_v3  ;;  %v2511_v32 = vld [vmem:[#allocation2 + $0x70] sm:$0xff]   ;;  %v2512_v33 = vld [vmem:[#allocation2 + $0x78] sm:$0xff]   ;;  %v2515_v34 = vld [vmem:[#allocation2 + $0x80] sm:$0xff]  }
  0x31   :  { %v2516_v35 = vld [vmem:[#allocation2 + $0x88] sm:$0xff]   ;;  %v2519_v36 = vld [vmem:[#allocation2 + $0x90] sm:$0xff]   ;;  %v2520_v37 = vld [vmem:[#allocation2 + $0x98] sm:$0xff]  }
  0x32   :  { %v2523_v38 = vld [vmem:[#allocation2 + $0xa0] sm:$0xff]   ;;  %v2524_v39 = vld [vmem:[#allocation2 + $0xa8] sm:$0xff]   ;;  %v2673_v40 = vld [vmem:[#allocation7 + $0x38] sm:$0xff]  }
  0x33   :  { %2347 = vmatpush3.bf16.msra.mxu0 %v2488_v3  ;;  %2471 = vmatpush3.bf16.msra.mxu1 %v2488_v3  ;;  %3760 = vst [vmem:[#allocation12_spill] sm:$0xff] %v2673_v40  ;;  %v2678_v42 = vld [vmem:[#allocation7 + $0x30] sm:$0xff]   ;;  %v2682_v43 = vld [vmem:[#allocation7 + $0x28] sm:$0xff]   ;;  %v2686_v44 = vld [vmem:[#allocation7 + $0x20] sm:$0xff]  }
  0x34   :  { %2348 = vmatprep.subr.bf16.mxu0 %v2489_v5  ;;  %2464 = vmatprep.subr.bf16.mxu1 %v2489_v5  ;;  %3761 = vst [vmem:[#allocation13_spill] sm:$0xff] %v2678_v42  ;;  %3762 = vst [vmem:[#allocation14_spill] sm:$0xff] %v2682_v43  ;;  %v2690_v45 = vld [vmem:[#allocation7 + $0x18] sm:$0xff]   ;;  %v2694_v46 = vld [vmem:[#allocation7 + $0x10] sm:$0xff]  }
  0x35   :  { %3763 = vst [vmem:[#allocation15_spill] sm:$0xff] %v2686_v44  ;;  %3764 = vst [vmem:[#allocation16_spill] sm:$0xff] %v2690_v45  ;;  %v2697_v47 = vld [vmem:[#allocation7 + $0x8] sm:$0xff]   ;;  %v2703_v48 = vld [vmem:[#allocation7] sm:$0xff]  }
  0x36   :  { %3765 = vst [vmem:[#allocation17_spill] sm:$0xff] %v2694_v46  ;;  %3766 = vst [vmem:[#allocation18_spill] sm:$0xff] %v2697_v47 }
  0x37   :  { %2349 = vmatpush3.bf16.msra.mxu0 %v2489_v5  ;;  %2472 = vmatpush3.bf16.msra.mxu1 %v2489_v5  ;;  %3767 = vst [vmem:[#allocation19_spill] sm:$0xff] %v2703_v48 }
  0x38   :  { %2350 = vmatprep.subr.bf16.mxu0 %v2490_v6  ;;  %2465 = vmatprep.subr.bf16.mxu1 %v2490_v6 }
  0x3b   :  { %2351 = vmatpush3.bf16.msra.mxu0 %v2490_v6  ;;  %2473 = vmatpush3.bf16.msra.mxu1 %v2490_v6 }
  0x3c   :  { %2352 = vmatprep.subr.bf16.mxu0 %v2491_v7  ;;  %2466 = vmatprep.subr.bf16.mxu1 %v2491_v7 }
  0x3f   :  { %2353 = vmatpush3.bf16.msra.mxu0 %v2491_v7  ;;  %2474 = vmatpush3.bf16.msra.mxu1 %v2491_v7 }
  0x40   :  { %2354 = vmatprep.subr.bf16.mxu0 %v2492_v9  ;;  %2467 = vmatprep.subr.bf16.mxu1 %v2492_v9 }
  0x43   :  { %2355 = vmatpush3.bf16.msra.mxu0 %v2492_v9  ;;  %2475 = vmatpush3.bf16.msra.mxu1 %v2492_v9 }
  0x44   :  { %2420 = vmatprep.subr.bf16.mxu1 %v3698_v41 }
  0x46   :  { %2357 = vmatmul.mubr.bf16.vlgmr.msra.gmra.mxu0 %v2494_v10  ;;  %2401 = vmatmul.mubr.bf16.vlgmr.msra.gmra.mxu1 %v2506_v12 }
  0x47   :  { %2360 = vmatprep.mubr.bf16.mxu0 %v2495_v11  ;;  %2404 = vmatprep.mubr.bf16.mxu1 %v2509_v13 }
  0x48   :  { %2421 = vmatpush3.bf16.msra.mxu1 %v2673_v40 }
  0x49   :  { %2422 = vmatprep.subr.bf16.mxu1 %v3698_v41 }
  0x4c   :  { %2423 = vmatpush3.bf16.msra.mxu1 %v2678_v42 }
  0x4d   :  { %2424 = vmatprep.subr.bf16.mxu1 %v3698_v41 }
  0x4e   :  { %2361 = vmatmul.mubr.bf16.gmra.mxu0 %v2496_v14  ;;  %2405 = vmatmul.mubr.bf16.gmra.mxu1 %v2510_v16 }
  0x4f   :  { %2364 = vmatprep.mubr.bf16.mxu0 %v2497_v15  ;;  %2408 = vmatprep.mubr.bf16.mxu1 %v2513_v17 }
  0x50   :  { %2425 = vmatpush3.bf16.msra.mxu1 %v2682_v43 }
  0x51   :  { %2426 = vmatprep.subr.bf16.mxu1 %v3698_v41 }
  0x54   :  { %2427 = vmatpush3.bf16.msra.mxu1 %v2686_v44 }
  0x55   :  { %2428 = vmatprep.subr.bf16.mxu1 %v3698_v41 }
  0x56   :  { %2365 = vmatmul.mubr.bf16.gmra.mxu0 %v2498_v18  ;;  %2409 = vmatmul.mubr.bf16.gmra.mxu1 %v2514_v19 }
  0x57   :  { %2368 = vmatprep.mubr.bf16.mxu0 %v2499_v20  ;;  %2412 = vmatprep.mubr.bf16.mxu1 %v2517_v21 }
  0x58   :  { %2429 = vmatpush3.bf16.msra.mxu1 %v2690_v45 }
  0x59   :  { %2430 = vmatprep.subr.bf16.mxu1 %v3698_v41 }
  0x5c   :  { %2431 = vmatpush3.bf16.msra.mxu1 %v2694_v46 }
  0x5d   :  { %2432 = vmatprep.subr.bf16.mxu1 %v3698_v41 }
  0x5e   :  { %2369 = vmatmul.mubr.bf16.gmra.mxu0 %v2500_v22  ;;  %2413 = vmatmul.mubr.bf16.gmra.mxu1 %v2518_v23 }
  0x5f   :  { %2372 = vmatprep.mubr.bf16.mxu0 %v2501_v24  ;;  %2416 = vmatprep.mubr.bf16.mxu1 %v2521_v25 }
  0x60   :  { %2433 = vmatpush3.bf16.msra.mxu1 %v2697_v47 }
  0x61   :  { %2434 = vmatprep.subr.bf16.mxu1 %v3698_v41 }
  0x64   :  { %2435 = vmatpush3.bf16.msra.mxu1 %v2703_v48 }
  0x65   :  { %2440 = vmatprep.subr.bf16.mxu1 %v3698_v41 }
  0x66   :  { %2373 = vmatmul.mubr.bf16.gmra.mxu0 %v2502_v26  ;;  %2417 = vmatmul.mubr.bf16.gmra.mxu1 %v2522_v27 }
  0x67   :  { %2376 = vmatprep.mubr.bf16.mxu0 %v2503_v28  ;;  %2436 = vmatprep.mubr.msk.bf16.mxu1 %vm2627_vm0, %v3698_v41 }
  0x6e   :  { %2377 = vmatmul.mubr.bf16.gmra.mxu0 %v2504_v29 }
  0x6f   :  { %2380 = vmatprep.mubr.bf16.mxu0 %v2507_v30 }
  0x76   :  { %2381 = vmatmul.mubr.bf16.gmra.mxu0 %v2508_v31 }
  0x77   :  { %2384 = vmatprep.mubr.bf16.mxu0 %v2511_v32 }
  0x7e   :  { %2385 = vmatmul.mubr.bf16.gmra.mxu0 %v2512_v33 }
  0x7f   :  { %2388 = vmatprep.mubr.bf16.mxu0 %v2515_v34 }
  0x86   :  { %2389 = vmatmul.mubr.bf16.gmra.mxu0 %v2516_v35 }
  0x87   :  { %2392 = vmatprep.mubr.bf16.mxu0 %v2519_v36 }
  0x8e   :  { %2393 = vmatmul.mubr.bf16.gmra.mxu0 %v2520_v37 }
  0x8f   :  { %2396 = vmatprep.mubr.bf16.mxu0 %v2523_v38 }
  0x96   :  { %2397 = vmatmul.mubr.bf16.gmra.mxu0 %v2524_v39 }
 0x106   :  { %v2708_v49 = vpop.f32.mrf.mxu0  ;;  %v2710_v50 = vpop.f32.mrf.mxu1 }
 0x107   :  { %3768 = vst [vmem:[#allocation20_spill] sm:$0xff] %v2708_v49  ;;  %v776_v9 = vmul.f32 %v2708_v49, %v2708_v49 }
 0x108   :  { %v2712_v51 = vpop.f32.mrf.mxu0  ;;  %v2714_v52 = vpop.f32.mrf.mxu1 }
 0x109   :  { %3769 = vst [vmem:[#allocation21_spill] sm:$0xff] %v2712_v51  ;;  %v774_v3 = vmul.f32 %v2712_v51, %v2712_v51 }
 0x10a   :  { %v2716_v53 = vpop.f32.mrf.mxu0  ;;  %v2718_v54 = vpop.f32.mrf.mxu1 }
 0x10b   :  { %3770 = vst [vmem:[#allocation22_spill] sm:$0xff] %v2716_v53  ;;  %v777_v15 = vmul.f32 %v2716_v53, %v2716_v53 }
 0x10c   :  { %v2720_v55 = vpop.f32.mrf.mxu0  ;;  %v2722_v56 = vpop.f32.mrf.mxu1 }
 0x10d   :  { %3771 = vst [vmem:[#allocation23_spill] sm:$0xff] %v2720_v55  ;;  %v775_v0 = vmul.f32 %v2720_v55, %v2720_v55  ;;  %v670_v4 = vadd.f32 %v2720_v55, %v2712_v51 }
 0x10e   :  { %v2724_v57 = vpop.f32.mrf.mxu0  ;;  %v2728_v59 = vpop.f32.mrf.mxu1 }
 0x10f   :  { %3772 = vst [vmem:[#allocation24_spill] sm:$0xff] %v2724_v57  ;;  %3774 = vst [vmem:[#allocation26_spill] sm:$0xff] %v2728_v59  ;;  %v838_v6 = vadd.f32 %v775_v0, %v774_v3  ;;  %v671_v10 = vadd.f32 %v2708_v49, %v670_v4  ;;  %v780_v38 = vmul.f32 %v2724_v57, %v2724_v57 }
 0x110   :  { %v2726_v58 = vpop.f32.mrf.mxu0  ;;  %v2734_v62 = vpop.f32.mrf.mxu1  ;;  %v824_v4 = vmul.f32 %v2728_v59, %v2728_v59 }
 0x111   :  { %3773 = vst [vmem:[#allocation25_spill] sm:$0xff] %v2726_v58  ;;  %3777 = vst [vmem:[#allocation29_spill] sm:$0xff] %v2734_v62  ;;  %v839_v12 = vadd.f32 %v838_v6, %v776_v9  ;;  %v672_v16 = vadd.f32 %v2716_v53, %v671_v10  ;;  %v778_v23 = vmul.f32 %v2726_v58, %v2726_v58 }
 0x112   :  { %v2730_v60 = vpop.f32.mrf.mxu0  ;;  %v2742_v2 = vpop.f32.mrf.mxu1  ;;  %v822_v32 = vmul.f32 %v2734_v62, %v2734_v62 }
 0x113   :  { %3775 = vst [vmem:[#allocation27_spill] sm:$0xff] %v2730_v60  ;;  %3780 = vst [vmem:[#allocation32_spill] sm:$0xff] %v2742_v2  ;;  %v840_v18 = vadd.f32 %v839_v12, %v777_v15  ;;  %v673_v22 = vadd.f32 %v672_v16, %v2726_v58  ;;  %v781_v16 = vmul.f32 %v2730_v60, %v2730_v60 }
 0x114   :  { %v2732_v61 = vpop.f32.mrf.mxu0  ;;  %v2752_v8 = vpop.f32.mrf.mxu1 }
 0x115   :  { %3776 = vst [vmem:[#allocation28_spill] sm:$0xff] %v2732_v61  ;;  %3783 = vst [vmem:[#allocation35_spill] sm:$0xff] %v2752_v8  ;;  %v748_v21 = vadd.f32 %v2752_v8, %v2734_v62  ;;  %v841_v25 = vadd.f32 %v840_v18, %v778_v23  ;;  %v779_v26 = vmul.f32 %v2732_v61, %v2732_v61 }
 0x116   :  { %v2736_v63 = vpop.f32.mrf.mxu0  ;;  %v2761_v14 = vpop.f32.mrf.mxu1  ;;  %v674_v30 = vadd.f32 %v673_v22, %v2732_v61  ;;  %v823_v33 = vmul.f32 %v2752_v8, %v2752_v8  ;;  %v825_v23 = vmul.f32 %v2742_v2, %v2742_v2 }
 0x117   :  { %3778 = vst [vmem:[#allocation30_spill] sm:$0xff] %v2736_v63  ;;  %3786 = vst [vmem:[#allocation38_spill] sm:$0xff] %v2761_v14  ;;  %v749_v29 = vadd.f32 %v2728_v59, %v748_v21  ;;  %v842_v34 = vadd.f32 %v841_v25, %v779_v26  ;;  %v2843_v59 = vld [vmem:[%s3696_s3] sm:$0x7]  ;;  %s2629_s3 = smov [#allocation8]  }
 0x118   :  { %v2740_v1 = vpop.f32.mrf.mxu0  ;;  %v2770_v20 = vpop.f32.mrf.mxu1  ;;  %v675_v39 = vadd.f32 %v2724_v57, %v674_v30  ;;  %v916_v6 = vadd.f32 %v823_v33, %v822_v32  ;;  %v943_v33 = vlaneseq  ;;  %3802 = vst [vmem:[#allocation54_spill] sm:$0xff] %v2843_v59  ;;  %v828_v57 = vmul.f32 %v2761_v14, %v2761_v14  ;;  %s1902_s5 = sshll.u32 %s2629_s3, 4  ;;  %s1903_s5 = int_to_ptr.vmem [resolvable:$true] %s1902_s5 }
 0x119   :  { %3779 = vst [vmem:[#allocation31_spill] sm:$0xff] %v2740_v1  ;;  %3789 = vst [vmem:[#allocation41_spill] sm:$0xff] %v2770_v20  ;;  %v750_v37 = vadd.f32 %v2742_v2, %v749_v29  ;;  %v843_v9 = vadd.f32 %v842_v34, %v780_v38  ;;  %v782_v38 = vmul.f32 %v2740_v1, %v2740_v1  ;;  %s2595_s6 = scalar_lea.vmem %s1903_s5, 4096  ;;  %p2600_p2 = scmp.lt.s32.totalorder %s1903_s5, %s1903_s5 }
 0x11a   :  { %v2748_v5 = vpop.f32.mrf.mxu0  ;;  %v2783_v28 = vpop.f32.mrf.mxu1  ;;  %v676_v18 = vadd.f32 %v2730_v60, %v675_v39  ;;  %v917_v25 = vadd.f32 %v916_v6, %v824_v4  ;;  %v826_v4 = vmul.f32 %v2770_v20, %v2770_v20  ;;  %p2596_p1 = scmp.ne.s32.totalorder %s1903_s5, %s2595_s6  ;;  %p2601_p3 = scmp.lt.s32.totalorder %s2595_s6, %s2595_s6 }
 0x11b   :  { %3781 = vst [vmem:[#allocation33_spill] sm:$0xff] %v2748_v5  ;;  %3792 = vst [vmem:[#allocation44_spill] sm:$0xff] %v2783_v28  ;;  %v751_v15 = vadd.f32 %v750_v37, %v2770_v20  ;;  %v844_v26 = vadd.f32 %v843_v9, %v781_v16 }
 0x11c   :  { %v2750_v7 = vpop.f32.mrf.mxu0  ;;  %v2795_v36 = vpop.f32.mrf.mxu1  ;;  %v677_v37 = vrot.slane %v676_v18, 4  ;;  %v918_v6 = vadd.f32 %v917_v25, %v825_v23  ;;  %v784_v23 = vmul.f32 %v2736_v63, %v2736_v63  ;;  %p2602_p4 = por %p2601_p3, %p2600_p2 }
 0x11d   :  { %3782 = vst [vmem:[#allocation34_spill] sm:$0xff] %v2750_v7  ;;  %3795 = vst [vmem:[#allocation47_spill] sm:$0xff] %v2795_v36  ;;  %v683_v0 = vadd.f32 %v2750_v7, %v2740_v1  ;;  %v783_v29 = vmul.f32 %v2750_v7, %v2750_v7  ;;  %v752_v34 = vadd.f32 %v751_v15, %v2795_v36  ;;  %v845_v9 = vrot.slane %v844_v26, 4 }
 0x11e   :  { %v2757_v11 = vpop.f32.mrf.mxu0  ;;  %v2809_v12 = vpop.f32.mrf.mxu1  ;;  %v678_v20 = vadd.f32 %v677_v37, %v676_v18  ;;  %v919_v62 = vadd.f32 %v918_v6, %v826_v4  ;;  %v827_v7 = vmul.f32 %v2795_v36, %v2795_v36  ;;  %v2870_v6 = vmul.f32 2.0, %v2843_v59  ;;  %p2603_p5 = pnand %p2602_p4, %p2596_p1 }
 0x11f   :  { %3784 = vst [vmem:[#allocation36_spill] sm:$0xff] %v2757_v11  ;;  %3796 = vst [vmem:[#allocation48_spill] sm:$0xff] %v2809_v12  ;;  %v684_v21 = vadd.f32 %v2736_v63, %v683_v0  ;;  %v851_v16 = vadd.f32 %v783_v29, %v782_v38  ;;  %v753_v8 = vadd.f32 %v2761_v14, %v752_v34 }
 0x120   :  { %v2759_v13 = vpop.f32.mrf.mxu0  ;;  %v2824_v32 = vpop.f32.mrf.mxu1  ;;  %v1008_v38 = vmul.f32 %v2843_v59, %v2843_v59  ;;  %v846_v1 = vadd.f32 %v845_v9, %v844_v26  ;;  %v679_v26 = vrot.slane %v678_v20, 2  ;;  %v785_v9 = vmul.f32 %v2748_v5, %v2748_v5 }
 0x121   :  { %3785 = vst [vmem:[#allocation37_spill] sm:$0xff] %v2759_v13  ;;  %3798 = vst [vmem:[#allocation50_spill] sm:$0xff] %v2824_v32  ;;  %v685_v39 = vadd.f32 %v2748_v5, %v684_v21  ;;  %v2845_v21 = vshrl.u32 %v943_v33, 7  ;;  %v942_v33 = vmul.f32 64.0, %v2843_v59  ;;  %v852_v60 = vadd.f32 %v851_v16, %v784_v23 }
 0x122   :  { %v2766_v17 = vpop.f32.mrf.mxu0  ;;  %v2838_v15 = vpop.f32.mrf.mxu1  ;;  %v754_v4 = vadd.f32 %v2783_v28, %v753_v8  ;;  %v1009_v23 = vmul.f32 64.0, %v1008_v38  ;;  %v920_v61 = vadd.f32 %v919_v62, %v827_v7  ;;  %v847_v58 = vrot.slane %v846_v1, 2 }
 0x123   :  { %3787 = vst [vmem:[#allocation39_spill] sm:$0xff] %v2766_v17  ;;  %3801 = vst [vmem:[#allocation53_spill] sm:$0xff] %v2838_v15  ;;  %v686_v25 = vadd.f32 %v685_v39, %v2759_v13  ;;  %v2864_v39 = vsub.s32 0, %v2845_v21  ;;  %v853_v53 = vadd.f32 %v852_v60, %v785_v9  ;;  %v680_v51 = vadd.f32 %v679_v26, %v678_v20 }
 0x124   :  { %v2768_v19 = vpop.f32.mrf.mxu0  ;;  %3803 = vst [vmem:[#allocation55_spill] sm:$0xff] %v2845_v21  ;;  %v2861_v37 = vpop.f32.mrf.mxu1  ;;  %v755_v38 = vrot.slane %v754_v4, 4  ;;  %v786_v62 = vmul.f32 %v2759_v13, %v2759_v13  ;;  %v921_v9 = vadd.f32 %v920_v61, %v828_v57  ;;  %v848_v20 = vadd.f32 %v847_v58, %v846_v1 }
 0x125   :  { %3788 = vst [vmem:[#allocation40_spill] sm:$0xff] %v2768_v19  ;;  %3806 = vst [vmem:[#allocation58_spill] sm:$0xff] %v2861_v37  ;;  %v761_v8 = vadd.f32 %v2861_v37, %v2824_v32  ;;  %v787_v13 = vmul.f32 %v2768_v19, %v2768_v19  ;;  %v2913_v60 = vmul.f32 %v2710_v50, %v2710_v50  ;;  %v681_v61 = vrot.slane %v680_v51, 1 }
 0x126   :  { %v2777_v24 = vpop.f32.mrf.mxu0  ;;  %v2885_v5 = vpop.f32.mrf.mxu1  ;;  %v854_v26 = vadd.f32 %v853_v53, %v786_v62  ;;  %v2917_v57 = vmul.f32 %v2714_v52, %v2714_v52  ;;  %v756_v53 = vadd.f32 %v755_v38, %v754_v4  ;;  %v788_v62 = vmul.f32 %v2757_v11, %v2757_v11 }
 0x127   :  { %3790 = vst [vmem:[#allocation42_spill] sm:$0xff] %v2777_v24  ;;  %3808 = vst [vmem:[#allocation60_spill] sm:$0xff] %v2885_v5  ;;  %v832_v4 = vmul.f32 %v2809_v12, %v2809_v12  ;;  %v849_v38 = vrot.slane %v848_v20, 1 }
 0x128   :  { %v2781_v27 = vpop.f32.mrf.mxu0  ;;  %v2909_v21 = vpop.f32.mrf.mxu1 }
 0x129   :  { %3791 = vst [vmem:[#allocation43_spill] sm:$0xff] %v2781_v27  ;;  %3810 = vst [vmem:[#allocation62_spill] sm:$0xff] %v2909_v21 }
 0x12a   :  { %v2787_v31 = vpop.f32.mrf.mxu0  ;;  %v2943_v46 = vpop.f32.mrf.mxu1 }
 0x12b   :  { %3793 = vst [vmem:[#allocation45_spill] sm:$0xff] %v2787_v31 }
 0x12c   :  { %v2793_v35 = vpop.f32.mrf.mxu0 }
 0x12d   :  { %3794 = vst [vmem:[#allocation46_spill] sm:$0xff] %v2793_v35  ;;  %v696_v41 = vadd.f32 %v2793_v35, %v2781_v27 }
 0x12e   :  { %v2803_v3 = vpop.f32.mrf.mxu0 }
 0x12f   :  { %v697_v18 = vadd.f32 %v2777_v24, %v696_v41  ;;  %v687_v41 = vadd.f32 %v686_v25, %v2768_v19  ;;  %v2888_v25 = vrot.slane %v942_v33, %v2864_v39  ;;  %v762_v33 = vadd.f32 %v2809_v12, %v761_v8 }
 0x130   :  { %v2807_v10 = vpop.f32.mrf.mxu0  ;;  %v791_v19 = vmul.f32 %v2793_v35, %v2793_v35  ;;  %v2950_v12 = vadd.f32 %v681_v61, %v680_v51  ;;  %v2958_v35 = vmul.f32 %v2838_v15, %v2838_v15  ;;  %v2966_v61 = vadd.f32 %v849_v38, %v848_v20 }
 0x131   :  { %v698_v49 = vadd.f32 %v2787_v31, %v697_v18  ;;  %v688_v7 = vadd.f32 %v2757_v11, %v687_v41  ;;  %v829_v18 = vmul.f32 %v2783_v28, %v2783_v28  ;;  %v757_v11 = vrot.slane %v756_v53, 2 }
 0x132   :  { %v2816_v22 = vpop.f32.mrf.mxu0  ;;  %v2980_v20 = vadd.f32 %v2888_v25, %v2950_v12 }
 0x133   :  { %3797 = vst [vmem:[#allocation49_spill] sm:$0xff] %v2816_v22  ;;  %v699_v41 = vadd.f32 %v698_v49, %v2807_v10  ;;  %v689_v1 = vadd.f32 %v2766_v17, %v688_v7  ;;  %v2923_v49 = vmul.f32 %v2718_v54, %v2718_v54  ;;  %v2933_v28 = vadd.f32 %v921_v9, %v829_v18 }
 0x134   :  { %v2822_v30 = vpop.f32.mrf.mxu0  ;;  %v855_v7 = vadd.f32 %v854_v26, %v787_v13  ;;  %v789_v18 = vmul.f32 %v2766_v17, %v2766_v17  ;;  %v790_v26 = vmul.f32 %v2781_v27, %v2781_v27  ;;  %v758_v42 = vadd.f32 %v757_v11, %v756_v53 }
 0x135   :  { %v700_v48 = vadd.f32 %v699_v41, %v2822_v30  ;;  %v690_v13 = vrot.slane %v689_v1, 4 }
 0x136   :  { %v2830_v0 = vpop.f32.mrf.mxu0  ;;  %v856_v45 = vadd.f32 %v855_v7, %v788_v62  ;;  %v864_v27 = vadd.f32 %v791_v19, %v790_v26 }
 0x137   :  { %3799 = vst [vmem:[#allocation51_spill] sm:$0xff] %v2830_v0  ;;  %v701_v44 = vadd.f32 %v2803_v3, %v700_v48  ;;  %v691_v19 = vadd.f32 %v690_v13, %v689_v1  ;;  %v792_v48 = vmul.f32 %v2777_v24, %v2777_v24 }
 0x138   :  { %v2836_v2 = vpop.f32.mrf.mxu0 }
 0x139   :  { %3800 = vst [vmem:[#allocation52_spill] sm:$0xff] %v2836_v2  ;;  %v865_v26 = vadd.f32 %v864_v27, %v792_v48 }
 0x13a   :  { %v2851_v29 = vpop.f32.mrf.mxu0 }
 0x13b   :  { %3804 = vst [vmem:[#allocation56_spill] sm:$0xff] %v2851_v29 }
 0x13c   :  { %v2859_v34 = vpop.f32.mrf.mxu0 }
 0x13d   :  { %3805 = vst [vmem:[#allocation57_spill] sm:$0xff] %v2859_v34  ;;  %v709_v63 = vadd.f32 %v2859_v34, %v2836_v2  ;;  %v799_v17 = vmul.f32 %v2859_v34, %v2859_v34  ;;  %v798_v34 = vmul.f32 %v2836_v2, %v2836_v2  ;;  %v702_v2 = vadd.f32 %v2816_v22, %v701_v44 }
 0x13e   :  { %v2875_v16 = vpop.f32.mrf.mxu0  ;;  %v3003_v44 = vmul.f32 %v2885_v5, %v2885_v5 }
 0x13f   :  { %v710_v36 = vadd.f32 %v2830_v0, %v709_v63  ;;  %v877_v38 = vadd.f32 %v799_v17, %v798_v34  ;;  %v759_v17 = vrot.slane %v758_v42, 1 }
 0x140   :  { %v2883_v55 = vpop.f32.mrf.mxu0 }
 0x141   :  { %3807 = vst [vmem:[#allocation59_spill] sm:$0xff] %v2883_v55  ;;  %v711_v63 = vadd.f32 %v2851_v29, %v710_v36  ;;  %v2902_v36 = vrot.slane %v1009_v23, %v2864_v39  ;;  %v2927_v23 = vmul.f32 %v2722_v56, %v2722_v56  ;;  %v3015_v40 = vadd.f32 %v759_v17, %v758_v42 }
 0x142   :  { %v2894_v14 = vpop.f32.mrf.mxu0 }
 0x143   :  { %v712_v58 = vadd.f32 %v711_v63, %v2883_v55  ;;  %v763_v63 = vadd.f32 %v2838_v15, %v762_v33  ;;  %v830_v33 = vmul.f32 %v2824_v32, %v2824_v32  ;;  %v831_v32 = vmul.f32 %v2861_v37, %v2861_v37  ;;  %v2971_v15 = vpop.f32.mrf.mxu1 }
 0x144   :  { %v2907_v59 = vpop.f32.mrf.mxu0 }
 0x145   :  { %3809 = vst [vmem:[#allocation61_spill] sm:$0xff] %v2907_v59  ;;  %v713_v9 = vadd.f32 %v712_v58, %v2907_v59  ;;  %v764_v51 = vadd.f32 %v763_v63, %v2909_v21  ;;  %v929_v11 = vadd.f32 %v831_v32, %v830_v33  ;;  %v692_v32 = vrot.slane %v691_v19, 2 }
 0x146   :  { %v2929_v8 = vpop.f32.mrf.mxu0 }
 0x147   :  { %3811 = vst [vmem:[#allocation63_spill] sm:$0xff] %v2929_v8  ;;  %v714_v58 = vadd.f32 %v2875_v16, %v713_v9  ;;  %v765_v53 = vadd.f32 %v764_v51, %v2971_v15  ;;  %v857_v9 = vadd.f32 %v856_v45, %v789_v18  ;;  %v793_v45 = vmul.f32 %v2787_v31, %v2787_v31 }
 0x148   :  { %v2941_v47 = vpop.f32.mrf.mxu0  ;;  %v930_v33 = vadd.f32 %v929_v11, %v832_v4  ;;  %v693_v4 = vadd.f32 %v692_v32, %v691_v19  ;;  %v794_v11 = vmul.f32 %v2807_v10, %v2807_v10  ;;  %v795_v19 = vmul.f32 %v2822_v30, %v2822_v30 }
 0x149   :  { %3812 = vst [vmem:[#allocation64_spill] sm:$0xff] %v2941_v47  ;;  %v806_v1 = vmul.f32 %v2941_v47, %v2941_v47  ;;  %v715_v24 = vadd.f32 %v2894_v14, %v714_v58  ;;  %v766_v58 = vadd.f32 %v2885_v5, %v765_v53  ;;  %v858_v48 = vrot.slane %v857_v9, 4 }
 0x14a   :  { %v2954_v41 = vpop.f32.mrf.mxu0 }
 0x14b   :  { %3813 = vst [vmem:[#allocation65_spill] sm:$0xff] %v2954_v41  ;;  %v767_v42 = vadd.f32 %v2943_v46, %v766_v58  ;;  %v809_v32 = vmul.f32 %v2954_v41, %v2954_v41  ;;  %v3038_v58 = vadd.f32 %v858_v48, %v857_v9 }
 0x14c   :  { %v2969_v43 = vpop.f32.mrf.mxu0 }
 0x14d   :  { %3814 = vst [vmem:[#allocation66_spill] sm:$0xff] %v2969_v43  ;;  %v722_v37 = vadd.f32 %v2969_v43, %v2941_v47  ;;  %v807_v62 = vmul.f32 %v2969_v43, %v2969_v43  ;;  %v800_v43 = vmul.f32 %v2830_v0, %v2830_v0  ;;  %v866_v47 = vadd.f32 %v865_v26, %v793_v45 }
 0x14e   :  { %v2986_v63 = vpop.f32.mrf.mxu0  ;;  %v808_v0 = vmul.f32 %v2929_v8, %v2929_v8  ;;  %v834_v45 = vmul.f32 %v2909_v21, %v2909_v21  ;;  %v803_v21 = vmul.f32 %v2907_v59, %v2907_v59 }
 0x14f   :  { %v723_v7 = vadd.f32 %v2929_v8, %v722_v37  ;;  %v890_v27 = vadd.f32 %v807_v62, %v806_v1  ;;  %v878_v18 = vadd.f32 %v877_v38, %v800_v43  ;;  %v801_v62 = vmul.f32 %v2851_v29, %v2851_v29 }
 0x150   :  { %v2993_v13 = vpop.f32.mrf.mxu0  ;;  %v716_v1 = vrot.slane %v715_v24, 4  ;;  %v796_v38 = vmul.f32 %v2803_v3, %v2803_v3  ;;  %v867_v17 = vadd.f32 %v866_v47, %v794_v11  ;;  %v3042_v47 = vadd.f32 %v2888_v25, %v3015_v40 }
 0x151   :  { %3815 = vst [vmem:[#allocation67_spill] sm:$0xff] %v2993_v13  ;;  %v724_v34 = vadd.f32 %v2954_v41, %v723_v7  ;;  %v703_v7 = vrot.slane %v702_v2, 4  ;;  %v891_v53 = vadd.f32 %v890_v27, %v808_v0  ;;  %v802_v0 = vmul.f32 %v2883_v55, %v2883_v55 }
 0x152   :  { %v3005_v37 = vpop.f32.mrf.mxu0  ;;  %v717_v27 = vadd.f32 %v716_v1, %v715_v24  ;;  %v768_v24 = vrot.slane %v767_v42, 4  ;;  %v810_v9 = vmul.f32 %v2993_v13, %v2993_v13 }
 0x153   :  { %v725_v51 = vadd.f32 %v724_v34, %v2993_v13  ;;  %v879_v34 = vadd.f32 %v878_v18, %v801_v62  ;;  %v931_v18 = vadd.f32 %v930_v33, %v2958_v35  ;;  %v797_v35 = vmul.f32 %v2816_v22, %v2816_v22 }
 0x154   :  { %v3011_v31 = vpop.f32.mrf.mxu0  ;;  %v868_v33 = vadd.f32 %v867_v17, %v795_v19  ;;  %v718_v1 = vrot.slane %v717_v27, 2  ;;  %v769_v29 = vadd.f32 %v768_v24, %v767_v42 }
 0x155   :  { %v726_v43 = vadd.f32 %v725_v51, %v3011_v31  ;;  %v704_v51 = vadd.f32 %v703_v7, %v702_v2  ;;  %v892_v2 = vadd.f32 %v891_v53, %v809_v32  ;;  %v880_v11 = vadd.f32 %v879_v34, %v802_v0 }
 0x156   :  { %v3022_v26 = vpop.f32.mrf.mxu0  ;;  %v932_v53 = vadd.f32 %v931_v18, %v834_v45  ;;  %v811_v59 = vmul.f32 %v3011_v31, %v3011_v31 }
 0x157   :  { %v727_v5 = vadd.f32 %v2986_v63, %v726_v43  ;;  %v694_v43 = vrot.slane %v693_v4, 1  ;;  %v893_v0 = vadd.f32 %v892_v2, %v810_v9  ;;  %v881_v19 = vadd.f32 %v880_v11, %v803_v21 }
 0x158   :  { %v3032_v8 = vpop.f32.mrf.mxu0  ;;  %v816_v18 = vmul.f32 %v3022_v26, %v3022_v26  ;;  %v804_v2 = vmul.f32 %v2875_v16, %v2875_v16  ;;  %v719_v9 = vadd.f32 %v718_v1, %v717_v27  ;;  %v812_v27 = vmul.f32 %v2986_v63, %v2986_v63 }
 0x159   :  { %3816 = vst [vmem:[#allocation68_spill] sm:$0xff] %v3032_v8  ;;  %v728_v62 = vadd.f32 %v3005_v37, %v727_v5  ;;  %v705_v5 = vrot.slane %v704_v51, 2  ;;  %v814_v55 = vmul.f32 %v3032_v8, %v3032_v8  ;;  %v894_v11 = vadd.f32 %v893_v0, %v811_v59 }
 0x15a   :  { %v3044_v7 = vpop.f32.mrf.mxu0  ;;  %v882_v24 = vadd.f32 %v881_v19, %v804_v2  ;;  %v805_v59 = vmul.f32 %v2894_v14, %v2894_v14  ;;  %v813_v2 = vmul.f32 %v3005_v37, %v3005_v37 }
 0x15b   :  { %v729_v41 = vrot.slane %v728_v62, 4  ;;  %v706_v45 = vadd.f32 %v705_v5, %v704_v51  ;;  %v817_v42 = vmul.f32 %v3044_v7, %v3044_v7  ;;  %v770_v5 = vrot.slane %v769_v29, 2 }
 0x15c   :  { %v3052_v48 = vpop.f32.mrf.mxu0 }
 0x15d   :  { %3817 = vst [vmem:[#allocation69_spill] sm:$0xff] %v3052_v48  ;;  %v730_v32 = vadd.f32 %v729_v41, %v728_v62  ;;  %v735_v34 = vadd.f32 %v3052_v48, %v3032_v8  ;;  %v815_v17 = vmul.f32 %v3052_v48, %v3052_v48  ;;  %v869_v41 = vadd.f32 %v868_v33, %v796_v38 }
 0x15e   :  { %v835_v8 = vmul.f32 %v2971_v15, %v2971_v15  ;;  %v3072_v38 = vadd.f32 %v694_v43, %v693_v4  ;;  %v707_v33 = vrot.slane %v706_v45, 1  ;;  %v895_v43 = vadd.f32 %v894_v11, %v812_v27 }
 0x15f   :  { %v731_v13 = vrot.slane %v730_v32, 2  ;;  %v736_v22 = vadd.f32 %v3022_v26, %v735_v34  ;;  %v903_v62 = vadd.f32 %v815_v17, %v814_v55  ;;  %v870_v34 = vadd.f32 %v869_v41, %v797_v35 }
 0x160   :  { %v933_v0 = vadd.f32 %v932_v53, %v835_v8  ;;  %v948_v35 = vadd.f32 %v2888_v25, %v3072_v38  ;;  %v771_v19 = vadd.f32 %v770_v5, %v769_v29  ;;  %v837_v8 = vmul.f32 %v2943_v46, %v2943_v46 }
 0x161   :  { %v737_v48 = vadd.f32 %v3044_v7, %v736_v22  ;;  %v732_v21 = vadd.f32 %v731_v13, %v730_v32  ;;  %v904_v51 = vadd.f32 %v903_v62, %v816_v18  ;;  %v860_v22 = vrot.slane %v3038_v58, 2 }
 0x162   :  { %v720_v13 = vrot.slane %v719_v9, 1  ;;  %v708_v18 = vadd.f32 %v707_v33, %v706_v45  ;;  %v871_v62 = vrot.slane %v870_v34, 4  ;;  %v934_v45 = vadd.f32 %v933_v0, %v3003_v44 }
 0x163   :  { %v738_v55 = vadd.f32 %v737_v48, %v2714_v52  ;;  %v905_v1 = vadd.f32 %v904_v51, %v817_v42  ;;  %v733_v4 = vrot.slane %v732_v21, 1  ;;  %v883_v48 = vadd.f32 %v882_v24, %v805_v59 }
 0x164   :  { %v721_v11 = vadd.f32 %v720_v13, %v719_v9  ;;  %v896_v51 = vadd.f32 %v895_v43, %v813_v2  ;;  %v1038_v33 = vpack.c.bf16 %v2980_v20, %v2980_v20  ;;  %v1039_v27 = vpack.c.bf16 %v948_v35, %v948_v35 }
 0x165   :  { %v739_v32 = vadd.f32 %v738_v55, %v2722_v56  ;;  %v906_v17 = vadd.f32 %v905_v1, %v2917_v57  ;;  %v1044_v57 = vpack.c.bf16 %v3042_v47, %v3042_v47  ;;  %v734_v53 = vadd.f32 %v733_v4, %v732_v21 }
 0x166   :  { %v884_v5 = vrot.slane %v883_v48, 4  ;;  %v772_v47 = vrot.slane %v771_v19, 1  ;;  %v872_v1 = vadd.f32 %v871_v62, %v870_v34  ;;  %v949_v21 = vadd.f32 %v2888_v25, %v708_v18 }
 0x167   :  { %v740_v41 = vadd.f32 %v2710_v50, %v739_v32  ;;  %v907_v42 = vadd.f32 %v906_v17, %v2927_v23  ;;  %v3818_v23 = vrot.slane %v2933_v28, 4  ;;  %v861_v44 = vadd.f32 %v860_v22, %v3038_v58 }
 0x168   :  { %v897_v32 = vrot.slane %v896_v51, 4  ;;  %v951_v4 = vadd.f32 %v2888_v25, %v734_v53  ;;  %v935_v43 = vadd.f32 %v934_v45, %v837_v8  ;;  %v885_v20 = vadd.f32 %v884_v5, %v883_v48 }
 0x169   :  { %v741_v29 = vadd.f32 %v2718_v54, %v740_v41  ;;  %v908_v24 = vadd.f32 %v907_v42, %v2913_v60  ;;  %v3098_v9 = vadd.f32 %v3818_v23, %v2933_v28  ;;  %v950_v60 = vadd.f32 %v2888_v25, %v721_v11 }
 0x16a   :  { %v3106_v28 = vunpack.c.l.b16 %v1044_v57  ;;  %v773_v0 = vadd.f32 %v772_v47, %v771_v19  ;;  %v1054_v35 = vunpack.c.l.b16 %v1038_v33  ;;  %v1055_v58 = vunpack.c.l.b16 %v1039_v27 }
 0x16b   :  { %v742_v55 = vrot.slane %v741_v29, 4  ;;  %v909_v13 = vadd.f32 %v908_v24, %v2923_v49  ;;  %v925_v34 = vrot.slane %v3098_v9, 2  ;;  %v873_v22 = vrot.slane %v872_v1, 2 }
 0x16c   :  { %v1040_v41 = vpack.c.bf16 %v949_v21, %v949_v21  ;;  %v862_v62 = vrot.slane %v861_v44, 1  ;;  %v1041_v2 = vpack.c.bf16 %v950_v60, %v950_v60  ;;  %v1072_v57 = vrot.slane %v3106_v28, 2 }
 0x16d   :  { %v743_v59 = vadd.f32 %v742_v55, %v741_v29  ;;  %v910_v42 = vrot.slane %v909_v13, 4  ;;  %v898_v29 = vadd.f32 %v897_v32, %v896_v51  ;;  %v1042_v24 = vpack.c.bf16 %v951_v4, %v951_v4 }
 0x16e   :  { %v936_v23 = vrot.slane %v935_v43, 4  ;;  %v969_v48 = vsel %vm968_vm1, %v3072_v38, %v2950_v12  ;;  %v886_v8 = vrot.slane %v885_v20, 2  ;;  %v954_v19 = vadd.f32 %v2888_v25, %v773_v0 }
 0x16f   :  { %v744_v17 = vrot.slane %v743_v59, 2  ;;  %v1062_v5 = vrot.slane %v1055_v58, 7  ;;  %v874_v47 = vadd.f32 %v873_v22, %v872_v1  ;;  %v971_v55 = vsel %vm970_vm2, %v708_v18, %v969_v48 }
 0x170   :  { %v1056_v33 = vunpack.c.l.b16 %v1040_v41  ;;  %v973_v27 = vsel %vm972_vm3, %v721_v11, %v971_v55  ;;  %v1057_v21 = vunpack.c.l.b16 %v1041_v2  ;;  %v911_v51 = vadd.f32 %v910_v42, %v909_v13 }
 0x171   :  { %v745_v49 = vadd.f32 %v744_v17, %v743_v59  ;;  %v899_v59 = vrot.slane %v898_v29, 2  ;;  %v975_v28 = vsel %vm974_vm4, %v734_v53, %v973_v27  ;;  %v1058_v32 = vunpack.c.l.b16 %v1042_v24 }
 0x172   :  { %v937_v4 = vadd.f32 %v936_v23, %v935_v43  ;;  %v887_v12 = vadd.f32 %v886_v8, %v885_v20  ;;  %v1045_v38 = vpack.c.bf16 %v954_v19, %v954_v19  ;;  %v863_v1 = vadd.f32 %v862_v62, %v861_v44 }
 0x173   :  { %v746_v45 = vrot.slane %v745_v49, 1  ;;  %v875_v22 = vrot.slane %v874_v47, 1  ;;  %v1064_v18 = vrot.slane %v1056_v33, 6  ;;  %v1066_v41 = vrot.slane %v1057_v21, 5 }
 0x174   :  { %v912_v2 = vrot.slane %v911_v51, 2  ;;  %v1063_v53 = vsel %vm968_vm1, %v1062_v5, %v1054_v35  ;;  %v900_v43 = vadd.f32 %v899_v59, %v898_v29  ;;  %v1068_v20 = vrot.slane %v1058_v32, 4 }
 0x175   :  { %v747_v60 = vadd.f32 %v746_v45, %v745_v49  ;;  %v888_v44 = vrot.slane %v887_v12, 1  ;;  %v938_v62 = vrot.slane %v937_v4, 2  ;;  %v1061_v24 = vunpack.c.l.b16 %v1045_v38 }
 0x176   :  { %v876_v48 = vadd.f32 %v875_v22, %v874_v47  ;;  %v913_v19 = vadd.f32 %v912_v2, %v911_v51  ;;  %v926_v51 = vadd.f32 %v925_v34, %v3098_v9 }
 0x177   :  { %v952_v17 = vadd.f32 %v2888_v25, %v747_v60  ;;  %v977_v58 = vsel %vm976_vm5, %v747_v60, %v975_v28  ;;  %v3819_v25 = vrot.slane %v2870_v6, %v2864_v39  ;;  %v901_v6 = vrot.slane %v900_v43, 1 }
 0x178   :  { %v979_v11 = vsel %vm978_vm6, %v3015_v40, %v977_v58  ;;  %v1065_v40 = vsel %vm970_vm2, %v1064_v18, %v1063_v53  ;;  %v889_v27 = vadd.f32 %v888_v44, %v887_v12  ;;  %v1074_v21 = vrot.slane %v1061_v24, 1 }
 0x179   :  { %v981_v13 = vsel %vm980_vm7, %v773_v0, %v979_v11  ;;  %v1043_v49 = vpack.c.bf16 %v952_v17, %v952_v17  ;;  %v1067_v35 = vsel %vm972_vm3, %v1066_v41, %v1065_v40  ;;  %v914_v38 = vrot.slane %v913_v19, 1 }
 0x17a   :  { %v3127_v42 = vmul.f32 %v981_v13, %v3819_v25  ;;  %v1069_v5 = vsel %vm974_vm4, %v1068_v20, %v1067_v35  ;;  %v939_v18 = vadd.f32 %v938_v62, %v937_v4  ;;  %v927_v34 = vrot.slane %v926_v51, 1  ;;  %v3820_v13 = vld [vmem:[#allocation12_spill] sm:$0xff] }
 0x17b   :  { %v1059_v23 = vunpack.c.l.b16 %v1043_v49  ;;  %v915_v2 = vadd.f32 %v914_v38, %v913_v19  ;;  %v3821_v49 = vmov 0.0  }
 0x17c   :  { %v985_v8 = vrot.slane %v3127_v42, 1  ;;  %v986_v0 = vrot.slane %v3127_v42, 2  ;;  %v987_v45 = vrot.slane %v3127_v42, 3  ;;  %v1000_v60 = vadd.f32 %v3127_v42, %v2966_v61 }
 0x17d   :  { %v1070_v29 = vrot.slane %v1059_v23, 3  ;;  %v988_v28 = vrot.slane %v3127_v42, 4  ;;  %v989_v61 = vrot.slane %v3127_v42, 5  ;;  %v990_v4 = vrot.slane %v3127_v42, 6 }
 0x17e   :  { %v1001_v55 = vadd.f32 %v985_v8, %v863_v1  ;;  %v1002_v33 = vadd.f32 %v986_v0, %v876_v48  ;;  %v1003_v12 = vadd.f32 %v987_v45, %v889_v27  ;;  %v902_v1 = vadd.f32 %v901_v6, %v900_v43  ;;  %v3822_v48 = vld [vmem:[#allocation13_spill] sm:$0xff] }
 0x17f   :  { %v1071_v47 = vsel %vm976_vm5, %v1070_v29, %v1069_v5  ;;  %v1014_v11 = vadd.f32 %v2902_v36, %v1000_v60  ;;  %v940_v20 = vrot.slane %v939_v18, 1  ;;  %v1005_v25 = vadd.f32 %v989_v61, %v915_v2  ;;  %v3827_v2 = vld [vmem:[#allocation18_spill] sm:$0xff] }
 0x180   :  { %v1073_v59 = vsel %vm978_vm6, %v1072_v57, %v1071_v47  ;;  %v1015_v32 = vadd.f32 %v2902_v36, %v1001_v55  ;;  %v1016_v58 = vadd.f32 %v2902_v36, %v1002_v33  ;;  %v1004_v57 = vadd.f32 %v988_v28, %v902_v1  ;;  %v3823_v55 = vld [vmem:[#allocation14_spill] sm:$0xff]  ;;  %v3825_v1 = vld [vmem:[#allocation16_spill] sm:$0xff] }
 0x181   :  { %v1075_v17 = vsel %vm980_vm7, %v1074_v21, %v1073_v59  ;;  %v1017_v53 = vadd.f32 %v2902_v36, %v1003_v12  ;;  %v1167_v44 = vpack.c.bf16 %v1014_v11, %v1014_v11  ;;  %v928_v62 = vadd.f32 %v927_v34, %v926_v51  ;;  %v3824_v59 = vld [vmem:[#allocation15_spill] sm:$0xff] }
 0x182   :  { %v1076_v22 = vpack.c.b16 %v1075_v17, %v1075_v17  ;;  %v1168_v9 = vpack.c.bf16 %v1015_v32, %v1015_v32  ;;  %v1169_v41 = vpack.c.bf16 %v1016_v58, %v1016_v58  ;;  %v1018_v24 = vadd.f32 %v2902_v36, %v1004_v57 }
 0x183   :  { %v991_v40 = vrot.slane %v3127_v42, 7  ;;  %v1170_v8 = vpack.c.bf16 %v1017_v53, %v1017_v53  ;;  %v1006_v19 = vadd.f32 %v990_v4, %v928_v62  ;;  %v941_v35 = vadd.f32 %v940_v20, %v939_v18 }
 0x184   :  { %2437 = vmatmul.mubr.bf16.vlgmr.msra.gmra.mxu1 %v1076_v22  ;;  %v1184_v43 = vunpack.c.l.b16 %v1168_v9  ;;  %v1185_v23 = vunpack.c.l.b16 %v1169_v41  ;;  %v1019_v29 = vadd.f32 %v2902_v36, %v1005_v25  ;;  %v1183_v45 = vunpack.c.l.b16 %v1167_v44  ;;  %v3826_v9 = vld [vmem:[#allocation17_spill] sm:$0xff] }
 0x185   :  { %2441 = vmatpush3.bf16.msra.mxu1 %v3820_v13  ;;  %2456 = vmatprep.mubr.msk.bf16.mxu1 %vm2627_vm0, %v3821_v49  ;;  %v1171_v6 = vpack.c.bf16 %v1018_v24, %v1018_v24  ;;  %v1007_v33 = vadd.f32 %v991_v40, %v941_v35  ;;  %v1186_v27 = vunpack.c.l.b16 %v1170_v8  ;;  %v1020_v42 = vadd.f32 %v2902_v36, %v1006_v19 }
 0x186   :  { %2442 = vmatprep.subr.bf16.mxu1 %v3821_v49  ;;  %v1191_v0 = vrot.slane %v1184_v43, 7  ;;  %v1193_v5 = vrot.slane %v1185_v23, 6  ;;  %v1172_v21 = vpack.c.bf16 %v1019_v29, %v1019_v29  ;;  %v3828_v43 = vld [vmem:[#allocation19_spill] sm:$0xff] }
 0x187   :  { %v1187_v60 = vunpack.c.l.b16 %v1171_v6  ;;  %v1021_v28 = vadd.f32 %v2902_v36, %v1007_v33  ;;  %v1195_v32 = vrot.slane %v1186_v27, 5  ;;  %v1173_v38 = vpack.c.bf16 %v1020_v42, %v1020_v42  ;;  %v3830_v27 = vld [vmem:[#allocation54_spill] sm:$0xff] }
 0x188   :  { %v1192_v47 = vsel %vm968_vm1, %v1191_v0, %v1183_v45  ;;  %v1188_v17 = vunpack.c.l.b16 %v1172_v21  ;;  %v2628_v45 = vmov 1966171168  }
 0x189   :  { %2443 = vmatpush3.bf16.msra.mxu1 %v3822_v48  ;;  %v1194_v51 = vsel %vm970_vm2, %v1193_v5, %v1192_v47  ;;  %v1197_v58 = vrot.slane %v1187_v60, 4  ;;  %v1174_v22 = vpack.c.bf16 %v1021_v28, %v1021_v28  ;;  %v1189_v18 = vunpack.c.l.b16 %v1173_v38  ;;  %v3829_v5 = vld [vmem:[#allocation55_spill] sm:$0xff] }
 0x18a   :  { %2444 = vmatprep.subr.bf16.mxu1 %v3821_v49  ;;  %v1196_v12 = vsel %vm972_vm3, %v1195_v32, %v1194_v51  ;;  %v1199_v11 = vrot.slane %v1188_v17, 3  ;;  %v1272_v6 = vunpack.c.l.s4 %v2628_v45  ;;  %v1261_v47 = vrot.slane %v3830_v27, %v2864_v39  ;;  %v3835_v45 = vld [vmem:[#allocation25_spill] sm:$0xff] }
 0x18b   :  { %v1198_v61 = vsel %vm974_vm4, %v1197_v58, %v1196_v12  ;;  %v1190_v36 = vunpack.c.l.b16 %v1174_v22  ;;  %v1201_v57 = vrot.slane %v1189_v18, 2  ;;  %v1266_v21 = vsub.s32 2, %v3829_v5 }
 0x18c   :  { %v1200_v34 = vsel %vm976_vm5, %v1199_v11, %v1198_v61  ;;  %v1273_v33 = vunpack.c.0.s8 %v1272_v6 }
 0x18d   :  { %2445 = vmatpush3.bf16.msra.mxu1 %v3823_v55  ;;  %v1202_v41 = vsel %vm978_vm6, %v1201_v57, %v1200_v34  ;;  %v1203_v13 = vrot.slane %v1190_v36, 1  ;;  %v1255_v55 = vsub.s32 1, %v3829_v5  ;;  %v1267_v32 = vrot.slane %v3830_v27, %v1266_v21  ;;  %v3839_v21 = vld [vmem:[#allocation31_spill] sm:$0xff] }
 0x18e   :  { %2446 = vmatprep.subr.bf16.mxu1 %v3821_v49  ;;  %v3185_v60 = vsub.s32 %v1273_v33, %v3829_v5  ;;  %v3836_v5 = vld [vmem:[#allocation28_spill] sm:$0xff] }
 0x18f   :  { %v1204_v53 = vsel %vm980_vm7, %v1203_v13, %v1202_v41  ;;  %v1256_v42 = vrot.slane %v3830_v27, %v1255_v55  ;;  %v3837_v33 = vld [vmem:[#allocation24_spill] sm:$0xff] }
 0x190   :  { %v1205_v4 = vpack.c.b16 %v1204_v53, %v1204_v53 }
 0x191   :  { %2447 = vmatpush3.bf16.msra.mxu1 %v3824_v59 }
 0x192   :  { %2448 = vmatprep.subr.bf16.mxu1 %v3821_v49 }
 0x195   :  { %2449 = vmatpush3.bf16.msra.mxu1 %v3825_v1 }
 0x196   :  { %2450 = vmatprep.subr.bf16.mxu1 %v3821_v49 }
 0x199   :  { %2451 = vmatpush3.bf16.msra.mxu1 %v3826_v9 }
 0x19a   :  { %2452 = vmatprep.subr.bf16.mxu1 %v3821_v49 }
 0x19d   :  { %2453 = vmatpush3.bf16.msra.mxu1 %v3827_v2 }
 0x19e   :  { %2454 = vmatprep.subr.bf16.mxu1 %v3821_v49 }
 0x1a1   :  { %2455 = vmatpush3.bf16.msra.mxu1 %v3828_v43 }
 0x1a4   :  { %2457 = vmatmul.mubr.bf16.vlgmr.msra.gmra.mxu1 %v1205_v4 }
 0x244   :  { %v1160_v20 = vpop.f32.mrf.mxu1 }
 0x245   :  { %v1166_v24 = vmul.f32 0.00390625, %v1160_v20 }
 0x246   :  { %v2438_v25 = vpop.f32.mrf.mxu1 }
 0x247   :  { %v1248_v48 = vmul.f32 %v1166_v24, %v1166_v24  ;;  %v1262_v59 = vsub.f32 %v1261_v47, %v1166_v24  ;;  %v3838_v47 = vld [vmem:[#allocation27_spill] sm:$0xff] }
 0x248   :  { %v1163_v44 = vpop.f32.mrf.mxu1 }
 0x24a   :  { %v2439_v62 = vpop.f32.mrf.mxu1 }
 0x24b   :  { %v3831_v62 = vld [vmem:[#allocation21_spill] sm:$0xff] }
 0x264   :  { %v1241_v23 = vpop.f32.mrf.mxu1 }
 0x265   :  { %v1247_v40 = vmul.f32 0.00390625, %v1241_v23  ;;  %v3832_v23 = vld [vmem:[#allocation23_spill] sm:$0xff] }
 0x266   :  { %v2458_v8 = vpop.f32.mrf.mxu1 }
 0x267   :  { %v1249_v0 = vsub.f32 %v1247_v40, %v1248_v48 }
 0x268   :  { %v1244_v19 = vpop.f32.mrf.mxu1 }
 0x269   :  { %v1250_v35 = vmax.f32 %v1249_v0, 0.0  ;;  %v3833_v0 = vld [vmem:[#allocation20_spill] sm:$0xff] }
 0x26a   :  { %v2459_v29 = vpop.f32.mrf.mxu1 }
 0x26b   :  { %v1251_v49 = vadd.f32 1e-05, %v1250_v35  ;;  %v3834_v35 = vld [vmem:[#allocation22_spill] sm:$0xff] }
 0x26d   :  { %2533 = vrsqrt.f32 %v1251_v49 }
 0x27a   :  { %v2534_v51 = vpop.eup %2533 }
 0x27b   :  { %v1257_v28 = vmul.f32 %v2534_v51, %v1256_v42 }
 0x27d   :  { %v1263_v38 = vmul.f32 %v1262_v59, %v1257_v28  ;;  %v1270_v17 = vcombine.high %v1257_v28, %v1257_v28  ;;  %v1277_v12 = vrot.slane %v1257_v28, %v3185_v60  ;;  %v3840_v59 = vld [vmem:[#allocation34_spill] sm:$0xff] }
 0x27f   :  { %v1284_v58 = vrot.slane %v1270_v17, %v3185_v60  ;;  %v1285_v1 = vcombine.high %v1277_v12, %v1277_v12  ;;  %v1293_v22 = vrot.slane %v1277_v12, %v3185_v60  ;;  %v3191_v18 = vadd.f32 %v1267_v32, %v1263_v38  ;;  %v3841_v32 = vld [vmem:[#allocation30_spill] sm:$0xff]  ;;  %v3842_v17 = vld [vmem:[#allocation33_spill] sm:$0xff] }
 0x281   :  { %v1286_v61 = vcombine.high %v1284_v58, %v1284_v58  ;;  %v1300_v11 = vrot.slane %v1284_v58, %v3185_v60  ;;  %v1307_v9 = vrot.slane %v1285_v1, %v3185_v60  ;;  %v1315_v36 = vcombine.high %v1293_v22, %v1293_v22  ;;  %v3843_v58 = vld [vmem:[#allocation37_spill] sm:$0xff] }
 0x282   :  { %v1322_v34 = vrot.slane %v1293_v22, %v2864_v39  ;;  %v3203_v20 = vrot.slane %v3191_v18, %v3185_v60  ;;  %v3844_v22 = vld [vmem:[#allocation40_spill] sm:$0xff] }
 0x283   :  { %v1314_v57 = vrot.slane %v1286_v61, %v3185_v60  ;;  %v1316_v41 = vcombine.high %v1300_v11, %v1300_v11  ;;  %v1317_v2 = vcombine.high %v1307_v9, %v1307_v9  ;;  %v1326_v43 = vrot.slane %v1307_v9, %v2864_v39 }
 0x284   :  { %v1330_v4 = vrot.slane %v1315_v36, %v2864_v39  ;;  %v1338_v44 = vrot.slane %v1300_v11, %v2864_v39  ;;  %v3208_v24 = vmul.f32 %v1322_v34, %v3831_v62  ;;  %v3211_v48 = vmul.f32 %v1322_v34, %v3832_v23  ;;  %v3845_v11 = vld [vmem:[#allocation36_spill] sm:$0xff]  ;;  %v3846_v36 = vld [vmem:[#allocation39_spill] sm:$0xff]  ;;  %v3849_v62 = vld [vmem:[#allocation42_spill] sm:$0xff] }
 0x285   :  { %v1318_v53 = vcombine.high %v1314_v57, %v1314_v57  ;;  %v1334_v25 = vrot.slane %v1317_v2, %v2864_v39  ;;  %v1342_v40 = vrot.slane %v1314_v57, %v2864_v39  ;;  %v1346_v8 = vrot.slane %v1316_v41, %v2864_v39  ;;  %v3847_v57 = vld [vmem:[#allocation43_spill] sm:$0xff]  ;;  %v3848_v2 = vld [vmem:[#allocation46_spill] sm:$0xff] }
 0x286   :  { %v3216_v19 = vmul.f32 %v3833_v0, %v1322_v34  ;;  %v3219_v29 = vmul.f32 %v3834_v35, %v1322_v34  ;;  %v3225_v6 = vmul.f32 %v1322_v34, %v3835_v45  ;;  %v3228_v55 = vmul.f32 %v1322_v34, %v3836_v5  ;;  %v3850_v0 = vld [vmem:[#allocation45_spill] sm:$0xff] }
 0x287   :  { %v3222_v49 = vrot.slane %v1318_v53, %v2864_v39  ;;  %v3231_v27 = vmul.f32 %v3837_v33, %v1322_v34  ;;  %v3234_v42 = vmul.f32 %v3838_v47, %v1322_v34  ;;  %v3237_v51 = vmul.f32 %v1326_v43, %v3839_v21  ;;  %v3851_v33 = vld [vmem:[#allocation49_spill] sm:$0xff]  ;;  %v3852_v21 = vld [vmem:[#allocation52_spill] sm:$0xff] }
 0x288   :  { %v3240_v28 = vmul.f32 %v1326_v43, %v3840_v59  ;;  %v3243_v38 = vmul.f32 %v3841_v32, %v1326_v43  ;;  %v3246_v12 = vmul.f32 %v3842_v17, %v1326_v43  ;;  %v3249_v1 = vmul.f32 %v1326_v43, %v3843_v58  ;;  %v3853_v32 = vld [vmem:[#allocation57_spill] sm:$0xff]  ;;  %v3854_v58 = vld [vmem:[#allocation51_spill] sm:$0xff] }
 0x289   :  { %v3252_v61 = vmul.f32 %v1326_v43, %v3844_v22  ;;  %v3255_v9 = vmul.f32 %v3845_v11, %v1326_v43  ;;  %v3258_v34 = vmul.f32 %v3846_v36, %v1326_v43  ;;  %v3261_v41 = vmul.f32 %v1330_v4, %v3847_v57 }
 0x28a   :  { %v3264_v53 = vmul.f32 %v1330_v4, %v3848_v2  ;;  %v3267_v23 = vmul.f32 %v3849_v62, %v1330_v4  ;;  %v3270_v35 = vmul.f32 %v3850_v0, %v1330_v4  ;;  %v3273_v45 = vmul.f32 %v1330_v4, %v2807_v10  ;;  %v3855_v10 = vld [vmem:[#allocation56_spill] sm:$0xff] }
 0x28b   :  { %v3276_v5 = vmul.f32 %v1330_v4, %v2822_v30  ;;  %v3279_v43 = vmul.f32 %v2803_v3, %v1330_v4  ;;  %v3282_v47 = vmul.f32 %v3851_v33, %v1330_v4  ;;  %v3285_v59 = vmul.f32 %v1334_v25, %v3852_v21  ;;  %v3856_v30 = vld [vmem:[#allocation59_spill] sm:$0xff]  ;;  %v3857_v3 = vld [vmem:[#allocation61_spill] sm:$0xff]  ;;  %v3858_v62 = vld [vmem:[#allocation64_spill] sm:$0xff] }
 0x28c   :  { %v3288_v17 = vmul.f32 %v1334_v25, %v3853_v32  ;;  %v3291_v22 = vmul.f32 %v3854_v58, %v1334_v25  ;;  %v3294_v11 = vmul.f32 %v3855_v10, %v1334_v25  ;;  %v3297_v36 = vmul.f32 %v1334_v25, %v3856_v30  ;;  %v3859_v33 = vld [vmem:[#allocation66_spill] sm:$0xff]  ;;  %v3860_v32 = vld [vmem:[#allocation63_spill] sm:$0xff]  ;;  %v3862_v10 = vld [vmem:[#allocation65_spill] sm:$0xff] }
 0x28d   :  { %v3300_v57 = vmul.f32 %v1334_v25, %v3857_v3  ;;  %v3303_v4 = vmul.f32 %v2875_v16, %v1334_v25  ;;  %v3306_v2 = vmul.f32 %v2894_v14, %v1334_v25  ;;  %v3309_v0 = vmul.f32 %v1338_v44, %v3858_v62  ;;  %v3863_v3 = vld [vmem:[#allocation67_spill] sm:$0xff]  ;;  %v3864_v62 = vld [vmem:[#allocation68_spill] sm:$0xff] }
 0x28e   :  { %v3312_v21 = vmul.f32 %v1338_v44, %v3859_v33  ;;  %v3315_v58 = vmul.f32 %v3860_v32, %v1338_v44  ;;  %v3318_v30 = vmul.f32 %v3862_v10, %v1338_v44  ;;  %v3321_v13 = vmul.f32 %v1338_v44, %v3863_v3  ;;  %v3865_v32 = vld [vmem:[#allocation69_spill] sm:$0xff] }
 0x28f   :  { %v3324_v16 = vmul.f32 %v1338_v44, %v3011_v31  ;;  %v3327_v14 = vmul.f32 %v2986_v63, %v1338_v44  ;;  %v3330_v25 = vmul.f32 %v3005_v37, %v1338_v44  ;;  %v3333_v33 = vmul.f32 %v1342_v40, %v3864_v62  ;;  %v3871_v62 = vld [vmem:[#allocation29_spill] sm:$0xff] }
 0x290   :  { %3861 = vst [vmem:[#allocation12_spill] sm:$0xff] %v3315_v58  ;;  %v3336_v58 = vmul.f32 %v1342_v40, %v3865_v32  ;;  %v3339_v10 = vmul.f32 %v3022_v26, %v1342_v40  ;;  %v3342_v3 = vmul.f32 %v3044_v7, %v1342_v40  ;;  %v3345_v31 = vmul.f32 %v1342_v40, %v2714_v52  ;;  %v3873_v26 = vld [vmem:[#allocation35_spill] sm:$0xff]  ;;  %v3875_v7 = vld [vmem:[#allocation26_spill] sm:$0xff]  ;;  %v3876_v52 = vld [vmem:[#allocation32_spill] sm:$0xff] }
 0x291   :  { %v3348_v63 = vmul.f32 %v1342_v40, %v2722_v56  ;;  %v3351_v37 = vmul.f32 %v2710_v50, %v1342_v40  ;;  %v3354_v44 = vmul.f32 %v2718_v54, %v1342_v40  ;;  %v3357_v32 = vmul.f32 %v1346_v8, %v3871_v62  ;;  %v3877_v56 = vld [vmem:[#allocation41_spill] sm:$0xff]  ;;  %v3879_v50 = vld [vmem:[#allocation47_spill] sm:$0xff]  ;;  %v3881_v54 = vld [vmem:[#allocation38_spill] sm:$0xff] }
 0x292   :  { %3866 = vst [vmem:[#allocation13_spill] sm:$0xff] %v3339_v10  ;;  %3867 = vst [vmem:[#allocation14_spill] sm:$0xff] %v3342_v3  ;;  %v3360_v10 = vmul.f32 %v1346_v8, %v3873_v26  ;;  %v3363_v3 = vmul.f32 %v3875_v7, %v1346_v8  ;;  %v3375_v40 = vmul.f32 %v3881_v54, %v1346_v8  ;;  %v3883_v62 = vld [vmem:[#allocation44_spill] sm:$0xff]  ;;  %v3885_v26 = vld [vmem:[#allocation50_spill] sm:$0xff] }
 0x293   :  { %3868 = vst [vmem:[#allocation15_spill] sm:$0xff] %v3345_v31  ;;  %3869 = vst [vmem:[#allocation16_spill] sm:$0xff] %v3348_v63  ;;  %v3366_v31 = vmul.f32 %v3876_v52, %v1346_v8  ;;  %v3369_v63 = vmul.f32 %v1346_v8, %v3877_v56  ;;  %v3887_v7 = vld [vmem:[#allocation58_spill] sm:$0xff]  ;;  %v3889_v56 = vcombine.high %v3191_v18, %v3191_v18 }
 0x294   :  { %3870 = vst [vmem:[#allocation17_spill] sm:$0xff] %v3351_v37  ;;  %3872 = vst [vmem:[#allocation18_spill] sm:$0xff] %v3357_v32  ;;  %v3372_v37 = vmul.f32 %v1346_v8, %v3879_v50  ;;  %v3378_v32 = vmul.f32 %v3883_v62, %v1346_v8  ;;  %v3386_v52 = vmul.f32 %v3222_v49, %v3887_v7  ;;  %v3892_v8 = vld [vmem:[#allocation53_spill] sm:$0xff] }
 0x295   :  { %3874 = vst [vmem:[#allocation19_spill] sm:$0xff] %v3360_v10  ;;  %3878 = vst [vmem:[#allocation55_spill] sm:$0xff] %v3369_v63  ;;  %v3382_v10 = vmul.f32 %v3222_v49, %v3885_v26  ;;  %v1438_v50 = vrot.slane %v3889_v56, %v3185_v60  ;;  %v3398_v62 = vmul.f32 %v3892_v8, %v3222_v49  ;;  %v3897_v8 = vld [vmem:[#allocation60_spill] sm:$0xff] }
 0x296   :  { %3880 = vst [vmem:[#allocation54_spill] sm:$0xff] %v3372_v37  ;;  %3882 = vst [vmem:[#allocation21_spill] sm:$0xff] %v3375_v40  ;;  %v3890_v37 = vld [vmem:[#allocation48_spill] sm:$0xff]  ;;  %v1439_v26 = vcombine.high %v3203_v20, %v3203_v20  ;;  %v1447_v7 = vrot.slane %v3203_v20, %v3185_v60  ;;  %v3410_v18 = vmul.f32 %v3222_v49, %v2971_v15 }
 0x297   :  { %3884 = vst [vmem:[#allocation23_spill] sm:$0xff] %v3378_v32  ;;  %3886 = vst [vmem:[#allocation20_spill] sm:$0xff] %v3382_v10  ;;  %v3394_v54 = vmul.f32 %v3890_v37, %v3222_v49  ;;  %v1440_v37 = vcombine.high %v1438_v50, %v1438_v50  ;;  %v1454_v56 = vrot.slane %v1438_v50, %v3185_v60 }
 0x298   :  { %3888 = vst [vmem:[#allocation22_spill] sm:$0xff] %v3386_v52  ;;  %3893 = vst [vmem:[#allocation28_spill] sm:$0xff] %v3398_v62  ;;  %v3894_v52 = vld [vmem:[#allocation62_spill] sm:$0xff]  ;;  %v3415_v62 = vmul.f32 %v3897_v8, %v3222_v49  ;;  %v1469_v32 = vcombine.high %v1447_v7, %v1447_v7  ;;  %v1476_v20 = vrot.slane %v1447_v7, %v2864_v39 }
 0x299   :  { %3891 = vst [vmem:[#allocation25_spill] sm:$0xff] %v3394_v54  ;;  %v3406_v10 = vmul.f32 %v3222_v49, %v3894_v52  ;;  %3896 = vst [vmem:[#allocation27_spill] sm:$0xff] %v3410_v18  ;;  %v1461_v54 = vrot.slane %v1439_v26, %v3185_v60  ;;  %v3421_v52 = vmul.f32 %v2943_v46, %v3222_v49 }
 0x29a   :  { %3898 = vst [vmem:[#allocation31_spill] sm:$0xff] %v3415_v62  ;;  %v1470_v15 = vcombine.high %v1454_v56, %v1454_v56  ;;  %v1492_v18 = vrot.slane %v1454_v56, %v2864_v39  ;;  %v1484_v8 = vrot.slane %v1469_v32, %v2864_v39  ;;  %v3428_v62 = vadd.f32 %v1476_v20, %v3208_v24 }
 0x29b   :  { %3895 = vst [vmem:[#allocation24_spill] sm:$0xff] %v3406_v10  ;;  %v1468_v10 = vrot.slane %v1440_v37, %v3185_v60  ;;  %v1471_v40 = vcombine.high %v1461_v54, %v1461_v54  ;;  %v1480_v50 = vrot.slane %v1461_v54, %v2864_v39  ;;  %v3433_v46 = vadd.f32 %v1476_v20, %v3211_v48 }
 0x29c   :  { %v1500_v63 = vrot.slane %v1470_v15, %v2864_v39  ;;  %v3437_v49 = vadd.f32 %v1476_v20, %v3216_v19  ;;  %v3440_v54 = vadd.f32 %v1476_v20, %v3219_v29  ;;  %v3443_v32 = vadd.f32 %v1476_v20, %v3225_v6 }
 0x29d   :  { %v1472_v26 = vcombine.high %v1468_v10, %v1468_v10  ;;  %v1496_v7 = vrot.slane %v1468_v10, %v2864_v39  ;;  %v1488_v60 = vrot.slane %v1471_v40, %v2864_v39  ;;  %v3447_v10 = vadd.f32 %v1476_v20, %v3228_v55 }
 0x29e   :  { %v3450_v37 = vadd.f32 %v1476_v20, %v3231_v27  ;;  %v3453_v48 = vadd.f32 %v1476_v20, %v3234_v42  ;;  %v3456_v19 = vadd.f32 %v1480_v50, %v3237_v51  ;;  %v3459_v29 = vadd.f32 %v1480_v50, %v3240_v28 }
 0x29f   :  { %v1504_v24 = vrot.slane %v1472_v26, %v2864_v39  ;;  %v3462_v6 = vadd.f32 %v1480_v50, %v3243_v38  ;;  %v3465_v39 = vadd.f32 %v1480_v50, %v3246_v12  ;;  %v3468_v55 = vadd.f32 %v1480_v50, %v3249_v1 }
 0x2a0   :  { %v3471_v27 = vadd.f32 %v1480_v50, %v3252_v61  ;;  %v3474_v42 = vadd.f32 %v1480_v50, %v3255_v9  ;;  %v3477_v51 = vadd.f32 %v1480_v50, %v3258_v34  ;;  %v3480_v28 = vadd.f32 %v1484_v8, %v3261_v41 }
 0x2a1   :  { %v3483_v38 = vadd.f32 %v1484_v8, %v3264_v53  ;;  %v3486_v12 = vadd.f32 %v1484_v8, %v3267_v23  ;;  %v3489_v1 = vadd.f32 %v1484_v8, %v3270_v35  ;;  %v3492_v61 = vadd.f32 %v1484_v8, %v3273_v45 }
 0x2a2   :  { %v3495_v9 = vadd.f32 %v1484_v8, %v3276_v5  ;;  %v3498_v34 = vadd.f32 %v1484_v8, %v3279_v43  ;;  %v3501_v41 = vadd.f32 %v1484_v8, %v3282_v47  ;;  %v3504_v53 = vadd.f32 %v1488_v60, %v3285_v59 }
 0x2a3   :  { %v3507_v23 = vadd.f32 %v1488_v60, %v3288_v17  ;;  %v3510_v35 = vadd.f32 %v1488_v60, %v3291_v22  ;;  %v3513_v45 = vadd.f32 %v1488_v60, %v3294_v11  ;;  %v3516_v5 = vadd.f32 %v1488_v60, %v3297_v36  ;;  %v3899_v11 = vld [vmem:[#allocation12_spill] sm:$0xff] }
 0x2a4   :  { %v3519_v43 = vadd.f32 %v1488_v60, %v3300_v57  ;;  %v3522_v47 = vadd.f32 %v1488_v60, %v3303_v4  ;;  %v3525_v59 = vadd.f32 %v1488_v60, %v3306_v2  ;;  %v3528_v17 = vadd.f32 %v1492_v18, %v3309_v0  ;;  %v3908_v60 = vld [vmem:[#allocation19_spill] sm:$0xff] }
 0x2a5   :  { %v3531_v22 = vadd.f32 %v1492_v18, %v3312_v21  ;;  %v3534_v40 = vadd.f32 %v1492_v18, %v3899_v11  ;;  %v3537_v36 = vadd.f32 %v1492_v18, %v3318_v30  ;;  %v3540_v57 = vadd.f32 %v1492_v18, %v3321_v13  ;;  %v3900_v30 = vld [vmem:[#allocation13_spill] sm:$0xff]  ;;  %v3901_v13 = vld [vmem:[#allocation14_spill] sm:$0xff] }
 0x2a6   :  { %v3543_v4 = vadd.f32 %v1492_v18, %v3324_v16  ;;  %v3546_v2 = vadd.f32 %v1492_v18, %v3327_v14  ;;  %v3549_v0 = vadd.f32 %v1492_v18, %v3330_v25  ;;  %v3552_v21 = vadd.f32 %v1496_v7, %v3333_v33  ;;  %v3902_v16 = vld [vmem:[#allocation15_spill] sm:$0xff]  ;;  %v3903_v14 = vld [vmem:[#allocation16_spill] sm:$0xff]  ;;  %v3904_v25 = vld [vmem:[#allocation17_spill] sm:$0xff] }
 0x2a7   :  { %v3555_v56 = vadd.f32 %v1496_v7, %v3336_v58  ;;  %v3558_v20 = vadd.f32 %v1496_v7, %v3900_v30  ;;  %v3561_v15 = vadd.f32 %v1496_v7, %v3901_v13  ;;  %v3564_v50 = vadd.f32 %v1496_v7, %v3902_v16  ;;  %v3906_v58 = vld [vmem:[#allocation18_spill] sm:$0xff]  ;;  %v3912_v16 = vld [vmem:[#allocation55_spill] sm:$0xff] }
 0x2a8   :  { %v3567_v8 = vadd.f32 %v1496_v7, %v3903_v14  ;;  %v3570_v18 = vadd.f32 %v1496_v7, %v3904_v25  ;;  %v3573_v33 = vadd.f32 %v1496_v7, %v3354_v44  ;;  %v3576_v26 = vadd.f32 %v1500_v63, %v3906_v58  ;;  %v3914_v25 = vld [vmem:[#allocation54_spill] sm:$0xff]  ;;  %v3916_v44 = vld [vmem:[#allocation21_spill] sm:$0xff]  ;;  %v3918_v58 = vld [vmem:[#allocation23_spill] sm:$0xff] }
 0x2a9   :  { %v3579_v11 = vadd.f32 %v1500_v63, %v3908_v60  ;;  %v3582_v30 = vadd.f32 %v1500_v63, %v3363_v3  ;;  %v3585_v13 = vadd.f32 %v1500_v63, %v3366_v31  ;;  %v3588_v14 = vadd.f32 %v1500_v63, %v3912_v16  ;;  %v3919_v60 = vld [vmem:[#allocation20_spill] sm:$0xff]  ;;  %v3920_v3 = vld [vmem:[#allocation22_spill] sm:$0xff]  ;;  %v3921_v31 = vld [vmem:[#allocation25_spill] sm:$0xff] }
 0x2aa   :  { %3905 = vst [vmem:[#allocation34_spill] sm:$0xff] %v3570_v18  ;;  %3907 = vst [vmem:[#allocation30_spill] sm:$0xff] %v3576_v26  ;;  %v3591_v18 = vadd.f32 %v1500_v63, %v3914_v25  ;;  %v3594_v7 = vadd.f32 %v1500_v63, %v3916_v44  ;;  %v3597_v26 = vadd.f32 %v1500_v63, %v3918_v58  ;;  %v3922_v16 = vld [vmem:[#allocation28_spill] sm:$0xff]  ;;  %v3924_v44 = vld [vmem:[#allocation27_spill] sm:$0xff] }
 0x2ab   :  { %3909 = vst [vmem:[#allocation33_spill] sm:$0xff] %v3579_v11  ;;  %3910 = vst [vmem:[#allocation37_spill] sm:$0xff] %v3582_v30  ;;  %v3600_v11 = vadd.f32 %v1504_v24, %v3919_v60  ;;  %v3603_v30 = vadd.f32 %v1504_v24, %v3920_v3  ;;  %v3923_v25 = vld [vmem:[#allocation24_spill] sm:$0xff]  ;;  %v3925_v63 = vld [vmem:[#allocation31_spill] sm:$0xff]  ;;  %v3621_v60 = vadd.f32 %v1504_v24, %v3421_v52 }
 0x2ac   :  { %3911 = vst [vmem:[#allocation40_spill] sm:$0xff] %v3585_v13  ;;  %3913 = vst [vmem:[#allocation36_spill] sm:$0xff] %v3588_v14  ;;  %v3606_v13 = vadd.f32 %v1504_v24, %v3921_v31  ;;  %v3609_v14 = vadd.f32 %v1504_v24, %v3922_v16  ;;  %v3618_v58 = vadd.f32 %v1504_v24, %v3925_v63 }
 0x2ad   :  { %3915 = vst [vmem:[#allocation39_spill] sm:$0xff] %v3591_v18  ;;  %3917 = vst [vmem:[#allocation43_spill] sm:$0xff] %v3594_v7  ;;  %v3612_v18 = vadd.f32 %v1504_v24, %v3923_v25  ;;  %v3615_v7 = vadd.f32 %v1504_v24, %v3924_v44  ;;  %v2094_v3 = vpack.c.bf16 %v3433_v46, %v3428_v62 }
 0x2ae   :  { %v2099_v31 = vpack.c.bf16 %v3440_v54, %v3437_v49  ;;  %v2104_v16 = vpack.c.bf16 %v3447_v10, %v3443_v32  ;;  %v2109_v25 = vpack.c.bf16 %v3453_v48, %v3450_v37  ;;  %v2114_v44 = vpack.c.bf16 %v3459_v29, %v3456_v19 }
 0x2af   :  { %v2119_v63 = vpack.c.bf16 %v3465_v39, %v3462_v6  ;;  %v2124_v52 = vpack.c.bf16 %v3471_v27, %v3468_v55  ;;  %v2129_v62 = vpack.c.bf16 %v3477_v51, %v3474_v42  ;;  %2095 = vst [vmem:[#allocation8] sm:$0xff] %v2094_v3   ;;  %v2134_v46 = vpack.c.bf16 %v3483_v38, %v3480_v28 }
 0x2b0   :  { %2251 = vst [vmem:[#allocation8 + $0x8] sm:$0xff] %v2099_v31   ;;  %2252 = vst [vmem:[#allocation8 + $0x10] sm:$0xff] %v2104_v16   ;;  %v2139_v49 = vpack.c.bf16 %v3489_v1, %v3486_v12  ;;  %v2144_v54 = vpack.c.bf16 %v3495_v9, %v3492_v61  ;;  %v2149_v32 = vpack.c.bf16 %v3501_v41, %v3498_v34 }
 0x2b1   :  { %2253 = vst [vmem:[#allocation8 + $0x18] sm:$0xff] %v2109_v25   ;;  %2254 = vst [vmem:[#allocation8 + $0x20] sm:$0xff] %v2114_v44   ;;  %v2154_v24 = vpack.c.bf16 %v3507_v23, %v3504_v53  ;;  %v2159_v10 = vpack.c.bf16 %v3513_v45, %v3510_v35  ;;  %v2164_v37 = vpack.c.bf16 %v3519_v43, %v3516_v5  ;;  %v3926_v51 = vld [vmem:[#allocation34_spill] sm:$0xff] }
 0x2b2   :  { %2255 = vst [vmem:[#allocation8 + $0x28] sm:$0xff] %v2119_v63   ;;  %2256 = vst [vmem:[#allocation8 + $0x30] sm:$0xff] %v2124_v52   ;;  %v2169_v48 = vpack.c.bf16 %v3525_v59, %v3522_v47  ;;  %v2174_v19 = vpack.c.bf16 %v3531_v22, %v3528_v17  ;;  %v2179_v29 = vpack.c.bf16 %v3537_v36, %v3534_v40  ;;  %v3927_v38 = vld [vmem:[#allocation30_spill] sm:$0xff]  ;;  %v3928_v12 = vld [vmem:[#allocation33_spill] sm:$0xff] }
 0x2b3   :  { %2257 = vst [vmem:[#allocation8 + $0x38] sm:$0xff] %v2129_v62   ;;  %2258 = vst [vmem:[#allocation8 + $0x40] sm:$0xff] %v2134_v46   ;;  %v2184_v6 = vpack.c.bf16 %v3543_v4, %v3540_v57  ;;  %v2189_v39 = vpack.c.bf16 %v3549_v0, %v3546_v2  ;;  %v2194_v55 = vpack.c.bf16 %v3555_v56, %v3552_v21  ;;  %v3929_v61 = vld [vmem:[#allocation37_spill] sm:$0xff]  ;;  %v3930_v9 = vld [vmem:[#allocation40_spill] sm:$0xff] }
 0x2b4   :  { %2259 = vst [vmem:[#allocation8 + $0x48] sm:$0xff] %v2139_v49   ;;  %2260 = vst [vmem:[#allocation8 + $0x50] sm:$0xff] %v2144_v54   ;;  %v2199_v27 = vpack.c.bf16 %v3561_v15, %v3558_v20  ;;  %v2204_v42 = vpack.c.bf16 %v3567_v8, %v3564_v50  ;;  %v2209_v28 = vpack.c.bf16 %v3573_v33, %v3926_v51  ;;  %v3931_v41 = vld [vmem:[#allocation36_spill] sm:$0xff]  ;;  %v3932_v53 = vld [vmem:[#allocation39_spill] sm:$0xff] }
 0x2b5   :  { %2261 = vst [vmem:[#allocation8 + $0x58] sm:$0xff] %v2149_v32   ;;  %2262 = vst [vmem:[#allocation8 + $0x60] sm:$0xff] %v2154_v24   ;;  %v2214_v1 = vpack.c.bf16 %v3928_v12, %v3927_v38  ;;  %v2219_v34 = vpack.c.bf16 %v3930_v9, %v3929_v61  ;;  %v2224_v23 = vpack.c.bf16 %v3932_v53, %v3931_v41  ;;  %v3933_v35 = vld [vmem:[#allocation43_spill] sm:$0xff] }
 0x2b6   :  { %2263 = vst [vmem:[#allocation8 + $0x68] sm:$0xff] %v2159_v10   ;;  %2264 = vst [vmem:[#allocation8 + $0x70] sm:$0xff] %v2164_v37   ;;  %v2229_v45 = vpack.c.bf16 %v3597_v26, %v3933_v35  ;;  %v2234_v5 = vpack.c.bf16 %v3603_v30, %v3600_v11  ;;  %v2239_v43 = vpack.c.bf16 %v3609_v14, %v3606_v13 }
 0x2b7   :  { %2265 = vst [vmem:[#allocation8 + $0x78] sm:$0xff] %v2169_v48   ;;  %2266 = vst [vmem:[#allocation8 + $0x80] sm:$0xff] %v2174_v19   ;;  %v2244_v47 = vpack.c.bf16 %v3615_v7, %v3612_v18  ;;  %v2249_v59 = vpack.c.bf16 %v3621_v60, %v3618_v58 }
 0x2b8   :  { %2267 = vst [vmem:[#allocation8 + $0x88] sm:$0xff] %v2179_v29   ;;  %2268 = vst [vmem:[#allocation8 + $0x90] sm:$0xff] %v2184_v6  }
 0x2b9   :  { %2269 = vst [vmem:[#allocation8 + $0x98] sm:$0xff] %v2189_v39   ;;  %2270 = vst [vmem:[#allocation8 + $0xa0] sm:$0xff] %v2194_v55  }
 0x2ba   :  { %2271 = vst [vmem:[#allocation8 + $0xa8] sm:$0xff] %v2199_v27   ;;  %2272 = vst [vmem:[#allocation8 + $0xb0] sm:$0xff] %v2204_v42  }
 0x2bb   :  { %2273 = vst [vmem:[#allocation8 + $0xb8] sm:$0xff] %v2209_v28   ;;  %2274 = vst [vmem:[#allocation8 + $0xc0] sm:$0xff] %v2214_v1  }
 0x2bc   :  { %2275 = vst [vmem:[#allocation8 + $0xc8] sm:$0xff] %v2219_v34   ;;  %2276 = vst [vmem:[#allocation8 + $0xd0] sm:$0xff] %v2224_v23  }
 0x2bd   :  { %2277 = vst [vmem:[#allocation8 + $0xd8] sm:$0xff] %v2229_v45   ;;  %2278 = vst [vmem:[#allocation8 + $0xe0] sm:$0xff] %v2234_v5  }
 0x2be   :  { %2279 = vst [vmem:[#allocation8 + $0xe8] sm:$0xff] %v2239_v43   ;;  %2280 = vst [vmem:[#allocation8 + $0xf0] sm:$0xff] %v2244_v47  }
 0x2bf   :  { %2281 = vst [vmem:[#allocation8 + $0xf8] sm:$0xff] %v2249_v59  }
 0x2c0   :  { %2606 = shalt.err (!%p2603_p5)
}
 0x2c1   :  { %1908 = dma.vmem_to_hbm [thread:$0]  %s1903_s5, 4096, %s3697_s4, [#allocation4], %s2623_s20, %s2623_s20, %s2624_s21  }
 0x2c2   :  { %2619 = dma.done.wait [#allocation4], 4096  }
 0x2c3   :  { %2620 = vsyncadd [#allocation4], 4294963200 }
 0x2c4   :  { %1912 = vsyncpa [#allocation3], 1 }
 0x2c5   :  { %1913 = vsyncpa [#allocation6], 1 }
 0x2c6   :  { %1914 = vsyncpa [#allocation4], 1 }

</bundles_post_ra>
